<compile_context>
chip_gen: v6e
topology: v6e:2x2x1
jax: 0.10.0
libtpu: 0.0.40
codegen_flags: <defaults>
</compile_context>

<pallas_src>
import functools

import jax
import jax.numpy as jnp
from jax.experimental import pallas as pl
from jax.experimental.pallas import tpu as pltpu


# ----------------------------- in-kernel helpers ---------------------------

def _leaky(x, ns):
    return jnp.where(x >= 0, x, ns * x)


def _instnorm(x, eps=1e-5):
    # nn.InstanceNorm1d (affine=False): normalize over L (rows) per channel.
    mean = jnp.mean(x, axis=0, keepdims=True)
    var = jnp.mean(jnp.square(x - mean), axis=0, keepdims=True)
    return (x - mean) * jax.lax.rsqrt(var + eps)


def _dot(a, b):
    return jnp.dot(a, b, preferred_element_type=jnp.float32)


# --------------------------------- kernel ----------------------------------

_WNAMES = (
    'w_bank', 'b_bank', 'w_conv2', 'b_conv2',
    'w_conv3', 'b_conv3', 'w_conv4', 'b_conv4',
    'w_conv5', 'b_conv5', 'w_conv6', 'b_conv6',
    'w_conv7', 'b_conv7', 'w_conv8', 'b_conv8',
    'w_dense1', 'b_dense1', 'w_dense2', 'b_dense2',
    'w_dense3', 'b_dense3', 'w_dense4', 'b_dense4',
    'w_ih', 'b_ih', 'w_hh', 'b_hh',
    'w_lin_x', 'w_lin_r', 'b_lin',
    'w_emb', 'b_emb',
)


def _encoder_kernel(ns, x_ref, *refs):
    (w_bank, b_bank, w_c2, b_c2,
     w_c3, b_c3, w_c4, b_c4, w_c5, b_c5, w_c6, b_c6, w_c7, b_c7, w_c8, b_c8,
     w_d1, b_d1, w_d2, b_d2, w_d3, b_d3, w_d4, b_d4,
     w_ih, b_ih, w_hh, b_hh, w_lx, w_lr, b_l,
     w_emb, b_emb,
     y_ref, emb_ref, scr_h, scr_x, scr_rnn) = refs

    L = x_ref.shape[0]
    x = x_ref[...]

    # ---- Stage 1: conv1 bank (k=1..7 embedded in a common 7-tap reflect
    # frame) + identity concat (torch.cat(outs + [x])) + leaky, then
    # conv2(1x1) + leaky + instnorm.  One K=7*c_in matmul for the whole bank.
    xq = jnp.concatenate([x[3:4], x[2:3], x[1:2], x,
                          x[L - 2:L - 1], x[L - 3:L - 2], x[L - 4:L - 3]],
                         axis=0)                                   # (L+6, c_in)
    xw = jnp.concatenate([xq[j:j + L, :] for j in range(7)], axis=1)
    hbank = _leaky(_dot(xw, w_bank[...]) + b_bank[...], ns)        # (L, 7*c_h1+c_in)
    o1 = _instnorm(_leaky(_dot(hbank, w_c2[...]) + b_c2[...], ns))  # (L, c_h2)
    p2 = jnp.mean(o1, axis=0, keepdims=True)

    # ---- conv_block: conv(k=5,s=1)+leaky -> conv(k=5,s=2)+leaky -> instnorm
    # -> + avg_pool(x).  Stride-2 is folded into the tap selection via
    # strided VMEM-scratch reads, so only L/2 output rows are computed.
    def conv_block(xb, Lc, wa, ba, wb_, bb_):
        xp = jnp.concatenate([xb[2:3], xb[1:2], xb,
                              xb[Lc - 2:Lc - 1], xb[Lc - 3:Lc - 2]], axis=0)
        xw5 = jnp.concatenate([xp[j:j + Lc, :] for j in range(5)], axis=1)
        h = _leaky(_dot(xw5, wa[...]) + ba[...], ns)               # (Lc, C)

        hp = jnp.concatenate([h[2:3], h[1:2], h,
                              h[Lc - 2:Lc - 1], h[Lc - 3:Lc - 2]], axis=0)
        scr_h[0:Lc + 4, :] = hp                                    # (Lc+4, C)
        scr_x[0:Lc, :] = xb
        L2 = Lc // 2
        hw = jnp.concatenate(
            [scr_h[pl.ds(j, L2, stride=2), :] for j in range(5)], axis=1)
        ob = _leaky(_dot(hw, wb_[...]) + bb_[...], ns)             # (L2, C)
        x_ds = 0.5 * (scr_x[pl.ds(0, L2, stride=2), :]
                      + scr_x[pl.ds(1, L2, stride=2), :])          # avg_pool1d(k=2)
        o = _instnorm(ob) + x_ds
        return o, jnp.mean(o, axis=0, keepdims=True)

    o2, p4 = conv_block(o1, L, w_c3, b_c3, w_c4, b_c4)
    o3, p6 = conv_block(o2, L // 2, w_c5, b_c5, w_c6, b_c6)
    o4, p8 = conv_block(o3, L // 4, w_c7, b_c7, w_c8, b_c8)

    # ---- dense_block(dense1, dense2) and dense_block(dense3, dense4).
    d = _leaky(_dot(o4, w_d1[...]) + b_d1[...], ns)
    d = _leaky(_dot(d, w_d2[...]) + b_d2[...], ns)
    o5 = _instnorm(d) + o4
    pd2 = jnp.mean(o5, axis=0, keepdims=True)
    d = _leaky(_dot(o5, w_d3[...]) + b_d3[...], ns)
    d = _leaky(_dot(d, w_d4[...]) + b_d4[...], ns)
    o6 = _instnorm(d) + o5
    pd4 = jnp.mean(o6, axis=0, keepdims=True)

    # ---- Bidirectional GRU (PyTorch gate order r,z,n), both directions
    # interleaved per unrolled step with a block-diagonal hidden weight.
    H = w_hh.shape[0] // 2
    L3 = o6.shape[0]
    xproj = _dot(o6, w_ih[...]) + b_ih[...]        # (L3, 6H) = [fwd r,z,n | bwd r,z,n]
    y_pre = _dot(o6, w_lx[...]) + b_l[...]         # x-part of the final Linear
    whh = w_hh[...]
    bhh = b_hh[...]
    h = jnp.zeros((1, 2 * H), jnp.float32)
    for t in range(L3):                            # L3 is tiny after 3x stride-2
        tb = L3 - 1 - t
        gi = jnp.concatenate([xproj[t:t + 1, 0:3 * H],
                              xproj[tb:tb + 1, 3 * H:6 * H]], axis=1)   # (1, 6H)
        gh = _dot(h, whh) + bhh                                          # (1, 6H)
        rf = jax.nn.sigmoid(gi[:, 0:H] + gh[:, 0:H])
        zf = jax.nn.sigmoid(gi[:, H:2 * H] + gh[:, H:2 * H])
        nf = jnp.tanh(gi[:, 2 * H:3 * H] + rf * gh[:, 2 * H:3 * H])
        rb = jax.nn.sigmoid(gi[:, 3 * H:4 * H] + gh[:, 3 * H:4 * H])
        zb = jax.nn.sigmoid(gi[:, 4 * H:5 * H] + gh[:, 4 * H:5 * H])
        nb = jnp.tanh(gi[:, 5 * H:6 * H] + rb * gh[:, 5 * H:6 * H])
        hf = (1.0 - zf) * nf + zf * h[:, 0:H]
        hb = (1.0 - zb) * nb + zb * h[:, H:2 * H]
        h = jnp.concatenate([hf, hb], axis=1)
        scr_rnn[t:t + 1, 0:H] = hf
        scr_rnn[tb:tb + 1, H:2 * H] = hb
    y = _leaky(y_pre + _dot(scr_rnn[...], w_lr[...]), ns)
    y_ref[...] = y

    # ---- All 7 AdaptiveAvgPool+Linear heads: one K=7*C block-diagonal matmul.
    pool_cat = jnp.concatenate([p2, p4, p6, p8, pd2, pd4, pd4], axis=1)  # (1, 7C)
    emb_ref[...] = _dot(pool_cat, w_emb[...]) + b_emb[...]               # (1, 7E)


# ------------------------------ Encoder model -------------------------------

def init_params(key, c_in, c_h1, c_h2, c_h3, emb_size):
    """Raw parameters in PyTorch layout/convention."""
    keys = iter(jax.random.split(key, 64))

    def w(shape, scale=0.1):
        return scale * jax.random.normal(next(keys), shape, dtype=jnp.float32)

    p = {}
    for k in range(1, 8):
        p[f'conv1_{k}'] = (w((c_h1, c_in, k)), w((c_h1,)))
    cat_c = 7 * c_h1 + c_in
    p['conv2'] = (w((c_h2, cat_c, 1)), w((c_h2,)))
    for i in range(3, 9):
        p[f'conv{i}'] = (w((c_h2, c_h2, 5)), w((c_h2,)))
    for name in ['emb2', 'emb4', 'emb6', 'emb8', 'embd2', 'embd4', 'embrnn']:
        p[name] = (w((emb_size, c_h2)), w((emb_size,)))
    for i in range(1, 5):
        p[f'dense{i}'] = (w((c_h2, c_h2)), w((c_h2,)))
    # GRU per direction: W_ih (3H, C), W_hh (3H, H), b_ih (3H,), b_hh (3H,)
    p['gru_fwd'] = (w((3 * c_h3, c_h2)), w((3 * c_h3, c_h3)),
                    w((3 * c_h3,)), w((3 * c_h3,)))
    p['gru_bwd'] = (w((3 * c_h3, c_h2)), w((3 * c_h3, c_h3)),
                    w((3 * c_h3,)), w((3 * c_h3,)))
    p['linear'] = (w((c_h2, c_h2 + 2 * c_h3)), w((c_h2,)))
    return p


def fuse_params(p, c_in, c_h1, c_h2, c_h3, emb_size):
    """One-time weight preprocessing into the fused-kernel layouts."""
    f32 = jnp.float32
    N1 = 7 * c_h1 + c_in
    fp = {}

    # conv1 bank: embed each conv1_k's taps into a common 7-tap reflect frame;
    # rows are tap-major (7*c_in, N1); the last c_in output columns are an
    # identity block at tap 3 (shift 0) = torch.cat(..., x).
    wb = jnp.zeros((7 * c_in, N1), f32)
    bb = jnp.zeros((N1,), f32)
    for k in range(1, 8):
        w, b = p[f'conv1_{k}']                        # (c_h1, c_in, k)
        off = 3 - k // 2                              # left pad of conv-k is k//2
        col = (k - 1) * c_h1
        for m in range(k):
            j = off + m
            wb = wb.at[j * c_in:(j + 1) * c_in, col:col + c_h1].set(
                jnp.transpose(w[:, :, m]))
        bb = bb.at[col:col + c_h1].set(b)
    wb = wb.at[3 * c_in:4 * c_in, 7 * c_h1:].set(jnp.eye(c_in, dtype=f32))
    fp['w_bank'] = wb
    fp['b_bank'] = bb.reshape(1, N1)

    w2, b2 = p['conv2']                               # (c_h2, N1, 1)
    fp['w_conv2'] = jnp.transpose(w2[:, :, 0])        # (N1, c_h2)
    fp['b_conv2'] = b2.reshape(1, c_h2)

    for i in range(3, 9):                             # (c_h2, c_h2, 5) -> (5C, C)
        w, b = p[f'conv{i}']
        fp[f'w_conv{i}'] = jnp.concatenate(
            [jnp.transpose(w[:, :, m]) for m in range(5)], axis=0)
        fp[f'b_conv{i}'] = b.reshape(1, c_h2)

    for i in range(1, 5):
        w, b = p[f'dense{i}']                         # (out, in)
        fp[f'w_dense{i}'] = jnp.transpose(w)
        fp[f'b_dense{i}'] = b.reshape(1, c_h2)

    H = c_h3
    wif, whf, bif, bhf = p['gru_fwd']
    wib, whb, bib, bhb = p['gru_bwd']
    fp['w_ih'] = jnp.concatenate([jnp.transpose(wif), jnp.transpose(wib)], axis=1)
    fp['b_ih'] = jnp.concatenate([bif, bib]).reshape(1, 6 * H)
    whh = jnp.zeros((2 * H, 6 * H), f32)              # block-diag [fwd | bwd]
    whh = whh.at[0:H, 0:3 * H].set(jnp.transpose(whf))
    whh = whh.at[H:2 * H, 3 * H:6 * H].set(jnp.transpose(whb))
    fp['w_hh'] = whh
    fp['b_hh'] = jnp.concatenate([bhf, bhb]).reshape(1, 6 * H)

    wl, bl = p['linear']                              # (c_h2, c_h2 + 2H)
    fp['w_lin_x'] = jnp.transpose(wl[:, :c_h2])       # (C, C)
    fp['w_lin_r'] = jnp.transpose(wl[:, c_h2:])       # (2H, C)
    fp['b_lin'] = bl.reshape(1, c_h2)

    names = ['emb2', 'emb4', 'emb6', 'emb8', 'embd2', 'embd4', 'embrnn']
    E = emb_size
    wemb = jnp.zeros((7 * c_h2, 7 * E), f32)          # block-diagonal heads
    bemb = jnp.zeros((1, 7 * E), f32)
    for i, n in enumerate(names):
        w, b = p[n]                                   # (E, c_h2)
        wemb = wemb.at[i * c_h2:(i + 1) * c_h2, i * E:(i + 1) * E].set(
            jnp.transpose(w))
        bemb = bemb.at[0, i * E:(i + 1) * E].set(b)
    fp['w_emb'] = wemb
    fp['b_emb'] = bemb
    return fp


def encoder_forward(fp, x, ns=0.2):
    """x: (B, C_in, L) in the PyTorch NCL convention."""
    B, c_in, L = x.shape
    assert L % 8 == 0 and L >= 8, "L must be a multiple of 8 (3 stride-2 stages)"
    c_h2 = fp['w_conv2'].shape[1]
    c_h3 = fp['w_hh'].shape[0] // 2
    E = fp['b_emb'].shape[1] // 7
    L3 = L // 8

    xl = jnp.transpose(x, (0, 2, 1))                  # single boundary transpose -> NLC
    weights = [fp[n] for n in _WNAMES]
    w_specs = [pl.BlockSpec(w.shape, lambda b: (0, 0)) for w in weights]

    y, emb = pl.pallas_call(
        functools.partial(_encoder_kernel, ns),
        grid=(B,),
        in_specs=[pl.BlockSpec((None, L, c_in), lambda b: (b, 0, 0))] + w_specs,
        out_specs=(pl.BlockSpec((None, L3, c_h2), lambda b: (b, 0, 0)),
                   pl.BlockSpec((None, 1, 7 * E), lambda b: (b, 0, 0))),
        out_shape=(jax.ShapeDtypeStruct((B, L3, c_h2), jnp.float32),
                   jax.ShapeDtypeStruct((B, 1, 7 * E), jnp.float32)),
        scratch_shapes=[pltpu.VMEM((L + 4, c_h2), jnp.float32),   # padded conv-A out
                        pltpu.VMEM((L, c_h2), jnp.float32),       # block input (pool)
                        pltpu.VMEM((L3, 2 * c_h3), jnp.float32)], # GRU hidden seq
        compiler_params=pltpu.CompilerParams(
            dimension_semantics=("parallel",)),
    )(xl, *weights)

    y_ncl = jnp.transpose(y, (0, 2, 1))               # back to NCL
    embs = tuple(emb[:, 0, i * E:(i + 1) * E] for i in range(7))
    return y_ncl, embs


# ----------------------------------- main -----------------------------------

if __name__ == "__main__":
    # Small shapes consistent with Encoder(c_in, c_h1, c_h2, c_h3, emb_size).
    B, C_IN, L = 2, 16, 32
    C_H1, C_H2, C_H3, EMB = 16, 32, 16, 16

    key = jax.random.PRNGKey(0)
    k_params, k_x = jax.random.split(key)
    raw = init_params(k_params, C_IN, C_H1, C_H2, C_H3, EMB)
    fp = fuse_params(raw, C_IN, C_H1, C_H2, C_H3, EMB)
    x = jax.random.normal(k_x, (B, C_IN, L), dtype=jnp.float32)

    fwd = jax.jit(encoder_forward)
    out, embs = jax.block_until_ready(fwd(fp, x))

    assert out.shape == (B, C_H2, L // 8), out.shape   # three stride-2 convs
    for e in embs:
        assert e.shape == (B, EMB), e.shape
    print("KERNEL_OK")
</pallas_src>

<mosaic_0001>
module attributes {stable_mosaic.version = 11 : i64} {
  func.func @_encoder_kernel(%arg0: i32, %arg1: memref<1x32x16xf32, #tpu.memory_space<vmem>>, %arg2: memref<112x128xf32, #tpu.memory_space<vmem>>, %arg3: memref<1x128xf32, #tpu.memory_space<vmem>>, %arg4: memref<128x32xf32, #tpu.memory_space<vmem>>, %arg5: memref<1x32xf32, #tpu.memory_space<vmem>>, %arg6: memref<160x32xf32, #tpu.memory_space<vmem>>, %arg7: memref<1x32xf32, #tpu.memory_space<vmem>>, %arg8: memref<160x32xf32, #tpu.memory_space<vmem>>, %arg9: memref<1x32xf32, #tpu.memory_space<vmem>>, %arg10: memref<160x32xf32, #tpu.memory_space<vmem>>, %arg11: memref<1x32xf32, #tpu.memory_space<vmem>>, %arg12: memref<160x32xf32, #tpu.memory_space<vmem>>, %arg13: memref<1x32xf32, #tpu.memory_space<vmem>>, %arg14: memref<160x32xf32, #tpu.memory_space<vmem>>, %arg15: memref<1x32xf32, #tpu.memory_space<vmem>>, %arg16: memref<160x32xf32, #tpu.memory_space<vmem>>, %arg17: memref<1x32xf32, #tpu.memory_space<vmem>>, %arg18: memref<32x32xf32, #tpu.memory_space<vmem>>, %arg19: memref<1x32xf32, #tpu.memory_space<vmem>>, %arg20: memref<32x32xf32, #tpu.memory_space<vmem>>, %arg21: memref<1x32xf32, #tpu.memory_space<vmem>>, %arg22: memref<32x32xf32, #tpu.memory_space<vmem>>, %arg23: memref<1x32xf32, #tpu.memory_space<vmem>>, %arg24: memref<32x32xf32, #tpu.memory_space<vmem>>, %arg25: memref<1x32xf32, #tpu.memory_space<vmem>>, %arg26: memref<32x96xf32, #tpu.memory_space<vmem>>, %arg27: memref<1x96xf32, #tpu.memory_space<vmem>>, %arg28: memref<32x96xf32, #tpu.memory_space<vmem>>, %arg29: memref<1x96xf32, #tpu.memory_space<vmem>>, %arg30: memref<32x32xf32, #tpu.memory_space<vmem>>, %arg31: memref<32x32xf32, #tpu.memory_space<vmem>>, %arg32: memref<1x32xf32, #tpu.memory_space<vmem>>, %arg33: memref<224x112xf32, #tpu.memory_space<vmem>>, %arg34: memref<1x112xf32, #tpu.memory_space<vmem>>, %arg35: memref<1x4x32xf32, #tpu.memory_space<vmem>>, %arg36: memref<1x1x112xf32, #tpu.memory_space<vmem>>, %arg37: memref<36x32xf32, #tpu.memory_space<vmem>>, %arg38: memref<32x32xf32, #tpu.memory_space<vmem>>, %arg39: memref<4x32xf32, #tpu.memory_space<vmem>>) attributes {dimension_semantics = [#tpu.dimension_semantics<parallel>], iteration_bounds = array<i64: 2>, scalar_prefetch = 0 : i64, scratch_operands = 3 : i64, tpu.core_type = #tpu.core_type<tc>, window_params = [{transform_indices = @transform_0, window_bounds = array<i64: 1, 32, 16>}, {pipeline_mode = #tpu.pipeline_mode<synchronous>, transform_indices = @transform_1, window_bounds = array<i64: 112, 128>}, {pipeline_mode = #tpu.pipeline_mode<synchronous>, transform_indices = @transform_2, window_bounds = array<i64: 1, 128>}, {pipeline_mode = #tpu.pipeline_mode<synchronous>, transform_indices = @transform_3, window_bounds = array<i64: 128, 32>}, {pipeline_mode = #tpu.pipeline_mode<synchronous>, transform_indices = @transform_4, window_bounds = array<i64: 1, 32>}, {pipeline_mode = #tpu.pipeline_mode<synchronous>, transform_indices = @transform_5, window_bounds = array<i64: 160, 32>}, {pipeline_mode = #tpu.pipeline_mode<synchronous>, transform_indices = @transform_6, window_bounds = array<i64: 1, 32>}, {pipeline_mode = #tpu.pipeline_mode<synchronous>, transform_indices = @transform_7, window_bounds = array<i64: 160, 32>}, {pipeline_mode = #tpu.pipeline_mode<synchronous>, transform_indices = @transform_8, window_bounds = array<i64: 1, 32>}, {pipeline_mode = #tpu.pipeline_mode<synchronous>, transform_indices = @transform_9, window_bounds = array<i64: 160, 32>}, {pipeline_mode = #tpu.pipeline_mode<synchronous>, transform_indices = @transform_10, window_bounds = array<i64: 1, 32>}, {pipeline_mode = #tpu.pipeline_mode<synchronous>, transform_indices = @transform_11, window_bounds = array<i64: 160, 32>}, {pipeline_mode = #tpu.pipeline_mode<synchronous>, transform_indices = @transform_12, window_bounds = array<i64: 1, 32>}, {pipeline_mode = #tpu.pipeline_mode<synchronous>, transform_indices = @transform_13, window_bounds = array<i64: 160, 32>}, {pipeline_mode = #tpu.pipeline_mode<synchronous>, transform_indices = @transform_14, window_bounds = array<i64: 1, 32>}, {pipeline_mode = #tpu.pipeline_mode<synchronous>, transform_indices = @transform_15, window_bounds = array<i64: 160, 32>}, {pipeline_mode = #tpu.pipeline_mode<synchronous>, transform_indices = @transform_16, window_bounds = array<i64: 1, 32>}, {pipeline_mode = #tpu.pipeline_mode<synchronous>, transform_indices = @transform_17, window_bounds = array<i64: 32, 32>}, {pipeline_mode = #tpu.pipeline_mode<synchronous>, transform_indices = @transform_18, window_bounds = array<i64: 1, 32>}, {pipeline_mode = #tpu.pipeline_mode<synchronous>, transform_indices = @transform_19, window_bounds = array<i64: 32, 32>}, {pipeline_mode = #tpu.pipeline_mode<synchronous>, transform_indices = @transform_20, window_bounds = array<i64: 1, 32>}, {pipeline_mode = #tpu.pipeline_mode<synchronous>, transform_indices = @transform_21, window_bounds = array<i64: 32, 32>}, {pipeline_mode = #tpu.pipeline_mode<synchronous>, transform_indices = @transform_22, window_bounds = array<i64: 1, 32>}, {pipeline_mode = #tpu.pipeline_mode<synchronous>, transform_indices = @transform_23, window_bounds = array<i64: 32, 32>}, {pipeline_mode = #tpu.pipeline_mode<synchronous>, transform_indices = @transform_24, window_bounds = array<i64: 1, 32>}, {pipeline_mode = #tpu.pipeline_mode<synchronous>, transform_indices = @transform_25, window_bounds = array<i64: 32, 96>}, {pipeline_mode = #tpu.pipeline_mode<synchronous>, transform_indices = @transform_26, window_bounds = array<i64: 1, 96>}, {pipeline_mode = #tpu.pipeline_mode<synchronous>, transform_indices = @transform_27, window_bounds = array<i64: 32, 96>}, {pipeline_mode = #tpu.pipeline_mode<synchronous>, transform_indices = @transform_28, window_bounds = array<i64: 1, 96>}, {pipeline_mode = #tpu.pipeline_mode<synchronous>, transform_indices = @transform_29, window_bounds = array<i64: 32, 32>}, {pipeline_mode = #tpu.pipeline_mode<synchronous>, transform_indices = @transform_30, window_bounds = array<i64: 32, 32>}, {pipeline_mode = #tpu.pipeline_mode<synchronous>, transform_indices = @transform_31, window_bounds = array<i64: 1, 32>}, {pipeline_mode = #tpu.pipeline_mode<synchronous>, transform_indices = @transform_32, window_bounds = array<i64: 224, 112>}, {pipeline_mode = #tpu.pipeline_mode<synchronous>, transform_indices = @transform_33, window_bounds = array<i64: 1, 112>}, {transform_indices = @transform_34, window_bounds = array<i64: 1, 4, 32>}, {transform_indices = @transform_35, window_bounds = array<i64: 1, 1, 112>}]} {
    %c0 = arith.constant 0 : index
    %c0_0 = arith.constant 0 : index
    %c0_1 = arith.constant 0 : index
    %0 = vector.load %arg1[%c0, %c0_0, %c0_1] : memref<1x32x16xf32, #tpu.memory_space<vmem>>, vector<1x32x16xf32>
    %1 = vector.shape_cast %0 : vector<1x32x16xf32> to vector<32x16xf32>
    %2 = vector.extract_strided_slice %1 {offsets = [3, 0], sizes = [1, 16], strides = [1, 1]} : vector<32x16xf32> to vector<1x16xf32>
    %3 = vector.extract_strided_slice %1 {offsets = [2, 0], sizes = [1, 16], strides = [1, 1]} : vector<32x16xf32> to vector<1x16xf32>
    %4 = vector.extract_strided_slice %1 {offsets = [1, 0], sizes = [1, 16], strides = [1, 1]} : vector<32x16xf32> to vector<1x16xf32>
    %5 = vector.extract_strided_slice %1 {offsets = [30, 0], sizes = [1, 16], strides = [1, 1]} : vector<32x16xf32> to vector<1x16xf32>
    %6 = vector.extract_strided_slice %1 {offsets = [29, 0], sizes = [1, 16], strides = [1, 1]} : vector<32x16xf32> to vector<1x16xf32>
    %7 = vector.extract_strided_slice %1 {offsets = [28, 0], sizes = [1, 16], strides = [1, 1]} : vector<32x16xf32> to vector<1x16xf32>
    %8 = tpu.concatenate %2, %3, %4, %1, %5, %6, %7 in 0 : vector<1x16xf32>, vector<1x16xf32>, vector<1x16xf32>, vector<32x16xf32>, vector<1x16xf32>, vector<1x16xf32>, vector<1x16xf32> -> vector<38x16xf32>
    %9 = vector.extract_strided_slice %8 {offsets = [0, 0], sizes = [32, 16], strides = [1, 1]} : vector<38x16xf32> to vector<32x16xf32>
    %10 = vector.extract_strided_slice %8 {offsets = [1, 0], sizes = [32, 16], strides = [1, 1]} : vector<38x16xf32> to vector<32x16xf32>
    %11 = vector.extract_strided_slice %8 {offsets = [2, 0], sizes = [32, 16], strides = [1, 1]} : vector<38x16xf32> to vector<32x16xf32>
    %12 = vector.extract_strided_slice %8 {offsets = [3, 0], sizes = [32, 16], strides = [1, 1]} : vector<38x16xf32> to vector<32x16xf32>
    %13 = vector.extract_strided_slice %8 {offsets = [4, 0], sizes = [32, 16], strides = [1, 1]} : vector<38x16xf32> to vector<32x16xf32>
    %14 = vector.extract_strided_slice %8 {offsets = [5, 0], sizes = [32, 16], strides = [1, 1]} : vector<38x16xf32> to vector<32x16xf32>
    %15 = vector.extract_strided_slice %8 {offsets = [6, 0], sizes = [32, 16], strides = [1, 1]} : vector<38x16xf32> to vector<32x16xf32>
    %16 = tpu.concatenate %9, %10, %11, %12, %13, %14, %15 in 1 : vector<32x16xf32>, vector<32x16xf32>, vector<32x16xf32>, vector<32x16xf32>, vector<32x16xf32>, vector<32x16xf32>, vector<32x16xf32> -> vector<32x112xf32>
    %c0_2 = arith.constant 0 : index
    %c0_3 = arith.constant 0 : index
    %17 = vector.load %arg2[%c0_2, %c0_3] : memref<112x128xf32, #tpu.memory_space<vmem>>, vector<112x128xf32>
    %cst = arith.constant dense<0.000000e+00> : vector<32x128xf32>
    %18 = tpu.matmul %16, %17, %cst {dimension_numbers = #tpu.dot_dimension_numbers<[1], [0], [0], [1], [0, 0, 1, 1], [], []>} : vector<32x112xf32>, vector<112x128xf32>, vector<32x128xf32> -> vector<32x128xf32>
    %c0_4 = arith.constant 0 : index
    %c0_5 = arith.constant 0 : index
    %19 = vector.load %arg3[%c0_4, %c0_5] : memref<1x128xf32, #tpu.memory_space<vmem>>, vector<1x128xf32>
    %20 = vector.broadcast %19 : vector<1x128xf32> to vector<32x128xf32>
    %21 = arith.addf %18, %20 : vector<32x128xf32>
    %cst_6 = arith.constant 0.000000e+00 : f32
    %22 = vector.broadcast %cst_6 : f32 to vector<32x128xf32>
    %23 = arith.cmpf oge, %21, %22 : vector<32x128xf32>
    %cst_7 = arith.constant 2.000000e-01 : f32
    %24 = vector.broadcast %cst_7 : f32 to vector<32x128xf32>
    %25 = arith.mulf %24, %21 : vector<32x128xf32>
    %26 = arith.select %23, %21, %25 : vector<32x128xi1>, vector<32x128xf32>
    %c0_8 = arith.constant 0 : index
    %c0_9 = arith.constant 0 : index
    %27 = vector.load %arg4[%c0_8, %c0_9] : memref<128x32xf32, #tpu.memory_space<vmem>>, vector<128x32xf32>
    %cst_10 = arith.constant dense<0.000000e+00> : vector<32x32xf32>
    %28 = tpu.matmul %26, %27, %cst_10 {dimension_numbers = #tpu.dot_dimension_numbers<[1], [0], [0], [1], [0, 0, 1, 1], [], []>} : vector<32x128xf32>, vector<128x32xf32>, vector<32x32xf32> -> vector<32x32xf32>
    %c0_11 = arith.constant 0 : index
    %c0_12 = arith.constant 0 : index
    %29 = vector.load %arg5[%c0_11, %c0_12] : memref<1x32xf32, #tpu.memory_space<vmem>>, vector<1x32xf32>
    %30 = vector.broadcast %29 : vector<1x32xf32> to vector<32x32xf32>
    %31 = arith.addf %28, %30 : vector<32x32xf32>
    %cst_13 = arith.constant 0.000000e+00 : f32
    %32 = vector.broadcast %cst_13 : f32 to vector<32x32xf32>
    %33 = arith.cmpf oge, %31, %32 : vector<32x32xf32>
    %cst_14 = arith.constant 2.000000e-01 : f32
    %34 = vector.broadcast %cst_14 : f32 to vector<32x32xf32>
    %35 = arith.mulf %34, %31 : vector<32x32xf32>
    %36 = arith.select %33, %31, %35 : vector<32x32xi1>, vector<32x32xf32>
    %cst_15 = arith.constant dense<0.000000e+00> : vector<32xf32>
    %37 = vector.multi_reduction <add>, %36, %cst_15 [0] : vector<32x32xf32> to vector<32xf32>
    %38 = vector.shape_cast %37 : vector<32xf32> to vector<1x32xf32>
    %cst_16 = arith.constant 3.200000e+01 : f32
    %39 = vector.broadcast %cst_16 : f32 to vector<1x32xf32>
    %40 = arith.divf %38, %39 : vector<1x32xf32>
    %41 = vector.broadcast %40 : vector<1x32xf32> to vector<32x32xf32>
    %42 = arith.subf %36, %41 : vector<32x32xf32>
    %43 = arith.mulf %42, %42 : vector<32x32xf32>
    %cst_17 = arith.constant dense<0.000000e+00> : vector<32xf32>
    %44 = vector.multi_reduction <add>, %43, %cst_17 [0] : vector<32x32xf32> to vector<32xf32>
    %45 = vector.shape_cast %44 : vector<32xf32> to vector<1x32xf32>
    %cst_18 = arith.constant 3.200000e+01 : f32
    %46 = vector.broadcast %cst_18 : f32 to vector<1x32xf32>
    %47 = arith.divf %45, %46 : vector<1x32xf32>
    %48 = vector.broadcast %40 : vector<1x32xf32> to vector<32x32xf32>
    %49 = arith.subf %36, %48 : vector<32x32xf32>
    %cst_19 = arith.constant 9.99999974E-6 : f32
    %50 = vector.broadcast %cst_19 : f32 to vector<1x32xf32>
    %51 = arith.addf %47, %50 : vector<1x32xf32>
    %52 = math.rsqrt %51 : vector<1x32xf32>
    %53 = vector.broadcast %52 : vector<1x32xf32> to vector<32x32xf32>
    %54 = arith.mulf %49, %53 : vector<32x32xf32>
    %cst_20 = arith.constant dense<0.000000e+00> : vector<32xf32>
    %55 = vector.multi_reduction <add>, %54, %cst_20 [0] : vector<32x32xf32> to vector<32xf32>
    %56 = vector.shape_cast %55 : vector<32xf32> to vector<1x32xf32>
    %cst_21 = arith.constant 3.200000e+01 : f32
    %57 = vector.broadcast %cst_21 : f32 to vector<1x32xf32>
    %58 = arith.divf %56, %57 : vector<1x32xf32>
    %59 = vector.extract_strided_slice %54 {offsets = [2, 0], sizes = [1, 32], strides = [1, 1]} : vector<32x32xf32> to vector<1x32xf32>
    %60 = vector.extract_strided_slice %54 {offsets = [1, 0], sizes = [1, 32], strides = [1, 1]} : vector<32x32xf32> to vector<1x32xf32>
    %61 = vector.extract_strided_slice %54 {offsets = [30, 0], sizes = [1, 32], strides = [1, 1]} : vector<32x32xf32> to vector<1x32xf32>
    %62 = vector.extract_strided_slice %54 {offsets = [29, 0], sizes = [1, 32], strides = [1, 1]} : vector<32x32xf32> to vector<1x32xf32>
    %63 = tpu.concatenate %59, %60, %54, %61, %62 in 0 : vector<1x32xf32>, vector<1x32xf32>, vector<32x32xf32>, vector<1x32xf32>, vector<1x32xf32> -> vector<36x32xf32>
    %64 = vector.extract_strided_slice %63 {offsets = [0, 0], sizes = [32, 32], strides = [1, 1]} : vector<36x32xf32> to vector<32x32xf32>
    %65 = vector.extract_strided_slice %63 {offsets = [1, 0], sizes = [32, 32], strides = [1, 1]} : vector<36x32xf32> to vector<32x32xf32>
    %66 = vector.extract_strided_slice %63 {offsets = [2, 0], sizes = [32, 32], strides = [1, 1]} : vector<36x32xf32> to vector<32x32xf32>
    %67 = vector.extract_strided_slice %63 {offsets = [3, 0], sizes = [32, 32], strides = [1, 1]} : vector<36x32xf32> to vector<32x32xf32>
    %68 = vector.extract_strided_slice %63 {offsets = [4, 0], sizes = [32, 32], strides = [1, 1]} : vector<36x32xf32> to vector<32x32xf32>
    %69 = tpu.concatenate %64, %65, %66, %67, %68 in 1 : vector<32x32xf32>, vector<32x32xf32>, vector<32x32xf32>, vector<32x32xf32>, vector<32x32xf32> -> vector<32x160xf32>
    %c0_22 = arith.constant 0 : index
    %c0_23 = arith.constant 0 : index
    %70 = vector.load %arg6[%c0_22, %c0_23] : memref<160x32xf32, #tpu.memory_space<vmem>>, vector<160x32xf32>
    %cst_24 = arith.constant dense<0.000000e+00> : vector<32x32xf32>
    %71 = tpu.matmul %69, %70, %cst_24 {dimension_numbers = #tpu.dot_dimension_numbers<[1], [0], [0], [1], [0, 0, 1, 1], [], []>} : vector<32x160xf32>, vector<160x32xf32>, vector<32x32xf32> -> vector<32x32xf32>
    %c0_25 = arith.constant 0 : index
    %c0_26 = arith.constant 0 : index
    %72 = vector.load %arg7[%c0_25, %c0_26] : memref<1x32xf32, #tpu.memory_space<vmem>>, vector<1x32xf32>
    %73 = vector.broadcast %72 : vector<1x32xf32> to vector<32x32xf32>
    %74 = arith.addf %71, %73 : vector<32x32xf32>
    %cst_27 = arith.constant 0.000000e+00 : f32
    %75 = vector.broadcast %cst_27 : f32 to vector<32x32xf32>
    %76 = arith.cmpf oge, %74, %75 : vector<32x32xf32>
    %cst_28 = arith.constant 2.000000e-01 : f32
    %77 = vector.broadcast %cst_28 : f32 to vector<32x32xf32>
    %78 = arith.mulf %77, %74 : vector<32x32xf32>
    %79 = arith.select %76, %74, %78 : vector<32x32xi1>, vector<32x32xf32>
    %80 = vector.extract_strided_slice %79 {offsets = [2, 0], sizes = [1, 32], strides = [1, 1]} : vector<32x32xf32> to vector<1x32xf32>
    %81 = vector.extract_strided_slice %79 {offsets = [1, 0], sizes = [1, 32], strides = [1, 1]} : vector<32x32xf32> to vector<1x32xf32>
    %82 = vector.extract_strided_slice %79 {offsets = [30, 0], sizes = [1, 32], strides = [1, 1]} : vector<32x32xf32> to vector<1x32xf32>
    %83 = vector.extract_strided_slice %79 {offsets = [29, 0], sizes = [1, 32], strides = [1, 1]} : vector<32x32xf32> to vector<1x32xf32>
    %84 = tpu.concatenate %80, %81, %79, %82, %83 in 0 : vector<1x32xf32>, vector<1x32xf32>, vector<32x32xf32>, vector<1x32xf32>, vector<1x32xf32> -> vector<36x32xf32>
    %c0_29 = arith.constant 0 : index
    %c0_30 = arith.constant 0 : index
    %85 = vector.load %arg37[%c0_29, %c0_30] : memref<36x32xf32, #tpu.memory_space<vmem>>, vector<36x32xf32>
    tpu.vector_store %arg37[%c0_29, %c0_30], %84 {strides = array<i32>} : memref<36x32xf32, #tpu.memory_space<vmem>>, vector<36x32xf32>,
    %c0_31 = arith.constant 0 : index
    %c0_32 = arith.constant 0 : index
    %86 = vector.load %arg38[%c0_31, %c0_32] : memref<32x32xf32, #tpu.memory_space<vmem>>, vector<32x32xf32>
    tpu.vector_store %arg38[%c0_31, %c0_32], %54 {strides = array<i32>} : memref<32x32xf32, #tpu.memory_space<vmem>>, vector<32x32xf32>,
    %c0_33 = arith.constant 0 : index
    %c0_34 = arith.constant 0 : index
    %87 = tpu.strided_load %arg37[%c0_33, %c0_34] {strides = array<i32: 2, 1>} : memref<36x32xf32, #tpu.memory_space<vmem>>, vector<16x32xf32>
    %c1 = arith.constant 1 : index
    %c0_35 = arith.constant 0 : index
    %88 = tpu.strided_load %arg37[%c1, %c0_35] {strides = array<i32: 2, 1>} : memref<36x32xf32, #tpu.memory_space<vmem>>, vector<16x32xf32>
    %c2 = arith.constant 2 : index
    %c0_36 = arith.constant 0 : index
    %89 = tpu.strided_load %arg37[%c2, %c0_36] {strides = array<i32: 2, 1>} : memref<36x32xf32, #tpu.memory_space<vmem>>, vector<16x32xf32>
    %c3 = arith.constant 3 : index
    %c0_37 = arith.constant 0 : index
    %90 = tpu.strided_load %arg37[%c3, %c0_37] {strides = array<i32: 2, 1>} : memref<36x32xf32, #tpu.memory_space<vmem>>, vector<16x32xf32>
    %c4 = arith.constant 4 : index
    %c0_38 = arith.constant 0 : index
    %91 = tpu.strided_load %arg37[%c4, %c0_38] {strides = array<i32: 2, 1>} : memref<36x32xf32, #tpu.memory_space<vmem>>, vector<16x32xf32>
    %92 = tpu.concatenate %87, %88, %89, %90, %91 in 1 : vector<16x32xf32>, vector<16x32xf32>, vector<16x32xf32>, vector<16x32xf32>, vector<16x32xf32> -> vector<16x160xf32>
    %c0_39 = arith.constant 0 : index
    %c0_40 = arith.constant 0 : index
    %93 = vector.load %arg8[%c0_39, %c0_40] : memref<160x32xf32, #tpu.memory_space<vmem>>, vector<160x32xf32>
    %cst_41 = arith.constant dense<0.000000e+00> : vector<16x32xf32>
    %94 = tpu.matmul %92, %93, %cst_41 {dimension_numbers = #tpu.dot_dimension_numbers<[1], [0], [0], [1], [0, 0, 1, 1], [], []>} : vector<16x160xf32>, vector<160x32xf32>, vector<16x32xf32> -> vector<16x32xf32>
    %c0_42 = arith.constant 0 : index
    %c0_43 = arith.constant 0 : index
    %95 = vector.load %arg9[%c0_42, %c0_43] : memref<1x32xf32, #tpu.memory_space<vmem>>, vector<1x32xf32>
    %96 = vector.broadcast %95 : vector<1x32xf32> to vector<16x32xf32>
    %97 = arith.addf %94, %96 : vector<16x32xf32>
    %cst_44 = arith.constant 0.000000e+00 : f32
    %98 = vector.broadcast %cst_44 : f32 to vector<16x32xf32>
    %99 = arith.cmpf oge, %97, %98 : vector<16x32xf32>
    %cst_45 = arith.constant 2.000000e-01 : f32
    %100 = vector.broadcast %cst_45 : f32 to vector<16x32xf32>
    %101 = arith.mulf %100, %97 : vector<16x32xf32>
    %102 = arith.select %99, %97, %101 : vector<16x32xi1>, vector<16x32xf32>
    %c0_46 = arith.constant 0 : index
    %c0_47 = arith.constant 0 : index
    %103 = tpu.strided_load %arg38[%c0_46, %c0_47] {strides = array<i32: 2, 1>} : memref<32x32xf32, #tpu.memory_space<vmem>>, vector<16x32xf32>
    %c1_48 = arith.constant 1 : index
    %c0_49 = arith.constant 0 : index
    %104 = tpu.strided_load %arg38[%c1_48, %c0_49] {strides = array<i32: 2, 1>} : memref<32x32xf32, #tpu.memory_space<vmem>>, vector<16x32xf32>
    %105 = arith.addf %103, %104 : vector<16x32xf32>
    %cst_50 = arith.constant 5.000000e-01 : f32
    %106 = vector.broadcast %cst_50 : f32 to vector<16x32xf32>
    %107 = arith.mulf %106, %105 : vector<16x32xf32>
    %cst_51 = arith.constant dense<0.000000e+00> : vector<32xf32>
    %108 = vector.multi_reduction <add>, %102, %cst_51 [0] : vector<16x32xf32> to vector<32xf32>
    %109 = vector.shape_cast %108 : vector<32xf32> to vector<1x32xf32>
    %cst_52 = arith.constant 1.600000e+01 : f32
    %110 = vector.broadcast %cst_52 : f32 to vector<1x32xf32>
    %111 = arith.divf %109, %110 : vector<1x32xf32>
    %112 = vector.broadcast %111 : vector<1x32xf32> to vector<16x32xf32>
    %113 = arith.subf %102, %112 : vector<16x32xf32>
    %114 = arith.mulf %113, %113 : vector<16x32xf32>
    %cst_53 = arith.constant dense<0.000000e+00> : vector<32xf32>
    %115 = vector.multi_reduction <add>, %114, %cst_53 [0] : vector<16x32xf32> to vector<32xf32>
    %116 = vector.shape_cast %115 : vector<32xf32> to vector<1x32xf32>
    %cst_54 = arith.constant 1.600000e+01 : f32
    %117 = vector.broadcast %cst_54 : f32 to vector<1x32xf32>
    %118 = arith.divf %116, %117 : vector<1x32xf32>
    %119 = vector.broadcast %111 : vector<1x32xf32> to vector<16x32xf32>
    %120 = arith.subf %102, %119 : vector<16x32xf32>
    %cst_55 = arith.constant 9.99999974E-6 : f32
    %121 = vector.broadcast %cst_55 : f32 to vector<1x32xf32>
    %122 = arith.addf %118, %121 : vector<1x32xf32>
    %123 = math.rsqrt %122 : vector<1x32xf32>
    %124 = vector.broadcast %123 : vector<1x32xf32> to vector<16x32xf32>
    %125 = arith.mulf %120, %124 : vector<16x32xf32>
    %126 = arith.addf %125, %107 : vector<16x32xf32>
    %cst_56 = arith.constant dense<0.000000e+00> : vector<32xf32>
    %127 = vector.multi_reduction <add>, %126, %cst_56 [0] : vector<16x32xf32> to vector<32xf32>
    %128 = vector.shape_cast %127 : vector<32xf32> to vector<1x32xf32>
    %cst_57 = arith.constant 1.600000e+01 : f32
    %129 = vector.broadcast %cst_57 : f32 to vector<1x32xf32>
    %130 = arith.divf %128, %129 : vector<1x32xf32>
    %131 = vector.extract_strided_slice %126 {offsets = [2, 0], sizes = [1, 32], strides = [1, 1]} : vector<16x32xf32> to vector<1x32xf32>
    %132 = vector.extract_strided_slice %126 {offsets = [1, 0], sizes = [1, 32], strides = [1, 1]} : vector<16x32xf32> to vector<1x32xf32>
    %133 = vector.extract_strided_slice %126 {offsets = [14, 0], sizes = [1, 32], strides = [1, 1]} : vector<16x32xf32> to vector<1x32xf32>
    %134 = vector.extract_strided_slice %126 {offsets = [13, 0], sizes = [1, 32], strides = [1, 1]} : vector<16x32xf32> to vector<1x32xf32>
    %135 = tpu.concatenate %131, %132, %126, %133, %134 in 0 : vector<1x32xf32>, vector<1x32xf32>, vector<16x32xf32>, vector<1x32xf32>, vector<1x32xf32> -> vector<20x32xf32>
    %136 = vector.extract_strided_slice %135 {offsets = [0, 0], sizes = [16, 32], strides = [1, 1]} : vector<20x32xf32> to vector<16x32xf32>
    %137 = vector.extract_strided_slice %135 {offsets = [1, 0], sizes = [16, 32], strides = [1, 1]} : vector<20x32xf32> to vector<16x32xf32>
    %138 = vector.extract_strided_slice %135 {offsets = [2, 0], sizes = [16, 32], strides = [1, 1]} : vector<20x32xf32> to vector<16x32xf32>
    %139 = vector.extract_strided_slice %135 {offsets = [3, 0], sizes = [16, 32], strides = [1, 1]} : vector<20x32xf32> to vector<16x32xf32>
    %140 = vector.extract_strided_slice %135 {offsets = [4, 0], sizes = [16, 32], strides = [1, 1]} : vector<20x32xf32> to vector<16x32xf32>
    %141 = tpu.concatenate %136, %137, %138, %139, %140 in 1 : vector<16x32xf32>, vector<16x32xf32>, vector<16x32xf32>, vector<16x32xf32>, vector<16x32xf32> -> vector<16x160xf32>
    %c0_58 = arith.constant 0 : index
    %c0_59 = arith.constant 0 : index
    %142 = vector.load %arg10[%c0_58, %c0_59] : memref<160x32xf32, #tpu.memory_space<vmem>>, vector<160x32xf32>
    %cst_60 = arith.constant dense<0.000000e+00> : vector<16x32xf32>
    %143 = tpu.matmul %141, %142, %cst_60 {dimension_numbers = #tpu.dot_dimension_numbers<[1], [0], [0], [1], [0, 0, 1, 1], [], []>} : vector<16x160xf32>, vector<160x32xf32>, vector<16x32xf32> -> vector<16x32xf32>
    %c0_61 = arith.constant 0 : index
    %c0_62 = arith.constant 0 : index
    %144 = vector.load %arg11[%c0_61, %c0_62] : memref<1x32xf32, #tpu.memory_space<vmem>>, vector<1x32xf32>
    %145 = vector.broadcast %144 : vector<1x32xf32> to vector<16x32xf32>
    %146 = arith.addf %143, %145 : vector<16x32xf32>
    %cst_63 = arith.constant 0.000000e+00 : f32
    %147 = vector.broadcast %cst_63 : f32 to vector<16x32xf32>
    %148 = arith.cmpf oge, %146, %147 : vector<16x32xf32>
    %cst_64 = arith.constant 2.000000e-01 : f32
    %149 = vector.broadcast %cst_64 : f32 to vector<16x32xf32>
    %150 = arith.mulf %149, %146 : vector<16x32xf32>
    %151 = arith.select %148, %146, %150 : vector<16x32xi1>, vector<16x32xf32>
    %152 = vector.extract_strided_slice %151 {offsets = [2, 0], sizes = [1, 32], strides = [1, 1]} : vector<16x32xf32> to vector<1x32xf32>
    %153 = vector.extract_strided_slice %151 {offsets = [1, 0], sizes = [1, 32], strides = [1, 1]} : vector<16x32xf32> to vector<1x32xf32>
    %154 = vector.extract_strided_slice %151 {offsets = [14, 0], sizes = [1, 32], strides = [1, 1]} : vector<16x32xf32> to vector<1x32xf32>
    %155 = vector.extract_strided_slice %151 {offsets = [13, 0], sizes = [1, 32], strides = [1, 1]} : vector<16x32xf32> to vector<1x32xf32>
    %156 = tpu.concatenate %152, %153, %151, %154, %155 in 0 : vector<1x32xf32>, vector<1x32xf32>, vector<16x32xf32>, vector<1x32xf32>, vector<1x32xf32> -> vector<20x32xf32>
    %c0_65 = arith.constant 0 : index
    %c0_66 = arith.constant 0 : index
    %157 = vector.load %arg37[%c0_65, %c0_66] : memref<36x32xf32, #tpu.memory_space<vmem>>, vector<20x32xf32>
    tpu.vector_store %arg37[%c0_65, %c0_66], %156 {strides = array<i32>} : memref<36x32xf32, #tpu.memory_space<vmem>>, vector<20x32xf32>,
    %c0_67 = arith.constant 0 : index
    %c0_68 = arith.constant 0 : index
    %158 = vector.load %arg38[%c0_67, %c0_68] : memref<32x32xf32, #tpu.memory_space<vmem>>, vector<16x32xf32>
    tpu.vector_store %arg38[%c0_67, %c0_68], %126 {strides = array<i32>} : memref<32x32xf32, #tpu.memory_space<vmem>>, vector<16x32xf32>,
    %c0_69 = arith.constant 0 : index
    %c0_70 = arith.constant 0 : index
    %159 = tpu.strided_load %arg37[%c0_69, %c0_70] {strides = array<i32: 2, 1>} : memref<36x32xf32, #tpu.memory_space<vmem>>, vector<8x32xf32>
    %c1_71 = arith.constant 1 : index
    %c0_72 = arith.constant 0 : index
    %160 = tpu.strided_load %arg37[%c1_71, %c0_72] {strides = array<i32: 2, 1>} : memref<36x32xf32, #tpu.memory_space<vmem>>, vector<8x32xf32>
    %c2_73 = arith.constant 2 : index
    %c0_74 = arith.constant 0 : index
    %161 = tpu.strided_load %arg37[%c2_73, %c0_74] {strides = array<i32: 2, 1>} : memref<36x32xf32, #tpu.memory_space<vmem>>, vector<8x32xf32>
    %c3_75 = arith.constant 3 : index
    %c0_76 = arith.constant 0 : index
    %162 = tpu.strided_load %arg37[%c3_75, %c0_76] {strides = array<i32: 2, 1>} : memref<36x32xf32, #tpu.memory_space<vmem>>, vector<8x32xf32>
    %c4_77 = arith.constant 4 : index
    %c0_78 = arith.constant 0 : index
    %163 = tpu.strided_load %arg37[%c4_77, %c0_78] {strides = array<i32: 2, 1>} : memref<36x32xf32, #tpu.memory_space<vmem>>, vector<8x32xf32>
    %164 = tpu.concatenate %159, %160, %161, %162, %163 in 1 : vector<8x32xf32>, vector<8x32xf32>, vector<8x32xf32>, vector<8x32xf32>, vector<8x32xf32> -> vector<8x160xf32>
    %c0_79 = arith.constant 0 : index
    %c0_80 = arith.constant 0 : index
    %165 = vector.load %arg12[%c0_79, %c0_80] : memref<160x32xf32, #tpu.memory_space<vmem>>, vector<160x32xf32>
    %cst_81 = arith.constant dense<0.000000e+00> : vector<8x32xf32>
    %166 = tpu.matmul %164, %165, %cst_81 {dimension_numbers = #tpu.dot_dimension_numbers<[1], [0], [0], [1], [0, 0, 1, 1], [], []>} : vector<8x160xf32>, vector<160x32xf32>, vector<8x32xf32> -> vector<8x32xf32>
    %c0_82 = arith.constant 0 : index
    %c0_83 = arith.constant 0 : index
    %167 = vector.load %arg13[%c0_82, %c0_83] : memref<1x32xf32, #tpu.memory_space<vmem>>, vector<1x32xf32>
    %168 = vector.broadcast %167 : vector<1x32xf32> to vector<8x32xf32>
    %169 = arith.addf %166, %168 : vector<8x32xf32>
    %cst_84 = arith.constant 0.000000e+00 : f32
    %170 = vector.broadcast %cst_84 : f32 to vector<8x32xf32>
    %171 = arith.cmpf oge, %169, %170 : vector<8x32xf32>
    %cst_85 = arith.constant 2.000000e-01 : f32
    %172 = vector.broadcast %cst_85 : f32 to vector<8x32xf32>
    %173 = arith.mulf %172, %169 : vector<8x32xf32>
    %174 = arith.select %171, %169, %173 : vector<8x32xi1>, vector<8x32xf32>
    %c0_86 = arith.constant 0 : index
    %c0_87 = arith.constant 0 : index
    %175 = tpu.strided_load %arg38[%c0_86, %c0_87] {strides = array<i32: 2, 1>} : memref<32x32xf32, #tpu.memory_space<vmem>>, vector<8x32xf32>
    %c1_88 = arith.constant 1 : index
    %c0_89 = arith.constant 0 : index
    %176 = tpu.strided_load %arg38[%c1_88, %c0_89] {strides = array<i32: 2, 1>} : memref<32x32xf32, #tpu.memory_space<vmem>>, vector<8x32xf32>
    %177 = arith.addf %175, %176 : vector<8x32xf32>
    %cst_90 = arith.constant 5.000000e-01 : f32
    %178 = vector.broadcast %cst_90 : f32 to vector<8x32xf32>
    %179 = arith.mulf %178, %177 : vector<8x32xf32>
    %cst_91 = arith.constant dense<0.000000e+00> : vector<32xf32>
    %180 = vector.multi_reduction <add>, %174, %cst_91 [0] : vector<8x32xf32> to vector<32xf32>
    %181 = vector.shape_cast %180 : vector<32xf32> to vector<1x32xf32>
    %cst_92 = arith.constant 8.000000e+00 : f32
    %182 = vector.broadcast %cst_92 : f32 to vector<1x32xf32>
    %183 = arith.divf %181, %182 : vector<1x32xf32>
    %184 = vector.broadcast %183 : vector<1x32xf32> to vector<8x32xf32>
    %185 = arith.subf %174, %184 : vector<8x32xf32>
    %186 = arith.mulf %185, %185 : vector<8x32xf32>
    %cst_93 = arith.constant dense<0.000000e+00> : vector<32xf32>
    %187 = vector.multi_reduction <add>, %186, %cst_93 [0] : vector<8x32xf32> to vector<32xf32>
    %188 = vector.shape_cast %187 : vector<32xf32> to vector<1x32xf32>
    %cst_94 = arith.constant 8.000000e+00 : f32
    %189 = vector.broadcast %cst_94 : f32 to vector<1x32xf32>
    %190 = arith.divf %188, %189 : vector<1x32xf32>
    %191 = vector.broadcast %183 : vector<1x32xf32> to vector<8x32xf32>
    %192 = arith.subf %174, %191 : vector<8x32xf32>
    %cst_95 = arith.constant 9.99999974E-6 : f32
    %193 = vector.broadcast %cst_95 : f32 to vector<1x32xf32>
    %194 = arith.addf %190, %193 : vector<1x32xf32>
    %195 = math.rsqrt %194 : vector<1x32xf32>
    %196 = vector.broadcast %195 : vector<1x32xf32> to vector<8x32xf32>
    %197 = arith.mulf %192, %196 : vector<8x32xf32>
    %198 = arith.addf %197, %179 : vector<8x32xf32>
    %cst_96 = arith.constant dense<0.000000e+00> : vector<32xf32>
    %199 = vector.multi_reduction <add>, %198, %cst_96 [0] : vector<8x32xf32> to vector<32xf32>
    %200 = vector.shape_cast %199 : vector<32xf32> to vector<1x32xf32>
    %cst_97 = arith.constant 8.000000e+00 : f32
    %201 = vector.broadcast %cst_97 : f32 to vector<1x32xf32>
    %202 = arith.divf %200, %201 : vector<1x32xf32>
    %203 = vector.extract_strided_slice %198 {offsets = [2, 0], sizes = [1, 32], strides = [1, 1]} : vector<8x32xf32> to vector<1x32xf32>
    %204 = vector.extract_strided_slice %198 {offsets = [1, 0], sizes = [1, 32], strides = [1, 1]} : vector<8x32xf32> to vector<1x32xf32>
    %205 = vector.extract_strided_slice %198 {offsets = [6, 0], sizes = [1, 32], strides = [1, 1]} : vector<8x32xf32> to vector<1x32xf32>
    %206 = vector.extract_strided_slice %198 {offsets = [5, 0], sizes = [1, 32], strides = [1, 1]} : vector<8x32xf32> to vector<1x32xf32>
    %207 = tpu.concatenate %203, %204, %198, %205, %206 in 0 : vector<1x32xf32>, vector<1x32xf32>, vector<8x32xf32>, vector<1x32xf32>, vector<1x32xf32> -> vector<12x32xf32>
    %208 = vector.extract_strided_slice %207 {offsets = [0, 0], sizes = [8, 32], strides = [1, 1]} : vector<12x32xf32> to vector<8x32xf32>
    %209 = vector.extract_strided_slice %207 {offsets = [1, 0], sizes = [8, 32], strides = [1, 1]} : vector<12x32xf32> to vector<8x32xf32>
    %210 = vector.extract_strided_slice %207 {offsets = [2, 0], sizes = [8, 32], strides = [1, 1]} : vector<12x32xf32> to vector<8x32xf32>
    %211 = vector.extract_strided_slice %207 {offsets = [3, 0], sizes = [8, 32], strides = [1, 1]} : vector<12x32xf32> to vector<8x32xf32>
    %212 = vector.extract_strided_slice %207 {offsets = [4, 0], sizes = [8, 32], strides = [1, 1]} : vector<12x32xf32> to vector<8x32xf32>
    %213 = tpu.concatenate %208, %209, %210, %211, %212 in 1 : vector<8x32xf32>, vector<8x32xf32>, vector<8x32xf32>, vector<8x32xf32>, vector<8x32xf32> -> vector<8x160xf32>
    %c0_98 = arith.constant 0 : index
    %c0_99 = arith.constant 0 : index
    %214 = vector.load %arg14[%c0_98, %c0_99] : memref<160x32xf32, #tpu.memory_space<vmem>>, vector<160x32xf32>
    %cst_100 = arith.constant dense<0.000000e+00> : vector<8x32xf32>
    %215 = tpu.matmul %213, %214, %cst_100 {dimension_numbers = #tpu.dot_dimension_numbers<[1], [0], [0], [1], [0, 0, 1, 1], [], []>} : vector<8x160xf32>, vector<160x32xf32>, vector<8x32xf32> -> vector<8x32xf32>
    %c0_101 = arith.constant 0 : index
    %c0_102 = arith.constant 0 : index
    %216 = vector.load %arg15[%c0_101, %c0_102] : memref<1x32xf32, #tpu.memory_space<vmem>>, vector<1x32xf32>
    %217 = vector.broadcast %216 : vector<1x32xf32> to vector<8x32xf32>
    %218 = arith.addf %215, %217 : vector<8x32xf32>
    %cst_103 = arith.constant 0.000000e+00 : f32
    %219 = vector.broadcast %cst_103 : f32 to vector<8x32xf32>
    %220 = arith.cmpf oge, %218, %219 : vector<8x32xf32>
    %cst_104 = arith.constant 2.000000e-01 : f32
    %221 = vector.broadcast %cst_104 : f32 to vector<8x32xf32>
    %222 = arith.mulf %221, %218 : vector<8x32xf32>
    %223 = arith.select %220, %218, %222 : vector<8x32xi1>, vector<8x32xf32>
    %224 = vector.extract_strided_slice %223 {offsets = [2, 0], sizes = [1, 32], strides = [1, 1]} : vector<8x32xf32> to vector<1x32xf32>
    %225 = vector.extract_strided_slice %223 {offsets = [1, 0], sizes = [1, 32], strides = [1, 1]} : vector<8x32xf32> to vector<1x32xf32>
    %226 = vector.extract_strided_slice %223 {offsets = [6, 0], sizes = [1, 32], strides = [1, 1]} : vector<8x32xf32> to vector<1x32xf32>
    %227 = vector.extract_strided_slice %223 {offsets = [5, 0], sizes = [1, 32], strides = [1, 1]} : vector<8x32xf32> to vector<1x32xf32>
    %228 = tpu.concatenate %224, %225, %223, %226, %227 in 0 : vector<1x32xf32>, vector<1x32xf32>, vector<8x32xf32>, vector<1x32xf32>, vector<1x32xf32> -> vector<12x32xf32>
    %c0_105 = arith.constant 0 : index
    %c0_106 = arith.constant 0 : index
    %229 = vector.load %arg37[%c0_105, %c0_106] : memref<36x32xf32, #tpu.memory_space<vmem>>, vector<12x32xf32>
    tpu.vector_store %arg37[%c0_105, %c0_106], %228 {strides = array<i32>} : memref<36x32xf32, #tpu.memory_space<vmem>>, vector<12x32xf32>,
    %c0_107 = arith.constant 0 : index
    %c0_108 = arith.constant 0 : index
    %230 = vector.load %arg38[%c0_107, %c0_108] : memref<32x32xf32, #tpu.memory_space<vmem>>, vector<8x32xf32>
    tpu.vector_store %arg38[%c0_107, %c0_108], %198 {strides = array<i32>} : memref<32x32xf32, #tpu.memory_space<vmem>>, vector<8x32xf32>,
    %c0_109 = arith.constant 0 : index
    %c0_110 = arith.constant 0 : index
    %231 = tpu.strided_load %arg37[%c0_109, %c0_110] {strides = array<i32: 2, 1>} : memref<36x32xf32, #tpu.memory_space<vmem>>, vector<4x32xf32>
    %c1_111 = arith.constant 1 : index
    %c0_112 = arith.constant 0 : index
    %232 = tpu.strided_load %arg37[%c1_111, %c0_112] {strides = array<i32: 2, 1>} : memref<36x32xf32, #tpu.memory_space<vmem>>, vector<4x32xf32>
    %c2_113 = arith.constant 2 : index
    %c0_114 = arith.constant 0 : index
    %233 = tpu.strided_load %arg37[%c2_113, %c0_114] {strides = array<i32: 2, 1>} : memref<36x32xf32, #tpu.memory_space<vmem>>, vector<4x32xf32>
    %c3_115 = arith.constant 3 : index
    %c0_116 = arith.constant 0 : index
    %234 = tpu.strided_load %arg37[%c3_115, %c0_116] {strides = array<i32: 2, 1>} : memref<36x32xf32, #tpu.memory_space<vmem>>, vector<4x32xf32>
    %c4_117 = arith.constant 4 : index
    %c0_118 = arith.constant 0 : index
    %235 = tpu.strided_load %arg37[%c4_117, %c0_118] {strides = array<i32: 2, 1>} : memref<36x32xf32, #tpu.memory_space<vmem>>, vector<4x32xf32>
    %236 = tpu.concatenate %231, %232, %233, %234, %235 in 1 : vector<4x32xf32>, vector<4x32xf32>, vector<4x32xf32>, vector<4x32xf32>, vector<4x32xf32> -> vector<4x160xf32>
    %c0_119 = arith.constant 0 : index
    %c0_120 = arith.constant 0 : index
    %237 = vector.load %arg16[%c0_119, %c0_120] : memref<160x32xf32, #tpu.memory_space<vmem>>, vector<160x32xf32>
    %cst_121 = arith.constant dense<0.000000e+00> : vector<4x32xf32>
    %238 = tpu.matmul %236, %237, %cst_121 {dimension_numbers = #tpu.dot_dimension_numbers<[1], [0], [0], [1], [0, 0, 1, 1], [], []>} : vector<4x160xf32>, vector<160x32xf32>, vector<4x32xf32> -> vector<4x32xf32>
    %c0_122 = arith.constant 0 : index
    %c0_123 = arith.constant 0 : index
    %239 = vector.load %arg17[%c0_122, %c0_123] : memref<1x32xf32, #tpu.memory_space<vmem>>, vector<1x32xf32>
    %240 = vector.broadcast %239 : vector<1x32xf32> to vector<4x32xf32>
    %241 = arith.addf %238, %240 : vector<4x32xf32>
    %cst_124 = arith.constant 0.000000e+00 : f32
    %242 = vector.broadcast %cst_124 : f32 to vector<4x32xf32>
    %243 = arith.cmpf oge, %241, %242 : vector<4x32xf32>
    %cst_125 = arith.constant 2.000000e-01 : f32
    %244 = vector.broadcast %cst_125 : f32 to vector<4x32xf32>
    %245 = arith.mulf %244, %241 : vector<4x32xf32>
    %246 = arith.select %243, %241, %245 : vector<4x32xi1>, vector<4x32xf32>
    %c0_126 = arith.constant 0 : index
    %c0_127 = arith.constant 0 : index
    %247 = tpu.strided_load %arg38[%c0_126, %c0_127] {strides = array<i32: 2, 1>} : memref<32x32xf32, #tpu.memory_space<vmem>>, vector<4x32xf32>
    %c1_128 = arith.constant 1 : index
    %c0_129 = arith.constant 0 : index
    %248 = tpu.strided_load %arg38[%c1_128, %c0_129] {strides = array<i32: 2, 1>} : memref<32x32xf32, #tpu.memory_space<vmem>>, vector<4x32xf32>
    %249 = arith.addf %247, %248 : vector<4x32xf32>
    %cst_130 = arith.constant 5.000000e-01 : f32
    %250 = vector.broadcast %cst_130 : f32 to vector<4x32xf32>
    %251 = arith.mulf %250, %249 : vector<4x32xf32>
    %cst_131 = arith.constant dense<0.000000e+00> : vector<32xf32>
    %252 = vector.multi_reduction <add>, %246, %cst_131 [0] : vector<4x32xf32> to vector<32xf32>
    %253 = vector.shape_cast %252 : vector<32xf32> to vector<1x32xf32>
    %cst_132 = arith.constant 4.000000e+00 : f32
    %254 = vector.broadcast %cst_132 : f32 to vector<1x32xf32>
    %255 = arith.divf %253, %254 : vector<1x32xf32>
    %256 = vector.broadcast %255 : vector<1x32xf32> to vector<4x32xf32>
    %257 = arith.subf %246, %256 : vector<4x32xf32>
    %258 = arith.mulf %257, %257 : vector<4x32xf32>
    %cst_133 = arith.constant dense<0.000000e+00> : vector<32xf32>
    %259 = vector.multi_reduction <add>, %258, %cst_133 [0] : vector<4x32xf32> to vector<32xf32>
    %260 = vector.shape_cast %259 : vector<32xf32> to vector<1x32xf32>
    %cst_134 = arith.constant 4.000000e+00 : f32
    %261 = vector.broadcast %cst_134 : f32 to vector<1x32xf32>
    %262 = arith.divf %260, %261 : vector<1x32xf32>
    %263 = vector.broadcast %255 : vector<1x32xf32> to vector<4x32xf32>
    %264 = arith.subf %246, %263 : vector<4x32xf32>
    %cst_135 = arith.constant 9.99999974E-6 : f32
    %265 = vector.broadcast %cst_135 : f32 to vector<1x32xf32>
    %266 = arith.addf %262, %265 : vector<1x32xf32>
    %267 = math.rsqrt %266 : vector<1x32xf32>
    %268 = vector.broadcast %267 : vector<1x32xf32> to vector<4x32xf32>
    %269 = arith.mulf %264, %268 : vector<4x32xf32>
    %270 = arith.addf %269, %251 : vector<4x32xf32>
    %cst_136 = arith.constant dense<0.000000e+00> : vector<32xf32>
    %271 = vector.multi_reduction <add>, %270, %cst_136 [0] : vector<4x32xf32> to vector<32xf32>
    %272 = vector.shape_cast %271 : vector<32xf32> to vector<1x32xf32>
    %cst_137 = arith.constant 4.000000e+00 : f32
    %273 = vector.broadcast %cst_137 : f32 to vector<1x32xf32>
    %274 = arith.divf %272, %273 : vector<1x32xf32>
    %c0_138 = arith.constant 0 : index
    %c0_139 = arith.constant 0 : index
    %275 = vector.load %arg18[%c0_138, %c0_139] : memref<32x32xf32, #tpu.memory_space<vmem>>, vector<32x32xf32>
    %cst_140 = arith.constant dense<0.000000e+00> : vector<4x32xf32>
    %276 = tpu.matmul %270, %275, %cst_140 {dimension_numbers = #tpu.dot_dimension_numbers<[1], [0], [0], [1], [0, 0, 1, 1], [], []>} : vector<4x32xf32>, vector<32x32xf32>, vector<4x32xf32> -> vector<4x32xf32>
    %c0_141 = arith.constant 0 : index
    %c0_142 = arith.constant 0 : index
    %277 = vector.load %arg19[%c0_141, %c0_142] : memref<1x32xf32, #tpu.memory_space<vmem>>, vector<1x32xf32>
    %278 = vector.broadcast %277 : vector<1x32xf32> to vector<4x32xf32>
    %279 = arith.addf %276, %278 : vector<4x32xf32>
    %cst_143 = arith.constant 0.000000e+00 : f32
    %280 = vector.broadcast %cst_143 : f32 to vector<4x32xf32>
    %281 = arith.cmpf oge, %279, %280 : vector<4x32xf32>
    %cst_144 = arith.constant 2.000000e-01 : f32
    %282 = vector.broadcast %cst_144 : f32 to vector<4x32xf32>
    %283 = arith.mulf %282, %279 : vector<4x32xf32>
    %284 = arith.select %281, %279, %283 : vector<4x32xi1>, vector<4x32xf32>
    %c0_145 = arith.constant 0 : index
    %c0_146 = arith.constant 0 : index
    %285 = vector.load %arg20[%c0_145, %c0_146] : memref<32x32xf32, #tpu.memory_space<vmem>>, vector<32x32xf32>
    %cst_147 = arith.constant dense<0.000000e+00> : vector<4x32xf32>
    %286 = tpu.matmul %284, %285, %cst_147 {dimension_numbers = #tpu.dot_dimension_numbers<[1], [0], [0], [1], [0, 0, 1, 1], [], []>} : vector<4x32xf32>, vector<32x32xf32>, vector<4x32xf32> -> vector<4x32xf32>
    %c0_148 = arith.constant 0 : index
    %c0_149 = arith.constant 0 : index
    %287 = vector.load %arg21[%c0_148, %c0_149] : memref<1x32xf32, #tpu.memory_space<vmem>>, vector<1x32xf32>
    %288 = vector.broadcast %287 : vector<1x32xf32> to vector<4x32xf32>
    %289 = arith.addf %286, %288 : vector<4x32xf32>
    %cst_150 = arith.constant 0.000000e+00 : f32
    %290 = vector.broadcast %cst_150 : f32 to vector<4x32xf32>
    %291 = arith.cmpf oge, %289, %290 : vector<4x32xf32>
    %cst_151 = arith.constant 2.000000e-01 : f32
    %292 = vector.broadcast %cst_151 : f32 to vector<4x32xf32>
    %293 = arith.mulf %292, %289 : vector<4x32xf32>
    %294 = arith.select %291, %289, %293 : vector<4x32xi1>, vector<4x32xf32>
    %cst_152 = arith.constant dense<0.000000e+00> : vector<32xf32>
    %295 = vector.multi_reduction <add>, %294, %cst_152 [0] : vector<4x32xf32> to vector<32xf32>
    %296 = vector.shape_cast %295 : vector<32xf32> to vector<1x32xf32>
    %cst_153 = arith.constant 4.000000e+00 : f32
    %297 = vector.broadcast %cst_153 : f32 to vector<1x32xf32>
    %298 = arith.divf %296, %297 : vector<1x32xf32>
    %299 = vector.broadcast %298 : vector<1x32xf32> to vector<4x32xf32>
    %300 = arith.subf %294, %299 : vector<4x32xf32>
    %301 = arith.mulf %300, %300 : vector<4x32xf32>
    %cst_154 = arith.constant dense<0.000000e+00> : vector<32xf32>
    %302 = vector.multi_reduction <add>, %301, %cst_154 [0] : vector<4x32xf32> to vector<32xf32>
    %303 = vector.shape_cast %302 : vector<32xf32> to vector<1x32xf32>
    %cst_155 = arith.constant 4.000000e+00 : f32
    %304 = vector.broadcast %cst_155 : f32 to vector<1x32xf32>
    %305 = arith.divf %303, %304 : vector<1x32xf32>
    %306 = vector.broadcast %298 : vector<1x32xf32> to vector<4x32xf32>
    %307 = arith.subf %294, %306 : vector<4x32xf32>
    %cst_156 = arith.constant 9.99999974E-6 : f32
    %308 = vector.broadcast %cst_156 : f32 to vector<1x32xf32>
    %309 = arith.addf %305, %308 : vector<1x32xf32>
    %310 = math.rsqrt %309 : vector<1x32xf32>
    %311 = vector.broadcast %310 : vector<1x32xf32> to vector<4x32xf32>
    %312 = arith.mulf %307, %311 : vector<4x32xf32>
    %313 = arith.addf %312, %270 : vector<4x32xf32>
    %cst_157 = arith.constant dense<0.000000e+00> : vector<32xf32>
    %314 = vector.multi_reduction <add>, %313, %cst_157 [0] : vector<4x32xf32> to vector<32xf32>
    %315 = vector.shape_cast %314 : vector<32xf32> to vector<1x32xf32>
    %cst_158 = arith.constant 4.000000e+00 : f32
    %316 = vector.broadcast %cst_158 : f32 to vector<1x32xf32>
    %317 = arith.divf %315, %316 : vector<1x32xf32>
    %c0_159 = arith.constant 0 : index
    %c0_160 = arith.constant 0 : index
    %318 = vector.load %arg22[%c0_159, %c0_160] : memref<32x32xf32, #tpu.memory_space<vmem>>, vector<32x32xf32>
    %cst_161 = arith.constant dense<0.000000e+00> : vector<4x32xf32>
    %319 = tpu.matmul %313, %318, %cst_161 {dimension_numbers = #tpu.dot_dimension_numbers<[1], [0], [0], [1], [0, 0, 1, 1], [], []>} : vector<4x32xf32>, vector<32x32xf32>, vector<4x32xf32> -> vector<4x32xf32>
    %c0_162 = arith.constant 0 : index
    %c0_163 = arith.constant 0 : index
    %320 = vector.load %arg23[%c0_162, %c0_163] : memref<1x32xf32, #tpu.memory_space<vmem>>, vector<1x32xf32>
    %321 = vector.broadcast %320 : vector<1x32xf32> to vector<4x32xf32>
    %322 = arith.addf %319, %321 : vector<4x32xf32>
    %cst_164 = arith.constant 0.000000e+00 : f32
    %323 = vector.broadcast %cst_164 : f32 to vector<4x32xf32>
    %324 = arith.cmpf oge, %322, %323 : vector<4x32xf32>
    %cst_165 = arith.constant 2.000000e-01 : f32
    %325 = vector.broadcast %cst_165 : f32 to vector<4x32xf32>
    %326 = arith.mulf %325, %322 : vector<4x32xf32>
    %327 = arith.select %324, %322, %326 : vector<4x32xi1>, vector<4x32xf32>
    %c0_166 = arith.constant 0 : index
    %c0_167 = arith.constant 0 : index
    %328 = vector.load %arg24[%c0_166, %c0_167] : memref<32x32xf32, #tpu.memory_space<vmem>>, vector<32x32xf32>
    %cst_168 = arith.constant dense<0.000000e+00> : vector<4x32xf32>
    %329 = tpu.matmul %327, %328, %cst_168 {dimension_numbers = #tpu.dot_dimension_numbers<[1], [0], [0], [1], [0, 0, 1, 1], [], []>} : vector<4x32xf32>, vector<32x32xf32>, vector<4x32xf32> -> vector<4x32xf32>
    %c0_169 = arith.constant 0 : index
    %c0_170 = arith.constant 0 : index
    %330 = vector.load %arg25[%c0_169, %c0_170] : memref<1x32xf32, #tpu.memory_space<vmem>>, vector<1x32xf32>
    %331 = vector.broadcast %330 : vector<1x32xf32> to vector<4x32xf32>
    %332 = arith.addf %329, %331 : vector<4x32xf32>
    %cst_171 = arith.constant 0.000000e+00 : f32
    %333 = vector.broadcast %cst_171 : f32 to vector<4x32xf32>
    %334 = arith.cmpf oge, %332, %333 : vector<4x32xf32>
    %cst_172 = arith.constant 2.000000e-01 : f32
    %335 = vector.broadcast %cst_172 : f32 to vector<4x32xf32>
    %336 = arith.mulf %335, %332 : vector<4x32xf32>
    %337 = arith.select %334, %332, %336 : vector<4x32xi1>, vector<4x32xf32>
    %cst_173 = arith.constant dense<0.000000e+00> : vector<32xf32>
    %338 = vector.multi_reduction <add>, %337, %cst_173 [0] : vector<4x32xf32> to vector<32xf32>
    %339 = vector.shape_cast %338 : vector<32xf32> to vector<1x32xf32>
    %cst_174 = arith.constant 4.000000e+00 : f32
    %340 = vector.broadcast %cst_174 : f32 to vector<1x32xf32>
    %341 = arith.divf %339, %340 : vector<1x32xf32>
    %342 = vector.broadcast %341 : vector<1x32xf32> to vector<4x32xf32>
    %343 = arith.subf %337, %342 : vector<4x32xf32>
    %344 = arith.mulf %343, %343 : vector<4x32xf32>
    %cst_175 = arith.constant dense<0.000000e+00> : vector<32xf32>
    %345 = vector.multi_reduction <add>, %344, %cst_175 [0] : vector<4x32xf32> to vector<32xf32>
    %346 = vector.shape_cast %345 : vector<32xf32> to vector<1x32xf32>
    %cst_176 = arith.constant 4.000000e+00 : f32
    %347 = vector.broadcast %cst_176 : f32 to vector<1x32xf32>
    %348 = arith.divf %346, %347 : vector<1x32xf32>
    %349 = vector.broadcast %341 : vector<1x32xf32> to vector<4x32xf32>
    %350 = arith.subf %337, %349 : vector<4x32xf32>
    %cst_177 = arith.constant 9.99999974E-6 : f32
    %351 = vector.broadcast %cst_177 : f32 to vector<1x32xf32>
    %352 = arith.addf %348, %351 : vector<1x32xf32>
    %353 = math.rsqrt %352 : vector<1x32xf32>
    %354 = vector.broadcast %353 : vector<1x32xf32> to vector<4x32xf32>
    %355 = arith.mulf %350, %354 : vector<4x32xf32>
    %356 = arith.addf %355, %313 : vector<4x32xf32>
    %cst_178 = arith.constant dense<0.000000e+00> : vector<32xf32>
    %357 = vector.multi_reduction <add>, %356, %cst_178 [0] : vector<4x32xf32> to vector<32xf32>
    %358 = vector.shape_cast %357 : vector<32xf32> to vector<1x32xf32>
    %cst_179 = arith.constant 4.000000e+00 : f32
    %359 = vector.broadcast %cst_179 : f32 to vector<1x32xf32>
    %360 = arith.divf %358, %359 : vector<1x32xf32>
    %c0_180 = arith.constant 0 : index
    %c0_181 = arith.constant 0 : index
    %361 = vector.load %arg26[%c0_180, %c0_181] : memref<32x96xf32, #tpu.memory_space<vmem>>, vector<32x96xf32>
    %cst_182 = arith.constant dense<0.000000e+00> : vector<4x96xf32>
    %362 = tpu.matmul %356, %361, %cst_182 {dimension_numbers = #tpu.dot_dimension_numbers<[1], [0], [0], [1], [0, 0, 1, 1], [], []>} : vector<4x32xf32>, vector<32x96xf32>, vector<4x96xf32> -> vector<4x96xf32>
    %c0_183 = arith.constant 0 : index
    %c0_184 = arith.constant 0 : index
    %363 = vector.load %arg27[%c0_183, %c0_184] : memref<1x96xf32, #tpu.memory_space<vmem>>, vector<1x96xf32>
    %364 = vector.broadcast %363 : vector<1x96xf32> to vector<4x96xf32>
    %365 = arith.addf %362, %364 : vector<4x96xf32>
    %c0_185 = arith.constant 0 : index
    %c0_186 = arith.constant 0 : index
    %366 = vector.load %arg30[%c0_185, %c0_186] : memref<32x32xf32, #tpu.memory_space<vmem>>, vector<32x32xf32>
    %cst_187 = arith.constant dense<0.000000e+00> : vector<4x32xf32>
    %367 = tpu.matmul %356, %366, %cst_187 {dimension_numbers = #tpu.dot_dimension_numbers<[1], [0], [0], [1], [0, 0, 1, 1], [], []>} : vector<4x32xf32>, vector<32x32xf32>, vector<4x32xf32> -> vector<4x32xf32>
    %c0_188 = arith.constant 0 : index
    %c0_189 = arith.constant 0 : index
    %368 = vector.load %arg32[%c0_188, %c0_189] : memref<1x32xf32, #tpu.memory_space<vmem>>, vector<1x32xf32>
    %369 = vector.broadcast %368 : vector<1x32xf32> to vector<4x32xf32>
    %370 = arith.addf %367, %369 : vector<4x32xf32>
    %c0_190 = arith.constant 0 : index
    %c0_191 = arith.constant 0 : index
    %371 = vector.load %arg28[%c0_190, %c0_191] : memref<32x96xf32, #tpu.memory_space<vmem>>, vector<32x96xf32>
    %c0_192 = arith.constant 0 : index
    %c0_193 = arith.constant 0 : index
    %372 = vector.load %arg29[%c0_192, %c0_193] : memref<1x96xf32, #tpu.memory_space<vmem>>, vector<1x96xf32>
    %cst_194 = arith.constant 0.000000e+00 : f32
    %373 = vector.broadcast %cst_194 : f32 to vector<1x32xf32>
    %374 = vector.extract_strided_slice %365 {offsets = [0, 0], sizes = [1, 48], strides = [1, 1]} : vector<4x96xf32> to vector<1x48xf32>
    %375 = vector.extract_strided_slice %365 {offsets = [3, 48], sizes = [1, 48], strides = [1, 1]} : vector<4x96xf32> to vector<1x48xf32>
    %376 = tpu.concatenate %374, %375 in 1 : vector<1x48xf32>, vector<1x48xf32> -> vector<1x96xf32>
    %cst_195 = arith.constant dense<0.000000e+00> : vector<1x96xf32>
    %377 = tpu.matmul %373, %371, %cst_195 {dimension_numbers = #tpu.dot_dimension_numbers<[1], [0], [0], [1], [0, 0, 1, 1], [], []>} : vector<1x32xf32>, vector<32x96xf32>, vector<1x96xf32> -> vector<1x96xf32>
    %378 = arith.addf %377, %372 : vector<1x96xf32>
    %379 = vector.extract_strided_slice %376 {offsets = [0, 0], sizes = [1, 16], strides = [1, 1]} : vector<1x96xf32> to vector<1x16xf32>
    %380 = vector.extract_strided_slice %378 {offsets = [0, 0], sizes = [1, 16], strides = [1, 1]} : vector<1x96xf32> to vector<1x16xf32>
    %381 = arith.addf %379, %380 : vector<1x16xf32>
    %382 = arith.negf %381 : vector<1x16xf32>
    %383 = math.exp %382 : vector<1x16xf32>
    %cst_196 = arith.constant 1.000000e+00 : f32
    %384 = vector.broadcast %cst_196 : f32 to vector<1x16xf32>
    %385 = arith.addf %384, %383 : vector<1x16xf32>
    %386 = arith.divf %384, %385 : vector<1x16xf32>
    %387 = vector.extract_strided_slice %376 {offsets = [0, 16], sizes = [1, 16], strides = [1, 1]} : vector<1x96xf32> to vector<1x16xf32>
    %388 = vector.extract_strided_slice %378 {offsets = [0, 16], sizes = [1, 16], strides = [1, 1]} : vector<1x96xf32> to vector<1x16xf32>
    %389 = arith.addf %387, %388 : vector<1x16xf32>
    %390 = arith.negf %389 : vector<1x16xf32>
    %391 = math.exp %390 : vector<1x16xf32>
    %cst_197 = arith.constant 1.000000e+00 : f32
    %392 = vector.broadcast %cst_197 : f32 to vector<1x16xf32>
    %393 = arith.addf %392, %391 : vector<1x16xf32>
    %394 = arith.divf %392, %393 : vector<1x16xf32>
    %395 = vector.extract_strided_slice %376 {offsets = [0, 32], sizes = [1, 16], strides = [1, 1]} : vector<1x96xf32> to vector<1x16xf32>
    %396 = vector.extract_strided_slice %378 {offsets = [0, 32], sizes = [1, 16], strides = [1, 1]} : vector<1x96xf32> to vector<1x16xf32>
    %397 = arith.mulf %386, %396 : vector<1x16xf32>
    %398 = arith.addf %395, %397 : vector<1x16xf32>
    %399 = math.tanh %398 : vector<1x16xf32>
    %400 = vector.extract_strided_slice %376 {offsets = [0, 48], sizes = [1, 16], strides = [1, 1]} : vector<1x96xf32> to vector<1x16xf32>
    %401 = vector.extract_strided_slice %378 {offsets = [0, 48], sizes = [1, 16], strides = [1, 1]} : vector<1x96xf32> to vector<1x16xf32>
    %402 = arith.addf %400, %401 : vector<1x16xf32>
    %403 = arith.negf %402 : vector<1x16xf32>
    %404 = math.exp %403 : vector<1x16xf32>
    %cst_198 = arith.constant 1.000000e+00 : f32
    %405 = vector.broadcast %cst_198 : f32 to vector<1x16xf32>
    %406 = arith.addf %405, %404 : vector<1x16xf32>
    %407 = arith.divf %405, %406 : vector<1x16xf32>
    %408 = vector.extract_strided_slice %376 {offsets = [0, 64], sizes = [1, 16], strides = [1, 1]} : vector<1x96xf32> to vector<1x16xf32>
    %409 = vector.extract_strided_slice %378 {offsets = [0, 64], sizes = [1, 16], strides = [1, 1]} : vector<1x96xf32> to vector<1x16xf32>
    %410 = arith.addf %408, %409 : vector<1x16xf32>
    %411 = arith.negf %410 : vector<1x16xf32>
    %412 = math.exp %411 : vector<1x16xf32>
    %cst_199 = arith.constant 1.000000e+00 : f32
    %413 = vector.broadcast %cst_199 : f32 to vector<1x16xf32>
    %414 = arith.addf %413, %412 : vector<1x16xf32>
    %415 = arith.divf %413, %414 : vector<1x16xf32>
    %416 = vector.extract_strided_slice %376 {offsets = [0, 80], sizes = [1, 16], strides = [1, 1]} : vector<1x96xf32> to vector<1x16xf32>
    %417 = vector.extract_strided_slice %378 {offsets = [0, 80], sizes = [1, 16], strides = [1, 1]} : vector<1x96xf32> to vector<1x16xf32>
    %418 = arith.mulf %407, %417 : vector<1x16xf32>
    %419 = arith.addf %416, %418 : vector<1x16xf32>
    %420 = math.tanh %419 : vector<1x16xf32>
    %cst_200 = arith.constant 1.000000e+00 : f32
    %421 = vector.broadcast %cst_200 : f32 to vector<1x16xf32>
    %422 = arith.subf %421, %394 : vector<1x16xf32>
    %423 = arith.mulf %422, %399 : vector<1x16xf32>
    %424 = vector.extract_strided_slice %373 {offsets = [0, 0], sizes = [1, 16], strides = [1, 1]} : vector<1x32xf32> to vector<1x16xf32>
    %425 = arith.mulf %394, %424 : vector<1x16xf32>
    %426 = arith.addf %423, %425 : vector<1x16xf32>
    %cst_201 = arith.constant 1.000000e+00 : f32
    %427 = vector.broadcast %cst_201 : f32 to vector<1x16xf32>
    %428 = arith.subf %427, %415 : vector<1x16xf32>
    %429 = arith.mulf %428, %420 : vector<1x16xf32>
    %430 = vector.extract_strided_slice %373 {offsets = [0, 16], sizes = [1, 16], strides = [1, 1]} : vector<1x32xf32> to vector<1x16xf32>
    %431 = arith.mulf %415, %430 : vector<1x16xf32>
    %432 = arith.addf %429, %431 : vector<1x16xf32>
    %433 = tpu.concatenate %426, %432 in 1 : vector<1x16xf32>, vector<1x16xf32> -> vector<1x32xf32>
    %c0_202 = arith.constant 0 : index
    %c0_203 = arith.constant 0 : index
    %434 = vector.load %arg39[%c0_202, %c0_203] : memref<4x32xf32, #tpu.memory_space<vmem>>, vector<1x16xf32>
    tpu.vector_store %arg39[%c0_202, %c0_203], %426 {strides = array<i32>} : memref<4x32xf32, #tpu.memory_space<vmem>>, vector<1x16xf32>,
    %c3_204 = arith.constant 3 : index
    %c16 = arith.constant 16 : index
    %435 = vector.load %arg39[%c3_204, %c16] : memref<4x32xf32, #tpu.memory_space<vmem>>, vector<1x16xf32>
    tpu.vector_store %arg39[%c3_204, %c16], %432 {strides = array<i32>} : memref<4x32xf32, #tpu.memory_space<vmem>>, vector<1x16xf32>,
    %436 = vector.extract_strided_slice %365 {offsets = [1, 0], sizes = [1, 48], strides = [1, 1]} : vector<4x96xf32> to vector<1x48xf32>
    %437 = vector.extract_strided_slice %365 {offsets = [2, 48], sizes = [1, 48], strides = [1, 1]} : vector<4x96xf32> to vector<1x48xf32>
    %438 = tpu.concatenate %436, %437 in 1 : vector<1x48xf32>, vector<1x48xf32> -> vector<1x96xf32>
    %cst_205 = arith.constant dense<0.000000e+00> : vector<1x96xf32>
    %439 = tpu.matmul %433, %371, %cst_205 {dimension_numbers = #tpu.dot_dimension_numbers<[1], [0], [0], [1], [0, 0, 1, 1], [], []>} : vector<1x32xf32>, vector<32x96xf32>, vector<1x96xf32> -> vector<1x96xf32>
    %440 = arith.addf %439, %372 : vector<1x96xf32>
    %441 = vector.extract_strided_slice %438 {offsets = [0, 0], sizes = [1, 16], strides = [1, 1]} : vector<1x96xf32> to vector<1x16xf32>
    %442 = vector.extract_strided_slice %440 {offsets = [0, 0], sizes = [1, 16], strides = [1, 1]} : vector<1x96xf32> to vector<1x16xf32>
    %443 = arith.addf %441, %442 : vector<1x16xf32>
    %444 = arith.negf %443 : vector<1x16xf32>
    %445 = math.exp %444 : vector<1x16xf32>
    %cst_206 = arith.constant 1.000000e+00 : f32
    %446 = vector.broadcast %cst_206 : f32 to vector<1x16xf32>
    %447 = arith.addf %446, %445 : vector<1x16xf32>
    %448 = arith.divf %446, %447 : vector<1x16xf32>
    %449 = vector.extract_strided_slice %438 {offsets = [0, 16], sizes = [1, 16], strides = [1, 1]} : vector<1x96xf32> to vector<1x16xf32>
    %450 = vector.extract_strided_slice %440 {offsets = [0, 16], sizes = [1, 16], strides = [1, 1]} : vector<1x96xf32> to vector<1x16xf32>
    %451 = arith.addf %449, %450 : vector<1x16xf32>
    %452 = arith.negf %451 : vector<1x16xf32>
    %453 = math.exp %452 : vector<1x16xf32>
    %cst_207 = arith.constant 1.000000e+00 : f32
    %454 = vector.broadcast %cst_207 : f32 to vector<1x16xf32>
    %455 = arith.addf %454, %453 : vector<1x16xf32>
    %456 = arith.divf %454, %455 : vector<1x16xf32>
    %457 = vector.extract_strided_slice %438 {offsets = [0, 32], sizes = [1, 16], strides = [1, 1]} : vector<1x96xf32> to vector<1x16xf32>
    %458 = vector.extract_strided_slice %440 {offsets = [0, 32], sizes = [1, 16], strides = [1, 1]} : vector<1x96xf32> to vector<1x16xf32>
    %459 = arith.mulf %448, %458 : vector<1x16xf32>
    %460 = arith.addf %457, %459 : vector<1x16xf32>
    %461 = math.tanh %460 : vector<1x16xf32>
    %462 = vector.extract_strided_slice %438 {offsets = [0, 48], sizes = [1, 16], strides = [1, 1]} : vector<1x96xf32> to vector<1x16xf32>
    %463 = vector.extract_strided_slice %440 {offsets = [0, 48], sizes = [1, 16], strides = [1, 1]} : vector<1x96xf32> to vector<1x16xf32>
    %464 = arith.addf %462, %463 : vector<1x16xf32>
    %465 = arith.negf %464 : vector<1x16xf32>
    %466 = math.exp %465 : vector<1x16xf32>
    %cst_208 = arith.constant 1.000000e+00 : f32
    %467 = vector.broadcast %cst_208 : f32 to vector<1x16xf32>
    %468 = arith.addf %467, %466 : vector<1x16xf32>
    %469 = arith.divf %467, %468 : vector<1x16xf32>
    %470 = vector.extract_strided_slice %438 {offsets = [0, 64], sizes = [1, 16], strides = [1, 1]} : vector<1x96xf32> to vector<1x16xf32>
    %471 = vector.extract_strided_slice %440 {offsets = [0, 64], sizes = [1, 16], strides = [1, 1]} : vector<1x96xf32> to vector<1x16xf32>
    %472 = arith.addf %470, %471 : vector<1x16xf32>
    %473 = arith.negf %472 : vector<1x16xf32>
    %474 = math.exp %473 : vector<1x16xf32>
    %cst_209 = arith.constant 1.000000e+00 : f32
    %475 = vector.broadcast %cst_209 : f32 to vector<1x16xf32>
    %476 = arith.addf %475, %474 : vector<1x16xf32>
    %477 = arith.divf %475, %476 : vector<1x16xf32>
    %478 = vector.extract_strided_slice %438 {offsets = [0, 80], sizes = [1, 16], strides = [1, 1]} : vector<1x96xf32> to vector<1x16xf32>
    %479 = vector.extract_strided_slice %440 {offsets = [0, 80], sizes = [1, 16], strides = [1, 1]} : vector<1x96xf32> to vector<1x16xf32>
    %480 = arith.mulf %469, %479 : vector<1x16xf32>
    %481 = arith.addf %478, %480 : vector<1x16xf32>
    %482 = math.tanh %481 : vector<1x16xf32>
    %cst_210 = arith.constant 1.000000e+00 : f32
    %483 = vector.broadcast %cst_210 : f32 to vector<1x16xf32>
    %484 = arith.subf %483, %456 : vector<1x16xf32>
    %485 = arith.mulf %484, %461 : vector<1x16xf32>
    %486 = vector.extract_strided_slice %433 {offsets = [0, 0], sizes = [1, 16], strides = [1, 1]} : vector<1x32xf32> to vector<1x16xf32>
    %487 = arith.mulf %456, %486 : vector<1x16xf32>
    %488 = arith.addf %485, %487 : vector<1x16xf32>
    %cst_211 = arith.constant 1.000000e+00 : f32
    %489 = vector.broadcast %cst_211 : f32 to vector<1x16xf32>
    %490 = arith.subf %489, %477 : vector<1x16xf32>
    %491 = arith.mulf %490, %482 : vector<1x16xf32>
    %492 = vector.extract_strided_slice %433 {offsets = [0, 16], sizes = [1, 16], strides = [1, 1]} : vector<1x32xf32> to vector<1x16xf32>
    %493 = arith.mulf %477, %492 : vector<1x16xf32>
    %494 = arith.addf %491, %493 : vector<1x16xf32>
    %495 = tpu.concatenate %488, %494 in 1 : vector<1x16xf32>, vector<1x16xf32> -> vector<1x32xf32>
    %c1_212 = arith.constant 1 : index
    %c0_213 = arith.constant 0 : index
    %496 = vector.load %arg39[%c1_212, %c0_213] : memref<4x32xf32, #tpu.memory_space<vmem>>, vector<1x16xf32>
    tpu.vector_store %arg39[%c1_212, %c0_213], %488 {strides = array<i32>} : memref<4x32xf32, #tpu.memory_space<vmem>>, vector<1x16xf32>,
    %c2_214 = arith.constant 2 : index
    %c16_215 = arith.constant 16 : index
    %497 = vector.load %arg39[%c2_214, %c16_215] : memref<4x32xf32, #tpu.memory_space<vmem>>, vector<1x16xf32>
    tpu.vector_store %arg39[%c2_214, %c16_215], %494 {strides = array<i32>} : memref<4x32xf32, #tpu.memory_space<vmem>>, vector<1x16xf32>,
    %498 = vector.extract_strided_slice %365 {offsets = [2, 0], sizes = [1, 48], strides = [1, 1]} : vector<4x96xf32> to vector<1x48xf32>
    %499 = vector.extract_strided_slice %365 {offsets = [1, 48], sizes = [1, 48], strides = [1, 1]} : vector<4x96xf32> to vector<1x48xf32>
    %500 = tpu.concatenate %498, %499 in 1 : vector<1x48xf32>, vector<1x48xf32> -> vector<1x96xf32>
    %cst_216 = arith.constant dense<0.000000e+00> : vector<1x96xf32>
    %501 = tpu.matmul %495, %371, %cst_216 {dimension_numbers = #tpu.dot_dimension_numbers<[1], [0], [0], [1], [0, 0, 1, 1], [], []>} : vector<1x32xf32>, vector<32x96xf32>, vector<1x96xf32> -> vector<1x96xf32>
    %502 = arith.addf %501, %372 : vector<1x96xf32>
    %503 = vector.extract_strided_slice %500 {offsets = [0, 0], sizes = [1, 16], strides = [1, 1]} : vector<1x96xf32> to vector<1x16xf32>
    %504 = vector.extract_strided_slice %502 {offsets = [0, 0], sizes = [1, 16], strides = [1, 1]} : vector<1x96xf32> to vector<1x16xf32>
    %505 = arith.addf %503, %504 : vector<1x16xf32>
    %506 = arith.negf %505 : vector<1x16xf32>
    %507 = math.exp %506 : vector<1x16xf32>
    %cst_217 = arith.constant 1.000000e+00 : f32
    %508 = vector.broadcast %cst_217 : f32 to vector<1x16xf32>
    %509 = arith.addf %508, %507 : vector<1x16xf32>
    %510 = arith.divf %508, %509 : vector<1x16xf32>
    %511 = vector.extract_strided_slice %500 {offsets = [0, 16], sizes = [1, 16], strides = [1, 1]} : vector<1x96xf32> to vector<1x16xf32>
    %512 = vector.extract_strided_slice %502 {offsets = [0, 16], sizes = [1, 16], strides = [1, 1]} : vector<1x96xf32> to vector<1x16xf32>
    %513 = arith.addf %511, %512 : vector<1x16xf32>
    %514 = arith.negf %513 : vector<1x16xf32>
    %515 = math.exp %514 : vector<1x16xf32>
    %cst_218 = arith.constant 1.000000e+00 : f32
    %516 = vector.broadcast %cst_218 : f32 to vector<1x16xf32>
    %517 = arith.addf %516, %515 : vector<1x16xf32>
    %518 = arith.divf %516, %517 : vector<1x16xf32>
    %519 = vector.extract_strided_slice %500 {offsets = [0, 32], sizes = [1, 16], strides = [1, 1]} : vector<1x96xf32> to vector<1x16xf32>
    %520 = vector.extract_strided_slice %502 {offsets = [0, 32], sizes = [1, 16], strides = [1, 1]} : vector<1x96xf32> to vector<1x16xf32>
    %521 = arith.mulf %510, %520 : vector<1x16xf32>
    %522 = arith.addf %519, %521 : vector<1x16xf32>
    %523 = math.tanh %522 : vector<1x16xf32>
    %524 = vector.extract_strided_slice %500 {offsets = [0, 48], sizes = [1, 16], strides = [1, 1]} : vector<1x96xf32> to vector<1x16xf32>
    %525 = vector.extract_strided_slice %502 {offsets = [0, 48], sizes = [1, 16], strides = [1, 1]} : vector<1x96xf32> to vector<1x16xf32>
    %526 = arith.addf %524, %525 : vector<1x16xf32>
    %527 = arith.negf %526 : vector<1x16xf32>
    %528 = math.exp %527 : vector<1x16xf32>
    %cst_219 = arith.constant 1.000000e+00 : f32
    %529 = vector.broadcast %cst_219 : f32 to vector<1x16xf32>
    %530 = arith.addf %529, %528 : vector<1x16xf32>
    %531 = arith.divf %529, %530 : vector<1x16xf32>
    %532 = vector.extract_strided_slice %500 {offsets = [0, 64], sizes = [1, 16], strides = [1, 1]} : vector<1x96xf32> to vector<1x16xf32>
    %533 = vector.extract_strided_slice %502 {offsets = [0, 64], sizes = [1, 16], strides = [1, 1]} : vector<1x96xf32> to vector<1x16xf32>
    %534 = arith.addf %532, %533 : vector<1x16xf32>
    %535 = arith.negf %534 : vector<1x16xf32>
    %536 = math.exp %535 : vector<1x16xf32>
    %cst_220 = arith.constant 1.000000e+00 : f32
    %537 = vector.broadcast %cst_220 : f32 to vector<1x16xf32>
    %538 = arith.addf %537, %536 : vector<1x16xf32>
    %539 = arith.divf %537, %538 : vector<1x16xf32>
    %540 = vector.extract_strided_slice %500 {offsets = [0, 80], sizes = [1, 16], strides = [1, 1]} : vector<1x96xf32> to vector<1x16xf32>
    %541 = vector.extract_strided_slice %502 {offsets = [0, 80], sizes = [1, 16], strides = [1, 1]} : vector<1x96xf32> to vector<1x16xf32>
    %542 = arith.mulf %531, %541 : vector<1x16xf32>
    %543 = arith.addf %540, %542 : vector<1x16xf32>
    %544 = math.tanh %543 : vector<1x16xf32>
    %cst_221 = arith.constant 1.000000e+00 : f32
    %545 = vector.broadcast %cst_221 : f32 to vector<1x16xf32>
    %546 = arith.subf %545, %518 : vector<1x16xf32>
    %547 = arith.mulf %546, %523 : vector<1x16xf32>
    %548 = vector.extract_strided_slice %495 {offsets = [0, 0], sizes = [1, 16], strides = [1, 1]} : vector<1x32xf32> to vector<1x16xf32>
    %549 = arith.mulf %518, %548 : vector<1x16xf32>
    %550 = arith.addf %547, %549 : vector<1x16xf32>
    %cst_222 = arith.constant 1.000000e+00 : f32
    %551 = vector.broadcast %cst_222 : f32 to vector<1x16xf32>
    %552 = arith.subf %551, %539 : vector<1x16xf32>
    %553 = arith.mulf %552, %544 : vector<1x16xf32>
    %554 = vector.extract_strided_slice %495 {offsets = [0, 16], sizes = [1, 16], strides = [1, 1]} : vector<1x32xf32> to vector<1x16xf32>
    %555 = arith.mulf %539, %554 : vector<1x16xf32>
    %556 = arith.addf %553, %555 : vector<1x16xf32>
    %557 = tpu.concatenate %550, %556 in 1 : vector<1x16xf32>, vector<1x16xf32> -> vector<1x32xf32>
    %c2_223 = arith.constant 2 : index
    %c0_224 = arith.constant 0 : index
    %558 = vector.load %arg39[%c2_223, %c0_224] : memref<4x32xf32, #tpu.memory_space<vmem>>, vector<1x16xf32>
    tpu.vector_store %arg39[%c2_223, %c0_224], %550 {strides = array<i32>} : memref<4x32xf32, #tpu.memory_space<vmem>>, vector<1x16xf32>,
    %c1_225 = arith.constant 1 : index
    %c16_226 = arith.constant 16 : index
    %559 = vector.load %arg39[%c1_225, %c16_226] : memref<4x32xf32, #tpu.memory_space<vmem>>, vector<1x16xf32>
    tpu.vector_store %arg39[%c1_225, %c16_226], %556 {strides = array<i32>} : memref<4x32xf32, #tpu.memory_space<vmem>>, vector<1x16xf32>,
    %560 = vector.extract_strided_slice %365 {offsets = [3, 0], sizes = [1, 48], strides = [1, 1]} : vector<4x96xf32> to vector<1x48xf32>
    %561 = vector.extract_strided_slice %365 {offsets = [0, 48], sizes = [1, 48], strides = [1, 1]} : vector<4x96xf32> to vector<1x48xf32>
    %562 = tpu.concatenate %560, %561 in 1 : vector<1x48xf32>, vector<1x48xf32> -> vector<1x96xf32>
    %cst_227 = arith.constant dense<0.000000e+00> : vector<1x96xf32>
    %563 = tpu.matmul %557, %371, %cst_227 {dimension_numbers = #tpu.dot_dimension_numbers<[1], [0], [0], [1], [0, 0, 1, 1], [], []>} : vector<1x32xf32>, vector<32x96xf32>, vector<1x96xf32> -> vector<1x96xf32>
    %564 = arith.addf %563, %372 : vector<1x96xf32>
    %565 = vector.extract_strided_slice %562 {offsets = [0, 0], sizes = [1, 16], strides = [1, 1]} : vector<1x96xf32> to vector<1x16xf32>
    %566 = vector.extract_strided_slice %564 {offsets = [0, 0], sizes = [1, 16], strides = [1, 1]} : vector<1x96xf32> to vector<1x16xf32>
    %567 = arith.addf %565, %566 : vector<1x16xf32>
    %568 = arith.negf %567 : vector<1x16xf32>
    %569 = math.exp %568 : vector<1x16xf32>
    %cst_228 = arith.constant 1.000000e+00 : f32
    %570 = vector.broadcast %cst_228 : f32 to vector<1x16xf32>
    %571 = arith.addf %570, %569 : vector<1x16xf32>
    %572 = arith.divf %570, %571 : vector<1x16xf32>
    %573 = vector.extract_strided_slice %562 {offsets = [0, 16], sizes = [1, 16], strides = [1, 1]} : vector<1x96xf32> to vector<1x16xf32>
    %574 = vector.extract_strided_slice %564 {offsets = [0, 16], sizes = [1, 16], strides = [1, 1]} : vector<1x96xf32> to vector<1x16xf32>
    %575 = arith.addf %573, %574 : vector<1x16xf32>
    %576 = arith.negf %575 : vector<1x16xf32>
    %577 = math.exp %576 : vector<1x16xf32>
    %cst_229 = arith.constant 1.000000e+00 : f32
    %578 = vector.broadcast %cst_229 : f32 to vector<1x16xf32>
    %579 = arith.addf %578, %577 : vector<1x16xf32>
    %580 = arith.divf %578, %579 : vector<1x16xf32>
    %581 = vector.extract_strided_slice %562 {offsets = [0, 32], sizes = [1, 16], strides = [1, 1]} : vector<1x96xf32> to vector<1x16xf32>
    %582 = vector.extract_strided_slice %564 {offsets = [0, 32], sizes = [1, 16], strides = [1, 1]} : vector<1x96xf32> to vector<1x16xf32>
    %583 = arith.mulf %572, %582 : vector<1x16xf32>
    %584 = arith.addf %581, %583 : vector<1x16xf32>
    %585 = math.tanh %584 : vector<1x16xf32>
    %586 = vector.extract_strided_slice %562 {offsets = [0, 48], sizes = [1, 16], strides = [1, 1]} : vector<1x96xf32> to vector<1x16xf32>
    %587 = vector.extract_strided_slice %564 {offsets = [0, 48], sizes = [1, 16], strides = [1, 1]} : vector<1x96xf32> to vector<1x16xf32>
    %588 = arith.addf %586, %587 : vector<1x16xf32>
    %589 = arith.negf %588 : vector<1x16xf32>
    %590 = math.exp %589 : vector<1x16xf32>
    %cst_230 = arith.constant 1.000000e+00 : f32
    %591 = vector.broadcast %cst_230 : f32 to vector<1x16xf32>
    %592 = arith.addf %591, %590 : vector<1x16xf32>
    %593 = arith.divf %591, %592 : vector<1x16xf32>
    %594 = vector.extract_strided_slice %562 {offsets = [0, 64], sizes = [1, 16], strides = [1, 1]} : vector<1x96xf32> to vector<1x16xf32>
    %595 = vector.extract_strided_slice %564 {offsets = [0, 64], sizes = [1, 16], strides = [1, 1]} : vector<1x96xf32> to vector<1x16xf32>
    %596 = arith.addf %594, %595 : vector<1x16xf32>
    %597 = arith.negf %596 : vector<1x16xf32>
    %598 = math.exp %597 : vector<1x16xf32>
    %cst_231 = arith.constant 1.000000e+00 : f32
    %599 = vector.broadcast %cst_231 : f32 to vector<1x16xf32>
    %600 = arith.addf %599, %598 : vector<1x16xf32>
    %601 = arith.divf %599, %600 : vector<1x16xf32>
    %602 = vector.extract_strided_slice %562 {offsets = [0, 80], sizes = [1, 16], strides = [1, 1]} : vector<1x96xf32> to vector<1x16xf32>
    %603 = vector.extract_strided_slice %564 {offsets = [0, 80], sizes = [1, 16], strides = [1, 1]} : vector<1x96xf32> to vector<1x16xf32>
    %604 = arith.mulf %593, %603 : vector<1x16xf32>
    %605 = arith.addf %602, %604 : vector<1x16xf32>
    %606 = math.tanh %605 : vector<1x16xf32>
    %cst_232 = arith.constant 1.000000e+00 : f32
    %607 = vector.broadcast %cst_232 : f32 to vector<1x16xf32>
    %608 = arith.subf %607, %580 : vector<1x16xf32>
    %609 = arith.mulf %608, %585 : vector<1x16xf32>
    %610 = vector.extract_strided_slice %557 {offsets = [0, 0], sizes = [1, 16], strides = [1, 1]} : vector<1x32xf32> to vector<1x16xf32>
    %611 = arith.mulf %580, %610 : vector<1x16xf32>
    %612 = arith.addf %609, %611 : vector<1x16xf32>
    %cst_233 = arith.constant 1.000000e+00 : f32
    %613 = vector.broadcast %cst_233 : f32 to vector<1x16xf32>
    %614 = arith.subf %613, %601 : vector<1x16xf32>
    %615 = arith.mulf %614, %606 : vector<1x16xf32>
    %616 = vector.extract_strided_slice %557 {offsets = [0, 16], sizes = [1, 16], strides = [1, 1]} : vector<1x32xf32> to vector<1x16xf32>
    %617 = arith.mulf %601, %616 : vector<1x16xf32>
    %618 = arith.addf %615, %617 : vector<1x16xf32>
    %c3_234 = arith.constant 3 : index
    %c0_235 = arith.constant 0 : index
    %619 = vector.load %arg39[%c3_234, %c0_235] : memref<4x32xf32, #tpu.memory_space<vmem>>, vector<1x16xf32>
    tpu.vector_store %arg39[%c3_234, %c0_235], %612 {strides = array<i32>} : memref<4x32xf32, #tpu.memory_space<vmem>>, vector<1x16xf32>,
    %c0_236 = arith.constant 0 : index
    %c16_237 = arith.constant 16 : index
    %620 = vector.load %arg39[%c0_236, %c16_237] : memref<4x32xf32, #tpu.memory_space<vmem>>, vector<1x16xf32>
    tpu.vector_store %arg39[%c0_236, %c16_237], %618 {strides = array<i32>} : memref<4x32xf32, #tpu.memory_space<vmem>>, vector<1x16xf32>,
    %c0_238 = arith.constant 0 : index
    %c0_239 = arith.constant 0 : index
    %621 = vector.load %arg39[%c0_238, %c0_239] : memref<4x32xf32, #tpu.memory_space<vmem>>, vector<4x32xf32>
    %c0_240 = arith.constant 0 : index
    %c0_241 = arith.constant 0 : index
    %622 = vector.load %arg31[%c0_240, %c0_241] : memref<32x32xf32, #tpu.memory_space<vmem>>, vector<32x32xf32>
    %cst_242 = arith.constant dense<0.000000e+00> : vector<4x32xf32>
    %623 = tpu.matmul %621, %622, %cst_242 {dimension_numbers = #tpu.dot_dimension_numbers<[1], [0], [0], [1], [0, 0, 1, 1], [], []>} : vector<4x32xf32>, vector<32x32xf32>, vector<4x32xf32> -> vector<4x32xf32>
    %624 = arith.addf %370, %623 : vector<4x32xf32>
    %cst_243 = arith.constant 0.000000e+00 : f32
    %625 = vector.broadcast %cst_243 : f32 to vector<4x32xf32>
    %626 = arith.cmpf oge, %624, %625 : vector<4x32xf32>
    %cst_244 = arith.constant 2.000000e-01 : f32
    %627 = vector.broadcast %cst_244 : f32 to vector<4x32xf32>
    %628 = arith.mulf %627, %624 : vector<4x32xf32>
    %629 = arith.select %626, %624, %628 : vector<4x32xi1>, vector<4x32xf32>
    %c0_245 = arith.constant 0 : index
    %c0_246 = arith.constant 0 : index
    %c0_247 = arith.constant 0 : index
    %630 = vector.load %arg35[%c0_245, %c0_246, %c0_247] : memref<1x4x32xf32, #tpu.memory_space<vmem>>, vector<1x4x32xf32>
    %631 = vector.shape_cast %630 : vector<1x4x32xf32> to vector<4x32xf32>
    %632 = vector.shape_cast %629 : vector<4x32xf32> to vector<1x4x32xf32>
    tpu.vector_store %arg35[%c0_245, %c0_246, %c0_247], %632 {strides = array<i32>} : memref<1x4x32xf32, #tpu.memory_space<vmem>>, vector<1x4x32xf32>,
    %633 = tpu.concatenate %58, %130, %202, %274, %317, %360, %360 in 1 : vector<1x32xf32>, vector<1x32xf32>, vector<1x32xf32>, vector<1x32xf32>, vector<1x32xf32>, vector<1x32xf32>, vector<1x32xf32> -> vector<1x224xf32>
    %c0_248 = arith.constant 0 : index
    %c0_249 = arith.constant 0 : index
    %634 = vector.load %arg33[%c0_248, %c0_249] : memref<224x112xf32, #tpu.memory_space<vmem>>, vector<224x112xf32>
    %cst_250 = arith.constant dense<0.000000e+00> : vector<1x112xf32>
    %635 = tpu.matmul %633, %634, %cst_250 {dimension_numbers = #tpu.dot_dimension_numbers<[1], [0], [0], [1], [0, 0, 1, 1], [], []>} : vector<1x224xf32>, vector<224x112xf32>, vector<1x112xf32> -> vector<1x112xf32>
    %c0_251 = arith.constant 0 : index
    %c0_252 = arith.constant 0 : index
    %636 = vector.load %arg34[%c0_251, %c0_252] : memref<1x112xf32, #tpu.memory_space<vmem>>, vector<1x112xf32>
    %637 = arith.addf %635, %636 : vector<1x112xf32>
    %c0_253 = arith.constant 0 : index
    %c0_254 = arith.constant 0 : index
    %c0_255 = arith.constant 0 : index
    %638 = vector.load %arg36[%c0_253, %c0_254, %c0_255] : memref<1x1x112xf32, #tpu.memory_space<vmem>>, vector<1x1x112xf32>
    %639 = vector.shape_cast %638 : vector<1x1x112xf32> to vector<1x112xf32>
    %640 = vector.shape_cast %637 : vector<1x112xf32> to vector<1x1x112xf32>
    tpu.vector_store %arg36[%c0_253, %c0_254, %c0_255], %640 {strides = array<i32>} : memref<1x1x112xf32, #tpu.memory_space<vmem>>, vector<1x1x112xf32>,
    return
  }
  func.func @transform_0(%arg0: i32) -> (i32, i32, i32) {
    %c0_i32 = arith.constant 0 : i32
    %c0_i32_0 = arith.constant 0 : i32
    %c0_i32_1 = arith.constant 0 : i32
    return %arg0, %c0_i32, %c0_i32_0 : i32, i32, i32
  }
  func.func @transform_1(%arg0: i32) -> (i32, i32) {
    %c0_i32 = arith.constant 0 : i32
    %c0_i32_0 = arith.constant 0 : i32
    %c0_i32_1 = arith.constant 0 : i32
    return %c0_i32, %c0_i32_0 : i32, i32
  }
  func.func @transform_2(%arg0: i32) -> (i32, i32) {
    %c0_i32 = arith.constant 0 : i32
    %c0_i32_0 = arith.constant 0 : i32
    %c0_i32_1 = arith.constant 0 : i32
    return %c0_i32, %c0_i32_0 : i32, i32
  }
  func.func @transform_3(%arg0: i32) -> (i32, i32) {
    %c0_i32 = arith.constant 0 : i32
    %c0_i32_0 = arith.constant 0 : i32
    %c0_i32_1 = arith.constant 0 : i32
    return %c0_i32, %c0_i32_0 : i32, i32
  }
  func.func @transform_4(%arg0: i32) -> (i32, i32) {
    %c0_i32 = arith.constant 0 : i32
    %c0_i32_0 = arith.constant 0 : i32
    %c0_i32_1 = arith.constant 0 : i32
    return %c0_i32, %c0_i32_0 : i32, i32
  }
  func.func @transform_5(%arg0: i32) -> (i32, i32) {
    %c0_i32 = arith.constant 0 : i32
    %c0_i32_0 = arith.constant 0 : i32
    %c0_i32_1 = arith.constant 0 : i32
    return %c0_i32, %c0_i32_0 : i32, i32
  }
  func.func @transform_6(%arg0: i32) -> (i32, i32) {
    %c0_i32 = arith.constant 0 : i32
    %c0_i32_0 = arith.constant 0 : i32
    %c0_i32_1 = arith.constant 0 : i32
    return %c0_i32, %c0_i32_0 : i32, i32
  }
  func.func @transform_7(%arg0: i32) -> (i32, i32) {
    %c0_i32 = arith.constant 0 : i32
    %c0_i32_0 = arith.constant 0 : i32
    %c0_i32_1 = arith.constant 0 : i32
    return %c0_i32, %c0_i32_0 : i32, i32
  }
  func.func @transform_8(%arg0: i32) -> (i32, i32) {
    %c0_i32 = arith.constant 0 : i32
    %c0_i32_0 = arith.constant 0 : i32
    %c0_i32_1 = arith.constant 0 : i32
    return %c0_i32, %c0_i32_0 : i32, i32
  }
  func.func @transform_9(%arg0: i32) -> (i32, i32) {
    %c0_i32 = arith.constant 0 : i32
    %c0_i32_0 = arith.constant 0 : i32
    %c0_i32_1 = arith.constant 0 : i32
    return %c0_i32, %c0_i32_0 : i32, i32
  }
  func.func @transform_10(%arg0: i32) -> (i32, i32) {
    %c0_i32 = arith.constant 0 : i32
    %c0_i32_0 = arith.constant 0 : i32
    %c0_i32_1 = arith.constant 0 : i32
    return %c0_i32, %c0_i32_0 : i32, i32
  }
  func.func @transform_11(%arg0: i32) -> (i32, i32) {
    %c0_i32 = arith.constant 0 : i32
    %c0_i32_0 = arith.constant 0 : i32
    %c0_i32_1 = arith.constant 0 : i32
    return %c0_i32, %c0_i32_0 : i32, i32
  }
  func.func @transform_12(%arg0: i32) -> (i32, i32) {
    %c0_i32 = arith.constant 0 : i32
    %c0_i32_0 = arith.constant 0 : i32
    %c0_i32_1 = arith.constant 0 : i32
    return %c0_i32, %c0_i32_0 : i32, i32
  }
  func.func @transform_13(%arg0: i32) -> (i32, i32) {
    %c0_i32 = arith.constant 0 : i32
    %c0_i32_0 = arith.constant 0 : i32
    %c0_i32_1 = arith.constant 0 : i32
    return %c0_i32, %c0_i32_0 : i32, i32
  }
  func.func @transform_14(%arg0: i32) -> (i32, i32) {
    %c0_i32 = arith.constant 0 : i32
    %c0_i32_0 = arith.constant 0 : i32
    %c0_i32_1 = arith.constant 0 : i32
    return %c0_i32, %c0_i32_0 : i32, i32
  }
  func.func @transform_15(%arg0: i32) -> (i32, i32) {
    %c0_i32 = arith.constant 0 : i32
    %c0_i32_0 = arith.constant 0 : i32
    %c0_i32_1 = arith.constant 0 : i32
    return %c0_i32, %c0_i32_0 : i32, i32
  }
  func.func @transform_16(%arg0: i32) -> (i32, i32) {
    %c0_i32 = arith.constant 0 : i32
    %c0_i32_0 = arith.constant 0 : i32
    %c0_i32_1 = arith.constant 0 : i32
    return %c0_i32, %c0_i32_0 : i32, i32
  }
  func.func @transform_17(%arg0: i32) -> (i32, i32) {
    %c0_i32 = arith.constant 0 : i32
    %c0_i32_0 = arith.constant 0 : i32
    %c0_i32_1 = arith.constant 0 : i32
    return %c0_i32, %c0_i32_0 : i32, i32
  }
  func.func @transform_18(%arg0: i32) -> (i32, i32) {
    %c0_i32 = arith.constant 0 : i32
    %c0_i32_0 = arith.constant 0 : i32
    %c0_i32_1 = arith.constant 0 : i32
    return %c0_i32, %c0_i32_0 : i32, i32
  }
  func.func @transform_19(%arg0: i32) -> (i32, i32) {
    %c0_i32 = arith.constant 0 : i32
    %c0_i32_0 = arith.constant 0 : i32
    %c0_i32_1 = arith.constant 0 : i32
    return %c0_i32, %c0_i32_0 : i32, i32
  }
  func.func @transform_20(%arg0: i32) -> (i32, i32) {
    %c0_i32 = arith.constant 0 : i32
    %c0_i32_0 = arith.constant 0 : i32
    %c0_i32_1 = arith.constant 0 : i32
    return %c0_i32, %c0_i32_0 : i32, i32
  }
  func.func @transform_21(%arg0: i32) -> (i32, i32) {
    %c0_i32 = arith.constant 0 : i32
    %c0_i32_0 = arith.constant 0 : i32
    %c0_i32_1 = arith.constant 0 : i32
    return %c0_i32, %c0_i32_0 : i32, i32
  }
  func.func @transform_22(%arg0: i32) -> (i32, i32) {
    %c0_i32 = arith.constant 0 : i32
    %c0_i32_0 = arith.constant 0 : i32
    %c0_i32_1 = arith.constant 0 : i32
    return %c0_i32, %c0_i32_0 : i32, i32
  }
  func.func @transform_23(%arg0: i32) -> (i32, i32) {
    %c0_i32 = arith.constant 0 : i32
    %c0_i32_0 = arith.constant 0 : i32
    %c0_i32_1 = arith.constant 0 : i32
    return %c0_i32, %c0_i32_0 : i32, i32
  }
  func.func @transform_24(%arg0: i32) -> (i32, i32) {
    %c0_i32 = arith.constant 0 : i32
    %c0_i32_0 = arith.constant 0 : i32
    %c0_i32_1 = arith.constant 0 : i32
    return %c0_i32, %c0_i32_0 : i32, i32
  }
  func.func @transform_25(%arg0: i32) -> (i32, i32) {
    %c0_i32 = arith.constant 0 : i32
    %c0_i32_0 = arith.constant 0 : i32
    %c0_i32_1 = arith.constant 0 : i32
    return %c0_i32, %c0_i32_0 : i32, i32
  }
  func.func @transform_26(%arg0: i32) -> (i32, i32) {
    %c0_i32 = arith.constant 0 : i32
    %c0_i32_0 = arith.constant 0 : i32
    %c0_i32_1 = arith.constant 0 : i32
    return %c0_i32, %c0_i32_0 : i32, i32
  }
  func.func @transform_27(%arg0: i32) -> (i32, i32) {
    %c0_i32 = arith.constant 0 : i32
    %c0_i32_0 = arith.constant 0 : i32
    %c0_i32_1 = arith.constant 0 : i32
    return %c0_i32, %c0_i32_0 : i32, i32
  }
  func.func @transform_28(%arg0: i32) -> (i32, i32) {
    %c0_i32 = arith.constant 0 : i32
    %c0_i32_0 = arith.constant 0 : i32
    %c0_i32_1 = arith.constant 0 : i32
    return %c0_i32, %c0_i32_0 : i32, i32
  }
  func.func @transform_29(%arg0: i32) -> (i32, i32) {
    %c0_i32 = arith.constant 0 : i32
    %c0_i32_0 = arith.constant 0 : i32
    %c0_i32_1 = arith.constant 0 : i32
    return %c0_i32, %c0_i32_0 : i32, i32
  }
  func.func @transform_30(%arg0: i32) -> (i32, i32) {
    %c0_i32 = arith.constant 0 : i32
    %c0_i32_0 = arith.constant 0 : i32
    %c0_i32_1 = arith.constant 0 : i32
    return %c0_i32, %c0_i32_0 : i32, i32
  }
  func.func @transform_31(%arg0: i32) -> (i32, i32) {
    %c0_i32 = arith.constant 0 : i32
    %c0_i32_0 = arith.constant 0 : i32
    %c0_i32_1 = arith.constant 0 : i32
    return %c0_i32, %c0_i32_0 : i32, i32
  }
  func.func @transform_32(%arg0: i32) -> (i32, i32) {
    %c0_i32 = arith.constant 0 : i32
    %c0_i32_0 = arith.constant 0 : i32
    %c0_i32_1 = arith.constant 0 : i32
    return %c0_i32, %c0_i32_0 : i32, i32
  }
  func.func @transform_33(%arg0: i32) -> (i32, i32) {
    %c0_i32 = arith.constant 0 : i32
    %c0_i32_0 = arith.constant 0 : i32
    %c0_i32_1 = arith.constant 0 : i32
    return %c0_i32, %c0_i32_0 : i32, i32
  }
  func.func @transform_34(%arg0: i32) -> (i32, i32, i32) {
    %c0_i32 = arith.constant 0 : i32
    %c0_i32_0 = arith.constant 0 : i32
    %c0_i32_1 = arith.constant 0 : i32
    return %arg0, %c0_i32, %c0_i32_0 : i32, i32, i32
  }
  func.func @transform_35(%arg0: i32) -> (i32, i32, i32) {
    %c0_i32 = arith.constant 0 : i32
    %c0_i32_0 = arith.constant 0 : i32
    %c0_i32_1 = arith.constant 0 : i32
    return %arg0, %c0_i32, %c0_i32_0 : i32, i32, i32
  }
}

</mosaic_0001>

<bundles_post_ra>
// kernel: encoder_forward.1
= control target key start
LH: loop header
LB: loop body
LE: loop exit
PB: predicated region body
PF: predicated region fallthrough
CT: control target
= control target key end

     0   :  { %s4706_s6 = smov 1   ;;  %s4707_s10 = smov 2   ;;  %s5971_s0 = inlined_call_operand.smem [shape: u32[36], index: -1, kind: input, shape index: {}] }
   0x1   :  { %s4759_s5 = sld [smem:[%s5971_s0]]   ;;  %s4708_s14 = smov 3  }
   0x2   :  { %s4764_s9 = sld [smem:[%s5971_s0 + %s4706_s6]]   ;;  %s4709_s18 = smov 4  }
   0x3   :  { %s4769_s13 = sld [smem:[%s5971_s0 + %s4707_s10]]   ;;  %s4710_s22 = smov 5  }
   0x4   :  { %s4774_s17 = sld [smem:[%s5971_s0 + %s4708_s14]]   ;;  %s4711_s26 = smov 6  }
   0x5   :  { %s4779_s21 = sld [smem:[%s5971_s0 + %s4709_s18]]   ;;  %s4712_s30 = smov 7  }
   0x6   :  { %s4784_s25 = sld [smem:[%s5971_s0 + %s4710_s22]]   ;;  %s4713_s4 = smov 8  }
   0x7   :  { %6003 = sst [smem:[#allocation8_spill]] %s4759_s5  ;;  %s4714_s10 = smov 9  }
   0x8   :  { %6004 = sst [smem:[#allocation9_spill]] %s4764_s9  ;;  %s4715_s15 = smov 10  }
   0x9   :  { %6005 = sst [smem:[#allocation10_spill]] %s4769_s13  ;;  %s4716_s20 = smov 11  }
   0xa   :  { %s4789_s29 = sld [smem:[%s5971_s0 + %s4711_s26]]   ;;  %s4717_s26 = smov 12  }
   0xb   :  { %s4794_s3 = sld [smem:[%s5971_s0 + %s4712_s30]]   ;;  %s4718_s1 = smov 13  }
   0xc   :  { %s4799_s8 = sld [smem:[%s5971_s0 + %s4713_s4]]   ;;  %s4719_s7 = smov 14  }
   0xd   :  { %s4804_s14 = sld [smem:[%s5971_s0 + %s4714_s10]]   ;;  %s4721_s22 = smov 16  }
   0xe   :  { %s4809_s19 = sld [smem:[%s5971_s0 + %s4715_s15]]   ;;  %s4720_s15 = smov 15  }
   0xf   :  { %s4814_s24 = sld [smem:[%s5971_s0 + %s4716_s20]]   ;;  %s4722_s28 = smov 17  }
  0x10   :  { %s4819_s30 = sld [smem:[%s5971_s0 + %s4717_s26]]  }
  0x11   :  { %6006 = sst [smem:[#allocation11_spill]] %s4794_s3 }
  0x12   :  { %6007 = sst [smem:[#allocation12_spill]] %s4799_s8 }
  0x13   :  { %s4824_s6 = sld [smem:[%s5971_s0 + %s4718_s1]]  }
  0x14   :  { %s4829_s12 = sld [smem:[%s5971_s0 + %s4719_s7]]   ;;  %s4723_s7 = smov 18  }
  0x15   :  { %s4834_s20 = sld [smem:[%s5971_s0 + %s4720_s15]]   ;;  %s4724_s15 = smov 19  }
  0x16   :  { %s4839_s27 = sld [smem:[%s5971_s0 + %s4721_s22]]   ;;  %s4725_s22 = smov 20  }
  0x17   :  { %s4844_s4 = sld [smem:[%s5971_s0 + %s4722_s28]]   ;;  %s4726_s28 = smov 21  }
  0x19   :  { %6008 = sst [smem:[#allocation13_spill]] %s4824_s6 }
  0x1a   :  { %6009 = sst [smem:[#allocation14_spill]] %s4829_s12 }
  0x1b   :  { %6010 = sst [smem:[#allocation15_spill]] %s4834_s20 }
  0x1c   :  { %6011 = sst [smem:[#allocation16_spill]] %s4839_s27 }
  0x1d   :  { %6012 = sst [smem:[#allocation17_spill]] %s4844_s4 }
  0x1e   :  { %s4849_s12 = sld [smem:[%s5971_s0 + %s4723_s7]]   ;;  %s4727_s7 = smov 22  }
  0x1f   :  { %s4854_s20 = sld [smem:[%s5971_s0 + %s4724_s15]]   ;;  %s4728_s15 = smov 23  }
  0x20   :  { %s4859_s27 = sld [smem:[%s5971_s0 + %s4725_s22]]   ;;  %s4729_s22 = smov 24  }
  0x21   :  { %s4864_s4 = sld [smem:[%s5971_s0 + %s4726_s28]]   ;;  %s4730_s28 = smov 25  }
  0x24   :  { %6013 = sst [smem:[#allocation18_spill]] %s4849_s12 }
  0x25   :  { %6014 = sst [smem:[#allocation19_spill]] %s4854_s20 }
  0x26   :  { %6015 = sst [smem:[#allocation20_spill]] %s4859_s27 }
  0x27   :  { %6016 = sst [smem:[#allocation21_spill]] %s4864_s4 }
  0x28   :  { %s4869_s12 = sld [smem:[%s5971_s0 + %s4727_s7]]   ;;  %s4731_s7 = smov 26  }
  0x29   :  { %s4874_s20 = sld [smem:[%s5971_s0 + %s4728_s15]]   ;;  %s4732_s15 = smov 27  }
  0x2a   :  { %s4879_s27 = sld [smem:[%s5971_s0 + %s4729_s22]]   ;;  %s4733_s22 = smov 28  }
  0x2b   :  { %s4884_s4 = sld [smem:[%s5971_s0 + %s4730_s28]]   ;;  %s4734_s28 = smov 29  }
  0x2e   :  { %6017 = sst [smem:[#allocation22_spill]] %s4869_s12 }
  0x2f   :  { %6018 = sst [smem:[#allocation23_spill]] %s4874_s20 }
  0x30   :  { %6019 = sst [smem:[#allocation24_spill]] %s4879_s27 }
  0x31   :  { %6020 = sst [smem:[#allocation25_spill]] %s4884_s4 }
  0x32   :  { %s4889_s12 = sld [smem:[%s5971_s0 + %s4731_s7]]   ;;  %s4735_s7 = smov 30  }
  0x33   :  { %s4894_s20 = sld [smem:[%s5971_s0 + %s4732_s15]]   ;;  %s4736_s15 = smov 31  }
  0x34   :  { %s4899_s27 = sld [smem:[%s5971_s0 + %s4733_s22]]   ;;  %s4737_s22 = smov 32  }
  0x35   :  { %s4904_s4 = sld [smem:[%s5971_s0 + %s4734_s28]]   ;;  %s4738_s28 = smov 33  }
  0x38   :  { %6021 = sst [smem:[#allocation26_spill]] %s4889_s12 }
  0x39   :  { %6022 = sst [smem:[#allocation27_spill]] %s4894_s20 }
  0x3a   :  { %6023 = sst [smem:[#allocation28_spill]] %s4899_s27 }
  0x3b   :  { %6024 = sst [smem:[#allocation29_spill]] %s4904_s4 }
  0x3c   :  { %s4909_s12 = sld [smem:[%s5971_s0 + %s4735_s7]]   ;;  %s4739_s7 = smov 34  }
  0x3d   :  { %s4914_s20 = sld [smem:[%s5971_s0 + %s4736_s15]]   ;;  %s4740_s15 = smov 35  }
  0x3e   :  { %s4919_s27 = sld [smem:[%s5971_s0 + %s4737_s22]]  }
  0x3f   :  { %s4924_s4 = sld [smem:[%s5971_s0 + %s4738_s28]]  }
  0x42   :  { %6025 = sst [smem:[#allocation30_spill]] %s4909_s12 }
  0x43   :  { %6026 = sst [smem:[#allocation31_spill]] %s4914_s20 }
  0x44   :  { %s4929_s12 = sld [smem:[%s5971_s0 + %s4739_s7]]  }
  0x45   :  { %s4934_s20 = sld [smem:[%s5971_s0 + %s4740_s15]]  }
  0x46   :  { %77 = vsyncpa [#allocation6], 0 }
  0x47   :  { %79 = vsyncpa [#allocation6 + $0x1], 0  ;;  %s4936_s22 = smov 0   ;;  %s4938_s23 = smov 0  }
  0x48   :  { %s4940_s26 = smov 0   ;;  %s4942_s28 = smov 0  }
  0x49 LB: > { %s6027_s6 = sld [smem:[#allocation13_spill]]  ;;  %s4957_s0 = sadd.s32 4294967295, %s4704_s28   ;;  %s4700_s26 = sphi %s4940_s26, %s6063_s26   ;;  %s4696_s23 = sphi %s4938_s23, %s6062_s23   ;;  %s4692_s22 = sphi %s4936_s22, %s6061_s22   ;;  %s4704_s28 = sphi %s4942_s28, %s6064_s28  }
  0x4a   : > { %s6028_s3 = sld [smem:[#allocation11_spill]]  ;;  %s4168_s1 = sadd.s32 4294967294, %s4704_s28  }
  0x4b   : > { %s6029_s9 = sld [smem:[#allocation9_spill]]  ;;  %s4961_s2 = sadd.s32 1, %s4704_s28  }
  0x4c   : > { %s811_s7 = sadd.s32 1, %s4700_s26  ;;  %s808_s10 = ssub.s32 %s4704_s28, %s4961_s2 }
  0x4d   : > { %p821_p0 = scmp.ne.s32.totalorder %s4700_s26, %s4696_s23  ;;  %p809_p1 = scmp.eq.s32.totalorder %s808_s10, 0 }
  0x4e   : > { %p822_p2 = scmp.eq.s32.totalorder %s4957_s0, 1  ;;  %p827_p3 = scmp.ne.s32.totalorder %s4696_s23, %s4692_s22 }
  0x4f   : > { %p828_p4 = scmp.eq.s32.totalorder %s4168_s1, 1  ;;  %p4171_p7 = scmp.ge.s32.totalorder %s4704_s28, 1 }
  0x50   : > { %s4972_s11 = scalar_select %p809_p1, %s4700_s26, %s811_s7  }
  0x51   : > { %p4974_p5 = por %p822_p2, %p821_p0  ;;  %p4978_p6 = por %p828_p4, %p827_p3 }
  0x52   : > { %6030 = sst [smem:[#allocation32_spill]] %s4972_s11  ;;  %p979_p8 = scmp.lt.s32.totalorder %s4704_s28, 3 }
  0x54   : > { %p980_p9 = pnand %p4171_p7, %p979_p8 }
  0x55   : > { %s6033_s5 = sld [smem:[#allocation8_spill]] (!%p980_p9)  ;;  %p1070_p10 = scmp.lt.s32.totalorder (!%p980_p9), %s4957_s0, 1 }
  0x56   : > { %983 = sbr.rel (%p980_p9) target bundleno = 6740 (0x1a54), region = 156  ;;  %s5989_s10 = smov (!%p980_p9), 32  }
  0x57   : > { %s6038_s11 = smov (!%p980_p9), 64   ;;  %s6039_s13 = sld [smem:[#allocation10_spill]] (!%p980_p9) }
  0x58   : > { %s6040_s8 = sld [smem:[#allocation12_spill]] (!%p980_p9) }
  0x5b   : > { %s4986_s18 = scalar_select %p1070_p10, %s4957_s0, 1  ;;  %v1294_v0 = vld [vmem:[%s6029_s9 + $0x68] sm:$0xff]  ;;  %v1293_v1 = vld [vmem:[%s6029_s9 + $0x60] sm:$0xff]  ;;  %vm1092_vm0 = vcmask 1042432   ;;  %vm1145_vm1 = vcmask 1045504   ;;  %vm1123_vm2 = vcmask 1046528  }
  0x5c   : > { %4317 = vmatprep.subr.mxu0 %v1294_v0  ;;  %vm1111_vm3 = vcmask 1040384   ;;  %v1292_v13 = vld [vmem:[%s6029_s9 + $0x58] sm:$0xff]  ;;  %v1291_v14 = vld [vmem:[%s6029_s9 + $0x50] sm:$0xff]  ;;  %vm1119_vm4 = vcmask 1044480   ;;  %vm1113_vm5 = vcmask 1041408   ;;  %v1290_v28 = vld [vmem:[%s6029_s9 + $0x48] sm:$0xff] }
  0x5d   : > { %s4223_s1 = sshll.u32 %s4986_s18, 5  ;;  %4318 = vmatpush3.msra.mxu0 %v1294_v0  ;;  %v1289_v35 = vld [vmem:[%s6029_s9 + $0x40] sm:$0xff]  ;;  %v1288_v38 = vld [vmem:[%s6029_s9 + $0x38] sm:$0xff]  ;;  %vm1117_vm6 = vcmask 1043456   ;;  %v1287_v46 = vld [vmem:[%s6029_s9 + $0x30] sm:$0xff]  ;;  %vm1251_vm7 = vcmask 130048  }
  0x5e   : > { %s1074_s7 = scalar_lea.vmem %s6033_s5, %s4223_s1  ;;  %4319 = vmatprep.subr.mxu0 %v1293_v1  ;;  %s5983_s1 = smov 16   ;;  %v1286_v49 = vld [vmem:[%s6029_s9 + $0x28] sm:$0xff]  ;;  %v1285_v55 = vld [vmem:[%s6029_s9 + $0x20] sm:$0xff]  ;;  %v1284_v60 = vld [vmem:[%s6029_s9 + $0x18] sm:$0xff]  ;;  %vm1256_vm8 = vcmask 261120   ;;  %vm1261_vm9 = vcmask 392192  }
  0x5f   : > { %v1078_v2 = vld [vmem:[%s1074_s7] sm:$0xff]  ;;  %v1079_v3 = vld [vmem:[%s1074_s7 + $0x8] sm:$0xff]  ;;  %v1080_v4 = vld [vmem:[%s1074_s7 + $0x10] sm:$0xff]  ;;  %4320 = vmatpush3.msra.mxu0 %v1293_v1  ;;  %s6035_s5 = smov 80   ;;  %vm1266_vm10 = vcmask 523264   ;;  %vm1271_vm11 = vcmask 654336  }
  0x60   : > { %v1093_v5 = vrot.slane %v1078_v2, 5  ;;  %v1094_v6 = vrot.slane %v1079_v3, 5  ;;  %v1096_v7 = vrot.slane %v1080_v4, 5  ;;  %v1083_v8 = vrot.slane %v1078_v2, 3  ;;  %v4992_v9 = vld [vmem:[%s1074_s7 + $0x18] sm:$0xff]  ;;  %4321 = vmatprep.subr.mxu0 %v1292_v13  ;;  %s5981_s7 = smov 48  }
  0x61   : > { %v1085_v10 = vrot.slane %v1078_v2, 1  ;;  %v1087_v11 = vrot.slane %v1078_v2, 7  ;;  %v1098_v12 = vrot.slane %v4992_v9, 5  ;;  %4322 = vmatpush3.msra.mxu0 %v1292_v13  ;;  %v1105_v30 = vrot.slane %v4992_v9, 3  ;;  %v1283_v62 = vld [vmem:[%s6029_s9 + $0x10] sm:$0xff]  ;;  %v1282_v3 = vld [vmem:[%s6029_s9 + $0x8] sm:$0xff] }
  0x62   : > { %v4998_v15 = vsel %vm1092_vm0, %v1093_v5, %v1094_v6  ;;  %v5001_v16 = vsel %vm1092_vm0, %v1094_v6, %v1096_v7  ;;  %4323 = vmatprep.subr.mxu0 %v1291_v14  ;;  %v1107_v37 = vrot.slane %v4992_v9, 1  ;;  %v1109_v45 = vrot.slane %v4992_v9, 7 }
  0x63   : > { %v1147_v17 = vrot.slane %v4998_v15, 2  ;;  %v1149_v18 = vrot.slane %v5001_v16, 2  ;;  %v1125_v19 = vrot.slane %v4998_v15, 1  ;;  %v1127_v20 = vrot.slane %v5001_v16, 1  ;;  %4324 = vmatpush3.msra.mxu0 %v1291_v14 }
  0x64   : > { %v1168_v21 = vrot.slane %v4998_v15, 3  ;;  %v1170_v22 = vrot.slane %v5001_v16, 3  ;;  %v1112_v23 = vsel %vm1111_vm3, %v1083_v8, %v1085_v10  ;;  %v5011_v24 = vsel %vm1092_vm0, %v1096_v7, %v1098_v12  ;;  %4325 = vmatprep.subr.mxu0 %v1290_v28  ;;  %v1281_v8 = vld [vmem:[%s6029_s9] sm:$0xff]  ;;  %s6037_s9 = smov 32  }
  0x65   : > { %v1150_v25 = vsel %vm1145_vm1, %v1147_v17, %v1149_v18  ;;  %v1128_v26 = vsel %vm1123_vm2, %v1125_v19, %v1127_v20  ;;  %v1114_v27 = vsel %vm1113_vm5, %v1112_v23, %v1087_v11  ;;  %v1129_v33 = vrot.slane %v5011_v24, 1  ;;  %4326 = vmatpush3.msra.mxu0 %v1290_v28  ;;  %v1427_v23 = vld [vmem:[%s4774_s17 + $0x78] sm:$0xff] }
  0x66   : > { %1157 = vrot.lane.b32.xlu1 %v1150_v25, %s5989_s10  ;;  %1135 = vrot.lane.b32.xlu0 %v1128_v26, %s5983_s1  ;;  %v5022_v29 = vsel %vm1092_vm0, %v1114_v27, %v1093_v5  ;;  %v1171_v31 = vsel %vm1119_vm4, %v1168_v21, %v1170_v22  ;;  %v1189_v39 = vrot.slane %v4998_v15, 4  ;;  %v1116_v40 = vsel %vm1092_vm0, %v1098_v12, %v1105_v30 }
  0x67   : > { %v1124_v32 = vrot.slane %v5022_v29, 1  ;;  %v1167_v34 = vrot.slane %v5022_v29, 3  ;;  %4327 = vmatprep.subr.mxu0 %v1289_v35  ;;  %v1130_v41 = vsel %vm1123_vm2, %v1127_v20, %v1129_v33  ;;  %v1146_v43 = vrot.slane %v5022_v29, 2 }
  0x68   : > { %v1188_v44 = vrot.slane %v5022_v29, 4  ;;  %4328 = vmatpush3.msra.mxu0 %v1289_v35  ;;  %v1118_v47 = vsel %vm1117_vm6, %v1116_v40, %v1107_v37  ;;  %v1210_v48 = vrot.slane %v4998_v15, 5  ;;  %v1209_v52 = vrot.slane %v5022_v29, 5 }
  0x69   : > { %v1126_v36 = vsel %vm1123_vm2, %v1124_v32, %v1125_v19  ;;  %v1169_v42 = vsel %vm1119_vm4, %v1167_v34, %v1168_v21  ;;  %4329 = vmatprep.subr.mxu0 %v1288_v38  ;;  %v1148_v50 = vsel %vm1145_vm1, %v1146_v43, %v1147_v17  ;;  %v1191_v53 = vrot.slane %v5001_v16, 4 }
  0x6a   : > { %1178 = vrot.lane.b32.xlu1 %v1171_v31, %s5981_s7  ;;  %1133 = vrot.lane.b32.xlu0 %v1126_v36, %s5983_s1  ;;  %v1190_v51 = vsel %vm1117_vm6, %v1188_v44, %v1189_v39  ;;  %v5055_v54 = vsel %vm1119_vm4, %v1118_v47, %v1109_v45  ;;  %v1211_v56 = vsel %vm1092_vm0, %v1209_v52, %v1210_v48  ;;  %v1151_v58 = vrot.slane %v5011_v24, 2 }
  0x6b   : > { %4330 = vmatpush3.msra.mxu0 %v1288_v38  ;;  %v1192_v57 = vsel %vm1117_vm6, %v1189_v39, %v1191_v53  ;;  %v1131_v59 = vrot.slane %v5055_v54, 1  ;;  %v1230_v61 = vrot.slane %v5022_v29, 6  ;;  %v1231_v1 = vrot.slane %v4998_v15, 6 }
  0x6c   : > { %4331 = vmatprep.subr.mxu0 %v1287_v46  ;;  %v1152_v63 = vsel %vm1145_vm1, %v1149_v18, %v1151_v58  ;;  %v1212_v2 = vrot.slane %v5001_v16, 5  ;;  %v1172_v6 = vrot.slane %v5011_v24, 3  ;;  %v1153_v7 = vrot.slane %v5055_v54, 2 }
  0x6d   : > { %4332 = vmatpush3.msra.mxu0 %v1287_v46  ;;  %v1132_v0 = vsel %vm1123_vm2, %v1129_v33, %v1131_v59  ;;  %v1232_v4 = vsel %vm1113_vm5, %v1230_v61, %v1231_v1  ;;  %v1174_v11 = vrot.slane %v5055_v54, 3  ;;  %v1233_v12 = vrot.slane %v5001_v16, 6  ;;  %v1426_v61 = vld [vmem:[%s4774_s17 + $0x70] sm:$0xff] }
  0x6e   : > { %1137 = vrot.lane.b32.xlu1 %v1130_v41, %s5983_s1  ;;  %1176 = vrot.lane.b32.xlu0 %v1169_v42, %s5981_s7  ;;  %s5985_s7 = smov 64   ;;  %s5987_s1 = smov 80   ;;  %v1213_v5 = vsel %vm1092_vm0, %v1210_v48, %v1212_v2  ;;  %v1173_v9 = vsel %vm1119_vm4, %v1170_v22, %v1172_v6  ;;  %v1154_v10 = vsel %vm1145_vm1, %v1151_v58, %v1153_v7  ;;  %v1193_v17 = vrot.slane %v5011_v24, 4 }
  0x6f   : > { %4333 = vmatprep.subr.mxu0 %v1286_v49  ;;  %v1175_v13 = vsel %vm1119_vm4, %v1172_v6, %v1174_v11  ;;  %v1234_v14 = vsel %vm1113_vm5, %v1231_v1, %v1233_v12  ;;  %v1195_v18 = vrot.slane %v5055_v54, 4  ;;  %v1214_v21 = vrot.slane %v5011_v24, 5  ;;  %v1423_v1 = vld [vmem:[%s4774_s17 + $0x58] sm:$0xff] }
  0x70   : > { %4334 = vmatpush3.msra.mxu0 %v1286_v49  ;;  %v1194_v20 = vsel %vm1117_vm6, %v1191_v53, %v1193_v17  ;;  %v1216_v22 = vrot.slane %v5055_v54, 5  ;;  %v1235_v27 = vrot.slane %v5011_v24, 6  ;;  %v1237_v28 = vrot.slane %v5055_v54, 6 }
  0x71   : > { %4335 = vmatprep.subr.mxu0 %v1285_v55  ;;  %v1196_v19 = vsel %vm1117_vm6, %v1193_v17, %v1195_v18  ;;  %v1215_v26 = vsel %vm1092_vm0, %v1212_v2, %v1214_v21  ;;  %vm1276_vm12 = vcmask 785408   ;;  %vm1302_vm13 = vcmask 916480  }
  0x72   : > { %1155 = vrot.lane.b32.xlu1 %v1148_v50, %s5989_s10  ;;  %1197 = vrot.lane.b32.xlu0 %v1190_v51, %s5985_s7  ;;  %v1217_v25 = vsel %vm1092_vm0, %v1214_v21, %v1216_v22  ;;  %v1238_v30 = vsel %vm1113_vm5, %v1235_v27, %v1237_v28  ;;  %v1236_v31 = vsel %vm1113_vm5, %v1233_v12, %v1235_v27  ;;  %v1419_v21 = vld [vmem:[%s4774_s17 + $0x38] sm:$0xff]  ;;  %v1418_v22 = vld [vmem:[%s4774_s17 + $0x30] sm:$0xff] }
  0x73   : > { %4336 = vmatpush3.msra.mxu0 %v1285_v55  ;;  %v1414_v27 = vld [vmem:[%s4774_s17 + $0x10] sm:$0xff]  ;;  %v1413_v28 = vld [vmem:[%s4774_s17 + $0x8] sm:$0xff] }
  0x74   : > { %4337 = vmatprep.subr.mxu0 %v1284_v60 }
  0x75   : > { %4338 = vmatpush3.msra.mxu0 %v1284_v60 }
  0x76   : > { %1218 = vrot.lane.b32.xlu1 %v1211_v56, %s5987_s1  ;;  %1199 = vrot.lane.b32.xlu0 %v1192_v57, %s5985_s7  ;;  %s6034_s7 = smov 16   ;;  %s5992_s1 = smov 96  }
  0x77   : > { %4339 = vmatprep.subr.mxu0 %v1283_v62 }
  0x78   : > { %4340 = vmatpush3.msra.mxu0 %v1283_v62 }
  0x79   : > { %4341 = vmatprep.subr.mxu0 %v1282_v3 }
  0x7a   : > { %1159 = vrot.lane.b32.xlu1 %v1152_v63, %s5989_s10  ;;  %1139 = vrot.lane.b32.xlu0 %v1132_v0, %s6034_s7  ;;  %s6036_s10 = smov 48   ;;  %v1424_v0 = vld [vmem:[%s4774_s17 + $0x60] sm:$0xff] }
  0x7b   : > { %4342 = vmatpush3.msra.mxu0 %v1282_v3 }
  0x7c   : > { %4343 = vmatprep.subr.mxu0 %v1281_v8 }
  0x7d   : > { %4344 = vmatpush3.msra.mxu0 %v1281_v8  ;;  %v1422_v8 = vld [vmem:[%s4774_s17 + $0x50] sm:$0xff] }
  0x7e   : > { %1239 = vrot.lane.b32.xlu1 %v1232_v4, %s5992_s1  ;;  %1220 = vrot.lane.b32.xlu0 %v1213_v5, %s6035_s5 }
  0x7f   : > { %4351 = vmatprep.subr.mxu0 %v1427_v23 }
  0x82   : > { %1180 = vrot.lane.b32.xlu1 %v1173_v9, %s6036_s10  ;;  %1161 = vrot.lane.b32.xlu0 %v1154_v10, %s6037_s9 }
  0x86   : > { %1182 = vrot.lane.b32.xlu1 %v1175_v13, %s6036_s10  ;;  %1241 = vrot.lane.b32.xlu0 %v1234_v14, %s5992_s1 }
  0x8a   : > { %1203 = vrot.lane.b32.xlu1 %v1196_v19, %s6038_s11  ;;  %1201 = vrot.lane.b32.xlu0 %v1194_v20, %s6038_s11  ;;  %v1420_v20 = vld [vmem:[%s4774_s17 + $0x40] sm:$0xff] }
  0x8e   : > { %1224 = vrot.lane.b32.xlu1 %v1217_v25, %s6035_s5  ;;  %1222 = vrot.lane.b32.xlu0 %v1215_v26, %s6035_s5  ;;  %v1416_v25 = vld [vmem:[%s4774_s17 + $0x20] sm:$0xff]  ;;  %v1415_v26 = vld [vmem:[%s4774_s17 + $0x18] sm:$0xff] }
  0x92   : > { %1245 = vrot.lane.b32.xlu1 %v1238_v30, %s5992_s1  ;;  %1243 = vrot.lane.b32.xlu0 %v1236_v31, %s5992_s1  ;;  %v1412_v30 = vld [vmem:[%s4774_s17] sm:$0xff] }
  0x93   : > { %v4175_v31 = vld [vmem:[%s6039_s13] ss:$0 sm:$0xff]  ;;  %s6049_s13 = sld [smem:[#allocation23_spill]] }
  0xd8   : > { %v1158_v32 = vpop.permute.xlu1 %1157  ;;  %v1136_v33 = vpop.permute.xlu0 %1135 }
  0xd9   : > { %v1253_v51 = vsel %vm1251_vm7, %v4998_v15, %v1136_v33  ;;  %v1425_v15 = vld [vmem:[%s4774_s17 + $0x68] sm:$0xff] }
  0xda   : > { %v1258_v54 = vsel %vm1256_vm8, %v1253_v51, %v1158_v32  ;;  %v1713_v51 = vld [vmem:[%s4784_s25 + $0x60] sm:$0xff] }
  0xdc   : > { %v1179_v34 = vpop.permute.xlu1 %1178  ;;  %v1134_v35 = vpop.permute.xlu0 %1133 }
  0xdd   : > { %v1252_v40 = vsel %vm1251_vm7, %v5022_v29, %v1134_v35  ;;  %v1263_v55 = vsel %vm1261_vm9, %v1258_v54, %v1179_v34  ;;  %v1710_v54 = vld [vmem:[%s4784_s25 + $0x48] sm:$0xff] }
  0xe0   : > { %v1138_v36 = vpop.permute.xlu1 %1137  ;;  %v1177_v37 = vpop.permute.xlu0 %1176 }
  0xe1   : > { %v1254_v2 = vsel %vm1251_vm7, %v5001_v16, %v1138_v36 }
  0xe4   : > { %v1156_v38 = vpop.permute.xlu1 %1155  ;;  %v1198_v39 = vpop.permute.xlu0 %1197 }
  0xe5   : > { %v1257_v41 = vsel %vm1256_vm8, %v1252_v40, %v1156_v38 }
  0xe6   : > { %v1262_v44 = vsel %vm1261_vm9, %v1257_v41, %v1177_v37 }
  0xe7   : > { %v1267_v47 = vsel %vm1266_vm10, %v1262_v44, %v1198_v39 }
  0xe8   : > { %v1219_v42 = vpop.permute.xlu1 %1218  ;;  %v1200_v43 = vpop.permute.xlu0 %1199 }
  0xe9   : > { %v1272_v48 = vsel %vm1271_vm11, %v1267_v47, %v1219_v42  ;;  %v1268_v56 = vsel %vm1266_vm10, %v1263_v55, %v1200_v43  ;;  %v1709_v55 = vld [vmem:[%s4784_s25 + $0x40] sm:$0xff] }
  0xec   : > { %v1160_v45 = vpop.permute.xlu1 %1159  ;;  %v1140_v46 = vpop.permute.xlu0 %1139 }
  0xed   : > { %v1255_v3 = vsel %vm1251_vm7, %v5011_v24, %v1140_v46  ;;  %v1259_v6 = vsel %vm1256_vm8, %v1254_v2, %v1160_v45  ;;  %v1421_v24 = vld [vmem:[%s4774_s17 + $0x48] sm:$0xff] }
  0xee   : > { %v1702_v2 = vld [vmem:[%s4784_s25 + $0x8] sm:$0xff] }
  0xf0   : > { %v1240_v49 = vpop.permute.xlu1 %1239  ;;  %v1221_v29 = vpop.permute.xlu0 %1220 }
  0xf1   : > { %v1277_v50 = vsel %vm1276_vm12, %v1272_v48, %v1240_v49  ;;  %v1273_v57 = vsel %vm1271_vm11, %v1268_v56, %v1221_v29  ;;  %v1716_v48 = vld [vmem:[%s4784_s25 + $0x78] sm:$0xff]  ;;  %v4747_v49 = vmov 0.0   ;;  %v1715_v29 = vld [vmem:[%s4784_s25 + $0x70] sm:$0xff] }
  0xf2   : > { %4345 = vmatprep.mubr.msk.f32.mxu0 %vm1302_vm13, %v1277_v50  ;;  %1951 = vmatprep.subr.mxu1 %v4747_v49  ;;  %v1714_v50 = vld [vmem:[%s4784_s25 + $0x68] sm:$0xff]  ;;  %v1708_v56 = vld [vmem:[%s4784_s25 + $0x38] sm:$0xff] }
  0xf4   : > { %v1181_v52 = vpop.permute.xlu1 %1180  ;;  %v1162_v53 = vpop.permute.xlu0 %1161 }
  0xf5   : > { %v1260_v7 = vsel %vm1256_vm8, %v1255_v3, %v1162_v53  ;;  %v1264_v9 = vsel %vm1261_vm9, %v1259_v6, %v1181_v52  ;;  %v1712_v52 = vld [vmem:[%s4784_s25 + $0x58] sm:$0xff]  ;;  %v1711_v53 = vld [vmem:[%s4784_s25 + $0x50] sm:$0xff] }
  0xf8   : > { %v1183_v58 = vpop.permute.xlu1 %1182  ;;  %v1242_v59 = vpop.permute.xlu0 %1241 }
  0xf9   : > { %v1278_v60 = vsel %vm1276_vm12, %v1273_v57, %v1242_v59  ;;  %v1265_v10 = vsel %vm1261_vm9, %v1260_v7, %v1183_v58  ;;  %v1707_v57 = vld [vmem:[%s4784_s25 + $0x30] sm:$0xff]  ;;  %v1706_v59 = vld [vmem:[%s4784_s25 + $0x28] sm:$0xff] }
  0xfa   : > { %4346 = vmatmul.mubr.msk.f32.vlgmr.msra.gmra.mxu0 %vm1302_vm13, %v1278_v60 }
  0xfb   : > { %4352 = vmatpush3.msra.mxu0 %v1427_v23  ;;  %v1417_v23 = vld [vmem:[%s4774_s17 + $0x28] sm:$0xff] }
  0xfc   : > { %v1204_v62 = vpop.permute.xlu1 %1203  ;;  %v1202_v63 = vpop.permute.xlu0 %1201  ;;  %4353 = vmatprep.subr.mxu0 %v1426_v61 }
  0xfd   : > { %4354 = vmatpush3.msra.mxu0 %v1426_v61  ;;  %v1270_v16 = vsel %vm1266_vm10, %v1265_v10, %v1204_v62  ;;  %v1269_v11 = vsel %vm1266_vm10, %v1264_v9, %v1202_v63  ;;  %v1705_v61 = vld [vmem:[%s4784_s25 + $0x20] sm:$0xff]  ;;  %v1704_v62 = vld [vmem:[%s4784_s25 + $0x18] sm:$0xff] }
  0xfe   : > { %4355 = vmatprep.subr.mxu0 %v1425_v15 }
  0xff   : > { %4356 = vmatpush3.msra.mxu0 %v1425_v15  ;;  %v4180_v15 = vld [vmem:[%s4779_s21] ss:$0 sm:$0xff] }
 0x100   : > { %v1225_v4 = vpop.permute.xlu1 %1224  ;;  %v1223_v5 = vpop.permute.xlu0 %1222  ;;  %4357 = vmatprep.subr.mxu0 %v1424_v0 }
 0x101   : > { %4358 = vmatpush3.msra.mxu0 %v1424_v0  ;;  %v1275_v12 = vsel %vm1271_vm11, %v1270_v16, %v1225_v4  ;;  %v1274_v13 = vsel %vm1271_vm11, %v1269_v11, %v1223_v5  ;;  %v1703_v0 = vld [vmem:[%s4784_s25 + $0x10] sm:$0xff]  ;;  %v1701_v4 = vld [vmem:[%s4784_s25] sm:$0xff] }
 0x102   : > { %4359 = vmatprep.subr.mxu0 %v1423_v1 }
 0x103   : > { %4360 = vmatpush3.msra.mxu0 %v1423_v1 }
 0x104   : > { %v1246_v14 = vpop.permute.xlu1 %1245  ;;  %v1244_v17 = vpop.permute.xlu0 %1243  ;;  %4361 = vmatprep.subr.mxu0 %v1422_v8 }
 0x105   : > { %v1280_v18 = vsel %vm1276_vm12, %v1275_v12, %v1246_v14  ;;  %v1279_v19 = vsel %vm1276_vm12, %v1274_v13, %v1244_v17  ;;  %4362 = vmatpush3.msra.mxu0 %v1422_v8 }
 0x106   : > { %4348 = vmatprep.mubr.msk.f32.mxu0 %vm1302_vm13, %v1279_v19  ;;  %4363 = vmatprep.subr.mxu0 %v1421_v24 }
 0x107   : > { %4349 = vmatmul.mubr.msk.f32.gmra.mxu0 %vm1302_vm13, %v1280_v18 }
 0x108   : > { %4364 = vmatpush3.msra.mxu0 %v1421_v24 }
 0x109   : > { %4365 = vmatprep.subr.mxu0 %v1420_v20 }
 0x10a   : > { %4366 = vmatpush3.msra.mxu0 %v1420_v20 }
 0x10b   : > { %4367 = vmatprep.subr.mxu0 %v1419_v21 }
 0x10c   : > { %4368 = vmatpush3.msra.mxu0 %v1419_v21 }
 0x10d   : > { %4369 = vmatprep.subr.mxu0 %v1418_v22 }
 0x10e   : > { %4370 = vmatpush3.msra.mxu0 %v1418_v22 }
 0x10f   : > { %4371 = vmatprep.subr.mxu0 %v1417_v23 }
 0x110   : > { %4372 = vmatpush3.msra.mxu0 %v1417_v23 }
 0x111   : > { %4373 = vmatprep.subr.mxu0 %v1416_v25 }
 0x112   : > { %4374 = vmatpush3.msra.mxu0 %v1416_v25 }
 0x113   : > { %4375 = vmatprep.subr.mxu0 %v1415_v26 }
 0x114   : > { %4376 = vmatpush3.msra.mxu0 %v1415_v26 }
 0x115   : > { %4377 = vmatprep.subr.mxu0 %v1414_v27 }
 0x116   : > { %4378 = vmatpush3.msra.mxu0 %v1414_v27 }
 0x117   : > { %4379 = vmatprep.subr.mxu0 %v1413_v28 }
 0x118   : > { %4380 = vmatpush3.msra.mxu0 %v1413_v28 }
 0x119   : > { %4381 = vmatprep.subr.mxu0 %v1412_v30 }
 0x11a   : > { %4382 = vmatpush3.msra.mxu0 %v1412_v30 }
 0x11b   : > { %1736 = vmatprep.subr.mxu0 %v4747_v49 }
 0x1ba   : > { %v4347_v32 = vpop.f32.mrf.mxu0 }
 0x1bb   : > { %v1387_v33 = vadd.f32 %v4347_v32, %v4175_v31 }
 0x1bc   : > { %v1381_v34 = vpop.f32.mrf.mxu0 }
 0x1bd   : > { %v1382_v35 = vadd.f32 %v4175_v31, %v1381_v34  ;;  %v1405_v36 = vmul.f32 0.2, %v1387_v33  ;;  %vm1401_vm14 = vcmp.ge.f32.partialorder %v1387_v33, 0.0 }
 0x1bf   : > { %v1404_v37 = vmul.f32 0.2, %v1382_v35  ;;  %vm1400_vm15 = vcmp.ge.f32.partialorder %v1382_v35, 0.0  ;;  %v1409_v39 = vsel %vm1401_vm14, %v1387_v33, %v1405_v36 }
 0x1c1   : > { %v1408_v38 = vsel %vm1400_vm15, %v1382_v35, %v1404_v37 }
 0x1c2   : > { %4383 = vmatprep.mubr.f32.mxu0 %v1408_v38 }
 0x1c3   : > { %4384 = vmatmul.mubr.f32.vlgmr.msra.gmra.mxu0 %v1409_v39 }
 0x1c4   : > { %1737 = vmatpush1.msra.mxu0 %v1716_v48 }
 0x1c5   : > { %1738 = vmatprep.subr.mxu0 %v4747_v49 }
 0x1c6   : > { %1739 = vmatpush1.msra.mxu0 %v1715_v29 }
 0x1c7   : > { %v4350_v40 = vpop.f32.mrf.mxu0  ;;  %1740 = vmatprep.subr.mxu0 %v4747_v49 }
 0x1c8   : > { %v1397_v41 = vadd.f32 %v4350_v40, %v4175_v31  ;;  %1741 = vmatpush1.msra.mxu0 %v1714_v50 }
 0x1c9   : > { %v1391_v42 = vpop.f32.mrf.mxu0  ;;  %1742 = vmatprep.subr.mxu0 %v4747_v49 }
 0x1ca   : > { %v1392_v43 = vadd.f32 %v4175_v31, %v1391_v42  ;;  %v1407_v44 = vmul.f32 0.2, %v1397_v41  ;;  %vm1403_vm13 = vcmp.ge.f32.partialorder %v1397_v41, 0.0  ;;  %1743 = vmatpush1.msra.mxu0 %v1713_v51 }
 0x1cb   : > { %1744 = vmatprep.subr.mxu0 %v4747_v49 }
 0x1cc   : > { %v1406_v45 = vmul.f32 0.2, %v1392_v43  ;;  %vm1402_vm11 = vcmp.ge.f32.partialorder %v1392_v43, 0.0  ;;  %v1411_v47 = vsel %vm1403_vm13, %v1397_v41, %v1407_v44  ;;  %1745 = vmatpush1.msra.mxu0 %v1712_v52 }
 0x1cd   : > { %1746 = vmatprep.subr.mxu0 %v4747_v49 }
 0x1ce   : > { %v1410_v46 = vsel %vm1402_vm11, %v1392_v43, %v1406_v45  ;;  %1747 = vmatpush1.msra.mxu0 %v1711_v53 }
 0x1cf   : > { %4386 = vmatprep.mubr.f32.mxu0 %v1410_v46  ;;  %1748 = vmatprep.subr.mxu0 %v4747_v49 }
 0x1d0   : > { %4387 = vmatmul.mubr.f32.gmra.mxu0 %v1411_v47 }
 0x1d1   : > { %1749 = vmatpush1.msra.mxu0 %v1710_v54 }
 0x1d2   : > { %1750 = vmatprep.subr.mxu0 %v4747_v49 }
 0x1d3   : > { %1751 = vmatpush1.msra.mxu0 %v1709_v55 }
 0x1d4   : > { %1752 = vmatprep.subr.mxu0 %v4747_v49 }
 0x1d5   : > { %1753 = vmatpush1.msra.mxu0 %v1708_v56 }
 0x1d6   : > { %1754 = vmatprep.subr.mxu0 %v4747_v49 }
 0x1d7   : > { %1755 = vmatpush1.msra.mxu0 %v1707_v57 }
 0x1d8   : > { %1756 = vmatprep.subr.mxu0 %v4747_v49 }
 0x1d9   : > { %1757 = vmatpush1.msra.mxu0 %v1706_v59 }
 0x1da   : > { %1758 = vmatprep.subr.mxu0 %v4747_v49 }
 0x1db   : > { %1759 = vmatpush1.msra.mxu0 %v1705_v61 }
 0x1dc   : > { %1760 = vmatprep.subr.mxu0 %v4747_v49 }
 0x1dd   : > { %1761 = vmatpush1.msra.mxu0 %v1704_v62  ;;  %v1720_v62 = vld [vmem:[%s4784_s25 + $0x98] sm:$0xff] }
 0x1de   : > { %1762 = vmatprep.subr.mxu0 %v4747_v49 }
 0x1df   : > { %1763 = vmatpush1.msra.mxu0 %v1703_v0 }
 0x1e0   : > { %1764 = vmatprep.subr.mxu0 %v4747_v49 }
 0x1e1   : > { %1765 = vmatpush1.msra.mxu0 %v1702_v2 }
 0x1e2   : > { %1766 = vmatprep.subr.mxu0 %v4747_v49 }
 0x1e3   : > { %1767 = vmatpush1.msra.mxu0 %v1701_v4 }
 0x1e4   : > { %1792 = vmatprep.subr.mxu0 %v4747_v49 }
 0x1e5   : > { %1793 = vmatpush2.msra.mxu0 %v1720_v62 }
 0x1e6   : > { %1794 = vmatprep.subr.mxu0 %v4747_v49 }
 0x283   : > { %v4385_v58 = vpop.f32.mrf.mxu0 }
 0x284   : > { %v1507_v1 = vadd.f32 %v4385_v58, %v4180_v15 }
 0x285   : > { %v1501_v60 = vpop.f32.mrf.mxu0 }
 0x286   : > { %v1502_v63 = vadd.f32 %v4180_v15, %v1501_v60  ;;  %v1525_v5 = vmul.f32 0.2, %v1507_v1  ;;  %vm1521_vm15 = vcmp.ge.f32.partialorder %v1507_v1, 0.0 }
 0x288   : > { %v1524_v3 = vmul.f32 0.2, %v1502_v63  ;;  %vm1520_vm14 = vcmp.ge.f32.partialorder %v1502_v63, 0.0  ;;  %v1529_v10 = vsel %vm1521_vm15, %v1507_v1, %v1525_v5 }
 0x289   : > { %v1533_v13 = vsel %vm1256_vm8, %v1529_v10, 0.0 }
 0x28a   : > { %v1528_v7 = vsel %vm1520_vm14, %v1502_v63, %v1524_v3  ;;  %v1719_v63 = vld [vmem:[%s4784_s25 + $0x90] sm:$0xff] }
 0x28b   : > { %v1532_v24 = vsel %vm1256_vm8, %v1528_v7, 0.0  ;;  %1795 = vmatpush2.msra.mxu0 %v1719_v63 }
 0x28c   : > { %v1534_v14 = vadd.f32 %v1533_v13, %v1532_v24  ;;  %1796 = vmatprep.subr.mxu0 %v4747_v49  ;;  %v1717_v13 = vld [vmem:[%s4784_s25 + $0x80] sm:$0xff] }
 0x290   : > { %v4388_v6 = vpop.f32.mrf.mxu0 }
 0x291   : > { %v1517_v8 = vadd.f32 %v4388_v6, %v4180_v15  ;;  %v1718_v6 = vld [vmem:[%s4784_s25 + $0x88] sm:$0xff] }
 0x292   : > { %v1511_v9 = vpop.f32.mrf.mxu0  ;;  %1797 = vmatpush2.msra.mxu0 %v1718_v6 }
 0x293   : > { %v1527_v16 = vmul.f32 0.2, %v1517_v8  ;;  %v1512_v11 = vadd.f32 %v4180_v15, %v1511_v9  ;;  %vm1523_vm11 = vcmp.ge.f32.partialorder %v1517_v8, 0.0  ;;  %1798 = vmatprep.subr.mxu0 %v4747_v49 }
 0x294   : > { %1799 = vmatpush2.msra.mxu0 %v1717_v13 }
 0x295   : > { %vm1522_vm13 = vcmp.ge.f32.partialorder %v1512_v11, 0.0  ;;  %v1526_v12 = vmul.f32 0.2, %v1512_v11  ;;  %v1531_v17 = vsel %vm1523_vm11, %v1517_v8, %v1527_v16  ;;  %2179 = vmatprep.subr.mxu0 %v4747_v49 }
 0x296   : > { %v1537_v21 = vsel %vm1256_vm8, %v1531_v17, 0.0 }
 0x297   : > { %v1530_v18 = vsel %vm1522_vm13, %v1512_v11, %v1526_v12 }
 0x298   : > { %v1535_v19 = vsel %vm1256_vm8, %v1530_v18, 0.0 }
 0x299   : > { %v1536_v20 = vadd.f32 %v1535_v19, %v1534_v14 }
 0x29b   : > { %v1538_v22 = vadd.f32 %v1537_v21, %v1536_v20 }
 0x29d   : > { %v1539_v23 = vrot.slane %v1538_v22, 4 }
 0x29f   : > { %v1540_v25 = vadd.f32 %v1539_v23, %v1538_v22 }
 0x2a1   : > { %v1541_v26 = vrot.slane %v1540_v25, 2 }
 0x2a3   : > { %v1542_v27 = vadd.f32 %v1541_v26, %v1540_v25 }
 0x2a5   : > { %v1543_v28 = vrot.slane %v1542_v27, 1 }
 0x2a7   : > { %v1544_v30 = vadd.f32 %v1543_v28, %v1542_v27 }
 0x2a9   : > { %v1546_v31 = vmul.f32 0.03125, %v1544_v30 }
 0x2ab   : > { %v1547_v32 = vsub.f32 %v1528_v7, %v1546_v31  ;;  %v1548_v33 = vsub.f32 %v1529_v10, %v1546_v31  ;;  %v1549_v34 = vsub.f32 %v1530_v18, %v1546_v31  ;;  %v1550_v35 = vsub.f32 %v1531_v17, %v1546_v31 }
 0x2ad   : > { %v1551_v36 = vmul.f32 %v1547_v32, %v1547_v32  ;;  %v1552_v37 = vmul.f32 %v1548_v33, %v1548_v33  ;;  %v1553_v38 = vmul.f32 %v1549_v34, %v1549_v34  ;;  %v1554_v39 = vmul.f32 %v1550_v35, %v1550_v35 }
 0x2af   : > { %v1555_v40 = vsel %vm1256_vm8, %v1551_v36, 0.0  ;;  %v1556_v41 = vsel %vm1256_vm8, %v1552_v37, 0.0  ;;  %v1558_v43 = vsel %vm1256_vm8, %v1553_v38, 0.0  ;;  %v1560_v45 = vsel %vm1256_vm8, %v1554_v39, 0.0 }
 0x2b0   : > { %v1557_v42 = vadd.f32 %v1556_v41, %v1555_v40 }
 0x2b2   : > { %v1559_v44 = vadd.f32 %v1558_v43, %v1557_v42 }
 0x2b4   : > { %v1561_v46 = vadd.f32 %v1560_v45, %v1559_v44 }
 0x2b6   : > { %v1562_v47 = vrot.slane %v1561_v46, 4 }
 0x2b8   : > { %v1563_v48 = vadd.f32 %v1562_v47, %v1561_v46 }
 0x2ba   : > { %v1564_v29 = vrot.slane %v1563_v48, 2 }
 0x2bc   : > { %v1565_v50 = vadd.f32 %v1564_v29, %v1563_v48 }
 0x2be   : > { %v1566_v51 = vrot.slane %v1565_v50, 1 }
 0x2c0   : > { %v1567_v52 = vadd.f32 %v1566_v51, %v1565_v50 }
 0x2c2   : > { %v1568_v53 = vmul.f32 0.03125, %v1567_v52 }
 0x2c4   : > { %v1569_v54 = vadd.f32 1e-05, %v1568_v53 }
 0x2c6   : > { %4608 = vrsqrt.f32 %v1569_v54 }
 0x2d3   : > { %v4609_v55 = vpop.eup %4608 }
 0x2d4   : > { %v1571_v56 = vmul.f32 %v4609_v55, %v1547_v32  ;;  %v1572_v57 = vmul.f32 %v4609_v55, %v1548_v33  ;;  %v1573_v58 = vmul.f32 %v4609_v55, %v1549_v34  ;;  %v5207_v59 = vmul.f32 %v4609_v55, %v1550_v35 }
 0x2d6   : > { %v1575_v60 = vsel %vm1256_vm8, %v1571_v56, 0.0  ;;  %v1576_v61 = vsel %vm1256_vm8, %v1572_v57, 0.0  ;;  %v1598_v15 = vrot.slane %v1573_v58, 6  ;;  %1865 = vst.msk [vmem:[#allocation3] sm:$0xff] %vm1256_vm8, %v1571_v56  ;;  %1866 = vst.msk [vmem:[#allocation3 + $0x8] sm:$0xff] %vm1256_vm8, %v1572_v57  ;;  %v1590_v1 = vrot.slane %v1571_v56, 2 }
 0x2d7   : > { %1867 = vst.msk [vmem:[#allocation3 + $0x10] sm:$0xff] %vm1256_vm8, %v1573_v58  ;;  %1868 = vst.msk [vmem:[#allocation3 + $0x18] sm:$0xff] %vm1256_vm8, %v5207_v59  ;;  %v1577_v0 = vadd.f32 %v1576_v61, %v1575_v60  ;;  %v1595_v2 = vrot.slane %v1571_v56, 6  ;;  %v1596_v3 = vrot.slane %v1572_v57, 6  ;;  %v1578_v4 = vsel %vm1256_vm8, %v1573_v58, 0.0 }
 0x2d8   : > { %v1600_v5 = vrot.slane %v5207_v59, 6  ;;  %v1611_v9 = vsel %vm1111_vm3, %v1590_v1, %v1571_v56  ;;  %v1607_v28 = vrot.slane %v5207_v59, 4  ;;  %v1609_v38 = vrot.slane %v5207_v59, 2 }
 0x2d9   : > { %v1579_v7 = vadd.f32 %v1578_v4, %v1577_v0  ;;  %v5223_v8 = vsel %vm1113_vm5, %v1595_v2, %v1596_v3  ;;  %v5227_v10 = vsel %vm1113_vm5, %v1596_v3, %v1598_v15  ;;  %v5230_v16 = vsel %vm1113_vm5, %v1611_v9, %v1595_v2 }
 0x2da   : > { %v1681_v11 = vrot.slane %v5223_v8, 4  ;;  %v1639_v24 = vrot.slane %v5223_v8, 2  ;;  %v1641_v12 = vrot.slane %v5227_v10, 2  ;;  %v1680_v14 = vrot.slane %v5230_v16, 4 }
 0x2db   : > { %v1638_v17 = vrot.slane %v5230_v16, 2  ;;  %v1617_v18 = vrot.slane %v5230_v16, 1  ;;  %v1618_v19 = vrot.slane %v5223_v8, 1  ;;  %v1620_v21 = vrot.slane %v5227_v10, 1 }
 0x2dc   : > { %v1642_v20 = vsel %vm1145_vm1, %v1639_v24, %v1641_v12  ;;  %v5244_v22 = vsel %vm1113_vm5, %v1598_v15, %v1600_v5  ;;  %v1659_v23 = vrot.slane %v5230_v16, 3  ;;  %v1682_v25 = vsel %vm1117_vm6, %v1680_v14, %v1681_v11 }
 0x2dd   : > { %v1640_v26 = vsel %vm1145_vm1, %v1638_v17, %v1639_v24  ;;  %v1619_v27 = vsel %vm1123_vm2, %v1617_v18, %v1618_v19  ;;  %4182 = vmatprep.mubr.msk.f32.mxu0 %vm1256_vm8, %v1682_v25  ;;  %v1621_v31 = vsel %vm1123_vm2, %v1618_v19, %v1620_v21  ;;  %v1660_v32 = vrot.slane %v5223_v8, 3  ;;  %v1933_v25 = vld [vmem:[%s6028_s3 + $0x78] sm:$0xff] }
 0x2de   : > { %v4598_v30 = vpack.i.bf16 %v1642_v20, %v1640_v26  ;;  %v1662_v33 = vrot.slane %v5227_v10, 3  ;;  %v4593_v34 = vpack.i.bf16 %v1621_v31, %v1619_v27  ;;  %v1622_v35 = vrot.slane %v5244_v22, 1  ;;  %v1932_v26 = vld [vmem:[%s6028_s3 + $0x70] sm:$0xff]  ;;  %1952 = vmatpush1.msra.mxu1 %v1933_v25  ;;  %v1930_v27 = vld [vmem:[%s6028_s3 + $0x60] sm:$0xff]  ;;  %v1927_v31 = vld [vmem:[%s6028_s3 + $0x48] sm:$0xff] }
 0x2df   : > { %v1661_v36 = vsel %vm1119_vm4, %v1659_v23, %v1660_v32  ;;  %v1613_v39 = vsel %vm1113_vm5, %v1600_v5, %v1607_v28  ;;  %v1664_v42 = vrot.slane %v5244_v22, 3  ;;  %v1580_v43 = vsel %vm1256_vm8, %v5207_v59, 0.0  ;;  %1953 = vmatprep.subr.mxu1 %v4747_v49  ;;  %v1929_v28 = vld [vmem:[%s6028_s3 + $0x58] sm:$0xff] }
 0x2e0   : > { %4599 = vrot.lane.b32.xlu1 %v4598_v30, %s6038_s11  ;;  %v1663_v37 = vsel %vm1119_vm4, %v1660_v32, %v1662_v33  ;;  %4594 = vrot.lane.b32.xlu0 %v4593_v34, %s6037_s9  ;;  %v1623_v40 = vsel %vm1123_vm2, %v1620_v21, %v1622_v35  ;;  %v1643_v44 = vrot.slane %v5244_v22, 2  ;;  %v1614_v45 = vsel %vm1092_vm0, %v1613_v39, %v1609_v38  ;;  %v1928_v30 = vld [vmem:[%s6028_s3 + $0x50] sm:$0xff]  ;;  %v1926_v32 = vld [vmem:[%s6028_s3 + $0x40] sm:$0xff] }
 0x2e1   : > { %v4603_v41 = vpack.i.bf16 %v1663_v37, %v1661_v36  ;;  %v5273_v46 = vadd.f32 %v1580_v43, %v1579_v7  ;;  %v1665_v47 = vsel %vm1119_vm4, %v1662_v33, %v1664_v42  ;;  %v1645_v48 = vrot.slane %v1614_v45, 2  ;;  %1954 = vmatpush1.msra.mxu1 %v1932_v26  ;;  %v1925_v33 = vld [vmem:[%s6028_s3 + $0x38] sm:$0xff]  ;;  %v1924_v34 = vld [vmem:[%s6028_s3 + $0x30] sm:$0xff]  ;;  %v1922_v36 = vld [vmem:[%s6028_s3 + $0x20] sm:$0xff] }
 0x2e2   : > { %v1644_v29 = vsel %vm1145_vm1, %v1641_v12, %v1643_v44  ;;  %v1624_v50 = vrot.slane %v1614_v45, 1  ;;  %v1666_v53 = vrot.slane %v1614_v45, 3  ;;  %v1683_v62 = vrot.slane %v5227_v10, 4  ;;  %1955 = vmatprep.subr.mxu1 %v4747_v49  ;;  %v1921_v37 = vld [vmem:[%s6028_s3 + $0x18] sm:$0xff]  ;;  %v1920_v38 = vld [vmem:[%s6028_s3 + $0x10] sm:$0xff]  ;;  %v1919_v39 = vld [vmem:[%s6028_s3 + $0x8] sm:$0xff] }
 0x2e3   : > { %v1646_v51 = vsel %vm1145_vm1, %v1643_v44, %v1645_v48  ;;  %v1685_v7 = vrot.slane %v5244_v22, 4 }
 0x2e4   : > { %1630 = vrot.lane.b32.xlu1 %v1623_v40, %s6037_s9  ;;  %4604 = vrot.lane.b32.xlu0 %v4603_v41, %s5992_s1  ;;  %v1625_v52 = vsel %vm1123_vm2, %v1622_v35, %v1624_v50  ;;  %v1667_v54 = vsel %vm1119_vm4, %v1664_v42, %v1666_v53  ;;  %v1684_v6 = vsel %vm1117_vm6, %v1681_v11, %v1683_v62  ;;  %v1687_v11 = vrot.slane %v1614_v45, 4  ;;  %v1923_v35 = vld [vmem:[%s6028_s3 + $0x28] sm:$0xff]  ;;  %v1918_v40 = vld [vmem:[%s6028_s3] sm:$0xff] }
 0x2e5   : > { %v1937_v41 = vld [vmem:[%s6028_s3 + $0x98] sm:$0xff]  ;;  %v4181_v42 = vld [vmem:[%s4789_s29] ss:$0 sm:$0xff] }
 0x2e6   : > { %v1688_v20 = vsel %vm1117_vm6, %v1685_v7, %v1687_v11 }
 0x2e8   : > { %1672 = vrot.lane.b32.xlu1 %v1665_v47, %s5992_s1  ;;  %1651 = vrot.lane.b32.xlu0 %v1644_v29, %s6038_s11 }
 0x2ec   : > { %1653 = vrot.lane.b32.xlu1 %v1646_v51, %s6038_s11  ;;  %1632 = vrot.lane.b32.xlu0 %v1625_v52, %s6037_s9 }
 0x2f0   : > { %1674 = vrot.lane.b32.xlu0 %v1667_v54, %s5992_s1 }
 0x352   : > { %v4600_v55 = vpop.permute.xlu1 %4599  ;;  %v4595_v56 = vpop.permute.xlu0 %4594 }
 0x353   : > { %v4596_v57 = vunpack.i.l.bf16 %v4595_v56  ;;  %v4601_v58 = vunpack.i.l.bf16 %v4600_v55  ;;  %v4597_v59 = vunpack.i.h.bf16 %v4595_v56  ;;  %v4602_v0 = vunpack.i.h.bf16 %v4600_v55 }
 0x355   : > { %v1689_v60 = vsel %vm1256_vm8, %v5230_v16, %v4596_v57  ;;  %v1690_v4 = vsel %vm1256_vm8, %v5223_v8, %v4597_v59  ;;  %v1686_v8 = vsel %vm1117_vm6, %v1683_v62, %v1685_v7  ;;  %v1936_v57 = vld [vmem:[%s6028_s3 + $0x90] sm:$0xff] }
 0x356   : > { %v1631_v61 = vpop.permute.xlu1 %1630  ;;  %v4605_v15 = vpop.permute.xlu0 %4604  ;;  %v1693_v1 = vsel %vm1266_vm10, %v1689_v60, %v4601_v58  ;;  %v1694_v16 = vsel %vm1266_vm10, %v1690_v4, %v4602_v0  ;;  %v1935_v58 = vld [vmem:[%s6028_s3 + $0x88] sm:$0xff] }
 0x357   : > { %v4606_v63 = vunpack.i.l.bf16 %v4605_v15  ;;  %v4607_v2 = vunpack.i.h.bf16 %v4605_v15  ;;  %v1691_v24 = vsel %vm1256_vm8, %v5227_v10, %v1631_v61 }
 0x359   : > { %v1697_v3 = vsel %vm1276_vm12, %v1693_v1, %v4606_v63  ;;  %v1698_v12 = vsel %vm1276_vm12, %v1694_v16, %v4607_v2  ;;  %v1934_v2 = vld [vmem:[%s6028_s3 + $0x80] sm:$0xff] }
 0x35a   : > { %v1652_v5 = vpop.permute.xlu0 %1651  ;;  %1801 = vmatmul.mubr.f32.vlgmr.msra.gmra.mxu0 %v1697_v3  ;;  %v1673_v9 = vpop.permute.xlu1 %1672 }
 0x35b   : > { %4183 = vmatprep.mubr.msk.f32.mxu0 %vm1256_vm8, %v1684_v6  ;;  %v1695_v13 = vsel %vm1266_vm10, %v1691_v24, %v1652_v5 }
 0x35c   : > { %v1699_v10 = vsel %vm1276_vm12, %v1695_v13, %v1673_v9 }
 0x35e   : > { %v1633_v14 = vpop.permute.xlu0 %1632  ;;  %1806 = vmatmul.mubr.f32.gmra.mxu0 %v1698_v12  ;;  %v1654_v17 = vpop.permute.xlu1 %1653 }
 0x35f   : > { %4184 = vmatprep.mubr.msk.f32.mxu0 %vm1256_vm8, %v1686_v8  ;;  %v1692_v18 = vsel %vm1256_vm8, %v5244_v22, %v1633_v14  ;;  %v1931_v22 = vld [vmem:[%s6028_s3 + $0x68] sm:$0xff]  ;;  %s6042_s3 = smov 96  }
 0x360   : > { %v1696_v21 = vsel %vm1266_vm10, %v1692_v18, %v1654_v17  ;;  %1956 = vmatpush1.msra.mxu1 %v1931_v22 }
 0x361   : > { %1957 = vmatprep.subr.mxu1 %v4747_v49 }
 0x362   : > { %v1675_v19 = vpop.permute.xlu0 %1674  ;;  %1811 = vmatmul.mubr.f32.gmra.mxu0 %v1699_v10  ;;  %1958 = vmatpush1.msra.mxu1 %v1930_v27 }
 0x363   : > { %4185 = vmatprep.mubr.msk.f32.mxu0 %vm1256_vm8, %v1688_v20  ;;  %v1700_v23 = vsel %vm1276_vm12, %v1696_v21, %v1675_v19  ;;  %1959 = vmatprep.subr.mxu1 %v4747_v49 }
 0x364   : > { %1960 = vmatpush1.msra.mxu1 %v1929_v28 }
 0x365   : > { %1961 = vmatprep.subr.mxu1 %v4747_v49 }
 0x366   : > { %1816 = vmatmul.mubr.f32.gmra.mxu0 %v1700_v23  ;;  %1962 = vmatpush1.msra.mxu1 %v1928_v30 }
 0x367   : > { %1963 = vmatprep.subr.mxu1 %v4747_v49 }
 0x368   : > { %1964 = vmatpush1.msra.mxu1 %v1927_v31 }
 0x369   : > { %1965 = vmatprep.subr.mxu1 %v4747_v49 }
 0x36a   : > { %1966 = vmatpush1.msra.mxu1 %v1926_v32 }
 0x36b   : > { %1967 = vmatprep.subr.mxu1 %v4747_v49 }
 0x36c   : > { %1968 = vmatpush1.msra.mxu1 %v1925_v33 }
 0x36d   : > { %1969 = vmatprep.subr.mxu1 %v4747_v49 }
 0x36e   : > { %1970 = vmatpush1.msra.mxu1 %v1924_v34 }
 0x36f   : > { %1971 = vmatprep.subr.mxu1 %v4747_v49 }
 0x370   : > { %1972 = vmatpush1.msra.mxu1 %v1923_v35 }
 0x371   : > { %1973 = vmatprep.subr.mxu1 %v4747_v49 }
 0x372   : > { %1974 = vmatpush1.msra.mxu1 %v1922_v36 }
 0x373   : > { %1975 = vmatprep.subr.mxu1 %v4747_v49 }
 0x374   : > { %1976 = vmatpush1.msra.mxu1 %v1921_v37 }
 0x375   : > { %1977 = vmatprep.subr.mxu1 %v4747_v49 }
 0x376   : > { %1978 = vmatpush1.msra.mxu1 %v1920_v38 }
 0x377   : > { %1979 = vmatprep.subr.mxu1 %v4747_v49 }
 0x378   : > { %1980 = vmatpush1.msra.mxu1 %v1919_v39 }
 0x379   : > { %1981 = vmatprep.subr.mxu1 %v4747_v49 }
 0x37a   : > { %1982 = vmatpush1.msra.mxu1 %v1918_v40  ;;  %v2163_v40 = vld [vmem:[%s4804_s14 + $0x78] sm:$0xff] }
 0x37b   : > { %2007 = vmatprep.subr.mxu1 %v4747_v49  ;;  %2180 = vmatpush1.msra.mxu0 %v2163_v40 }
 0x37c   : > { %2008 = vmatpush2.msra.mxu1 %v1937_v41  ;;  %v2162_v41 = vld [vmem:[%s4804_s14 + $0x70] sm:$0xff]  ;;  %2181 = vmatprep.subr.mxu0 %v4747_v49 }
 0x37d   : > { %2009 = vmatprep.subr.mxu1 %v4747_v49  ;;  %2182 = vmatpush1.msra.mxu0 %v2162_v41 }
 0x37e   : > { %2010 = vmatpush2.msra.mxu1 %v1936_v57  ;;  %2183 = vmatprep.subr.mxu0 %v4747_v49  ;;  %v2167_v57 = vld [vmem:[%s4804_s14 + $0x98] sm:$0xff] }
 0x37f   : > { %2011 = vmatprep.subr.mxu1 %v4747_v49 }
 0x380   : > { %2012 = vmatpush2.msra.mxu1 %v1935_v58  ;;  %v4186_v58 = vld [vmem:[%s6040_s8] ss:$0 sm:$0xff]  ;;  %s6048_s8 = sld [smem:[#allocation21_spill]] }
 0x381   : > { %2013 = vmatprep.subr.mxu1 %v4747_v49 }
 0x382   : > { %2014 = vmatpush2.msra.mxu1 %v1934_v2 }
 0x383   : > { %2333 = vmatprep.subr.mxu1 %v4747_v49 }
 0x41a   : > { %v1802_v43 = vpop.f32.mrf.mxu0 }
 0x41b   : > { %v1803_v44 = vadd.f32 %v4181_v42, %v1802_v43  ;;  %v2160_v43 = vld [vmem:[%s4804_s14 + $0x60] sm:$0xff] }
 0x41c   : > { %v1804_v45 = vpop.f32.mrf.mxu0 }
 0x41d   : > { %vm1821_vm14 = vcmp.ge.f32.partialorder %v1803_v44, 0.0  ;;  %v1825_v47 = vmul.f32 0.2, %v1803_v44  ;;  %v2158_v45 = vld [vmem:[%s4804_s14 + $0x50] sm:$0xff] }
 0x41e   : > { %v1807_v48 = vpop.f32.mrf.mxu0 }
 0x41f   : > { %v1829_v29 = vsel %vm1821_vm14, %v1803_v44, %v1825_v47  ;;  %v1808_v50 = vadd.f32 %v4181_v42, %v1807_v48  ;;  %vm1863_vm14 = vcmask 257024   ;;  %v2159_v44 = vld [vmem:[%s4804_s14 + $0x58] sm:$0xff]  ;;  %v2157_v47 = vld [vmem:[%s4804_s14 + $0x48] sm:$0xff]  ;;  %v2156_v48 = vld [vmem:[%s4804_s14 + $0x40] sm:$0xff] }
 0x420   : > { %v1834_v51 = vrot.slane %v1829_v29, 2  ;;  %v1839_v52 = vrot.slane %v1829_v29, 6  ;;  %v1809_v53 = vpop.f32.mrf.mxu0 }
 0x421   : > { %vm1822_vm15 = vcmp.ge.f32.partialorder %v1808_v50, 0.0  ;;  %v1826_v54 = vmul.f32 0.2, %v1808_v50  ;;  %v2151_v53 = vld [vmem:[%s4804_s14 + $0x18] sm:$0xff] }
 0x422   : > { %v1855_v55 = vsel %vm1111_vm3, %v1834_v51, %v1829_v29  ;;  %v1812_v56 = vpop.f32.mrf.mxu0  ;;  %v2155_v29 = vld [vmem:[%s4804_s14 + $0x38] sm:$0xff]  ;;  %v2153_v51 = vld [vmem:[%s4804_s14 + $0x28] sm:$0xff] }
 0x423   : > { %v1856_v59 = vsel %vm1113_vm5, %v1855_v55, %v1839_v52  ;;  %v1830_v60 = vsel %vm1822_vm15, %v1808_v50, %v1826_v54  ;;  %v1813_v61 = vadd.f32 %v4181_v42, %v1812_v56  ;;  %v2154_v50 = vld [vmem:[%s4804_s14 + $0x30] sm:$0xff]  ;;  %v2149_v55 = vld [vmem:[%s4804_s14 + $0x8] sm:$0xff]  ;;  %v2148_v56 = vld [vmem:[%s4804_s14] sm:$0xff] }
 0x424   : > { %1859 = vst.msk [vmem:[#allocation2] sm:$0xff] %vm1256_vm8, %v1856_v59  ;;  %v1840_v15 = vrot.slane %v1830_v60, 6  ;;  %v1814_v62 = vpop.f32.mrf.mxu0  ;;  %v2150_v54 = vld [vmem:[%s4804_s14 + $0x10] sm:$0xff] }
 0x425   : > { %vm1823_vm11 = vcmp.ge.f32.partialorder %v1813_v61, 0.0  ;;  %v1827_v63 = vmul.f32 0.2, %v1813_v61 }
 0x426   : > { %v1841_v0 = vsel %vm1113_vm5, %v1839_v52, %v1840_v15  ;;  %v1817_v1 = vpop.f32.mrf.mxu0  ;;  %v2152_v52 = vld [vmem:[%s4804_s14 + $0x20] sm:$0xff] }
 0x427   : > { %1860 = vst.msk [vmem:[#allocation2 + $0x8] sm:$0xff] %vm1256_vm8, %v1841_v0  ;;  %v1831_v3 = vsel %vm1823_vm11, %v1813_v61, %v1827_v63  ;;  %v1818_v4 = vadd.f32 %v4181_v42, %v1817_v1  ;;  %v2161_v42 = vld [vmem:[%s4804_s14 + $0x68] sm:$0xff] }
 0x428   : > { %v1842_v5 = vrot.slane %v1831_v3, 6  ;;  %v1819_v6 = vpop.f32.mrf.mxu0  ;;  %2184 = vmatpush1.msra.mxu0 %v2161_v42 }
 0x429   : > { %vm1824_vm13 = vcmp.ge.f32.partialorder %v1818_v4, 0.0  ;;  %v1828_v7 = vmul.f32 0.2, %v1818_v4  ;;  %2185 = vmatprep.subr.mxu0 %v4747_v49 }
 0x42a   : > { %v1843_v9 = vsel %vm1113_vm5, %v1840_v15, %v1842_v5  ;;  %2186 = vmatpush1.msra.mxu0 %v2160_v43 }
 0x42b   : > { %1861 = vst.msk [vmem:[#allocation2 + $0x10] sm:$0xff] %vm1256_vm8, %v1843_v9  ;;  %v1832_v16 = vsel %vm1824_vm13, %v1818_v4, %v1828_v7  ;;  %2187 = vmatprep.subr.mxu0 %v4747_v49 }
 0x42c   : > { %v1844_v24 = vrot.slane %v1832_v16, 6  ;;  %v1851_v12 = vrot.slane %v1832_v16, 4  ;;  %v1853_v13 = vrot.slane %v1832_v16, 2  ;;  %2188 = vmatpush1.msra.mxu0 %v2159_v44 }
 0x42d   : > { %2189 = vmatprep.subr.mxu0 %v4747_v49 }
 0x42e   : > { %v1845_v14 = vsel %vm1113_vm5, %v1842_v5, %v1844_v24  ;;  %v1857_v8 = vsel %vm1113_vm5, %v1844_v24, %v1851_v12  ;;  %v1873_v11 = vld [vmem:[#allocation2 + $0x1] ss:$2 sm:$0xff]  ;;  %v1869_v26 = vld [vmem:[#allocation2] ss:$2 sm:$0xff]  ;;  %2190 = vmatpush1.msra.mxu0 %v2158_v45 }
 0x42f   : > { %v1858_v17 = vsel %vm1092_vm0, %v1857_v8, %v1853_v13  ;;  %1862 = vst.msk [vmem:[#allocation2 + $0x18] sm:$0xff] %vm1256_vm8, %v1845_v14  ;;  %1890 = vrot.lane.b32.xlu1 %v1873_v11, %s6037_s9  ;;  %2191 = vmatprep.subr.mxu0 %v4747_v49 }
 0x430   : > { %1864 = vst.msk [vmem:[#allocation2 + $0x20] sm:$0xf] %vm1863_vm14, %v1858_v17  ;;  %2192 = vmatpush1.msra.mxu0 %v2157_v47  ;;  %v2164_v47 = vld [vmem:[%s4804_s14 + $0x80] sm:$0xff] }
 0x431   : > { %2193 = vmatprep.subr.mxu0 %v4747_v49 }
 0x432   : > { %v1885_v18 = vld [vmem:[#allocation2 + $0x4] ss:$2 sm:$0xff]  ;;  %v1881_v19 = vld [vmem:[#allocation2 + $0x3] ss:$2 sm:$0xff]  ;;  %2194 = vmatpush1.msra.mxu0 %v2156_v48 }
 0x433   : > { %v1877_v10 = vld [vmem:[#allocation2 + $0x2] ss:$2 sm:$0xff]  ;;  %4187 = vmatprep.mubr.msk.f32.mxu1 %vm1256_vm8, %v1885_v18  ;;  %1906 = vrot.lane.b32.xlu1 %v1881_v19, %s5992_s1 }
 0x434   : > { %1898 = vrot.lane.b32.xlu0 %v1877_v10, %s6038_s11  ;;  %2195 = vmatprep.subr.mxu0 %v4747_v49 }
 0x435   : > { %2196 = vmatpush1.msra.mxu0 %v2155_v29 }
 0x436   : > { %v1875_v20 = vld [vmem:[#allocation2 + $0x11] ss:$2 sm:$0xff]  ;;  %v1871_v33 = vld [vmem:[#allocation2 + $0x10] ss:$2 sm:$0xff]  ;;  %2197 = vmatprep.subr.mxu0 %v4747_v49 }
 0x437   : > { %v1879_v21 = vld [vmem:[#allocation2 + $0x12] ss:$2 sm:$0xff]  ;;  %v1883_v23 = vld [vmem:[#allocation2 + $0x13] ss:$2 sm:$0xff]  ;;  %2198 = vmatpush1.msra.mxu0 %v2154_v50 }
 0x438   : > { %1892 = vrot.lane.b32.xlu0 %v1875_v20, %s6037_s9  ;;  %1900 = vrot.lane.b32.xlu1 %v1879_v21, %s6038_s11  ;;  %v1887_v32 = vld [vmem:[#allocation2 + $0x14] ss:$2 sm:$0xff] }
 0x439   : > { %2199 = vmatprep.subr.mxu0 %v4747_v49 }
 0x43a   : > { %2200 = vmatpush1.msra.mxu0 %v2153_v51 }
 0x43b   : > { %2201 = vmatprep.subr.mxu0 %v4747_v49 }
 0x43c   : > { %1908 = vrot.lane.b32.xlu0 %v1883_v23, %s5992_s1  ;;  %2202 = vmatpush1.msra.mxu0 %v2152_v52 }
 0x43d   : > { %2203 = vmatprep.subr.mxu0 %v4747_v49 }
 0x43e   : > { %2204 = vmatpush1.msra.mxu0 %v2151_v53 }
 0x43f   : > { %2205 = vmatprep.subr.mxu0 %v4747_v49 }
 0x440   : > { %2206 = vmatpush1.msra.mxu0 %v2150_v54 }
 0x441   : > { %2207 = vmatprep.subr.mxu0 %v4747_v49 }
 0x442   : > { %2208 = vmatpush1.msra.mxu0 %v2149_v55 }
 0x443   : > { %2209 = vmatprep.subr.mxu0 %v4747_v49 }
 0x444   : > { %2210 = vmatpush1.msra.mxu0 %v2148_v56 }
 0x445   : > { %2235 = vmatprep.subr.mxu0 %v4747_v49 }
 0x446   : > { %2236 = vmatpush2.msra.mxu0 %v2167_v57 }
 0x447   : > { %2237 = vmatprep.subr.mxu0 %v4747_v49 }
 0x4a1   : > { %v1891_v25 = vpop.permute.xlu1 %1890 }
 0x4a2   : > { %v1912_v22 = vsel %vm1256_vm8, %v1869_v26, %v1891_v25 }
 0x4a5   : > { %v1907_v30 = vpop.permute.xlu1 %1906 }
 0x4a6   : > { %v1899_v27 = vpop.permute.xlu0 %1898 }
 0x4a7   : > { %v1914_v28 = vsel %vm1266_vm10, %v1912_v22, %v1899_v27 }
 0x4a8   : > { %v1916_v31 = vsel %vm1276_vm12, %v1914_v28, %v1907_v30 }
 0x4a9   : > { %2016 = vmatmul.mubr.f32.vlgmr.msra.gmra.mxu1 %v1916_v31  ;;  %v2032_v31 = vld [vmem:[#allocation3] ss:$2 sm:$0xff] }
 0x4aa   : > { %v1893_v34 = vpop.permute.xlu0 %1892  ;;  %4188 = vmatprep.mubr.msk.f32.mxu1 %vm1256_vm8, %v1887_v32  ;;  %v1901_v36 = vpop.permute.xlu1 %1900  ;;  %v2034_v32 = vld [vmem:[#allocation3 + $0x10] ss:$2 sm:$0xff] }
 0x4ab   : > { %v1913_v35 = vsel %vm1256_vm8, %v1871_v33, %v1893_v34  ;;  %v2036_v33 = vld [vmem:[#allocation3 + $0x1] ss:$2 sm:$0xff]  ;;  %v2038_v34 = vld [vmem:[#allocation3 + $0x11] ss:$2 sm:$0xff] }
 0x4ac   : > { %v1915_v37 = vsel %vm1266_vm10, %v1913_v35, %v1901_v36  ;;  %v2039_v35 = vadd.f32 %v2036_v33, %v2032_v31  ;;  %v2040_v36 = vadd.f32 %v2038_v34, %v2034_v32  ;;  %v2317_v31 = vld [vmem:[%s4814_s24 + $0x70] sm:$0xff]  ;;  %v2316_v32 = vld [vmem:[%s4814_s24 + $0x68] sm:$0xff]  ;;  %v2315_v33 = vld [vmem:[%s4814_s24 + $0x60] sm:$0xff] }
 0x4ad   : > { %v2314_v34 = vld [vmem:[%s4814_s24 + $0x58] sm:$0xff] }
 0x4ae   : > { %v1909_v38 = vpop.permute.xlu0 %1908  ;;  %v2041_v40 = vmul.f32 0.5, %v2039_v35  ;;  %v2042_v41 = vmul.f32 0.5, %v2040_v36  ;;  %v2313_v35 = vld [vmem:[%s4814_s24 + $0x50] sm:$0xff]  ;;  %v2312_v36 = vld [vmem:[%s4814_s24 + $0x48] sm:$0xff] }
 0x4af   : > { %v1917_v39 = vsel %vm1276_vm12, %v1915_v37, %v1909_v38  ;;  %v2166_v38 = vld [vmem:[%s4804_s14 + $0x90] sm:$0xff] }
 0x4b0   : > { %2021 = vmatmul.mubr.f32.gmra.mxu1 %v1917_v39  ;;  %v2165_v39 = vld [vmem:[%s4804_s14 + $0x88] sm:$0xff]  ;;  %2238 = vmatpush2.msra.mxu0 %v2166_v38  ;;  %v2310_v38 = vld [vmem:[%s4814_s24 + $0x38] sm:$0xff] }
 0x4b1   : > { %2239 = vmatprep.subr.mxu0 %v4747_v49 }
 0x4b2   : > { %2240 = vmatpush2.msra.mxu0 %v2165_v39  ;;  %v2309_v39 = vld [vmem:[%s4814_s24 + $0x30] sm:$0xff] }
 0x4b3   : > { %2241 = vmatprep.subr.mxu0 %v4747_v49 }
 0x4b4   : > { %2242 = vmatpush2.msra.mxu0 %v2164_v47  ;;  %v2322_v47 = vld [vmem:[%s4814_s24 + $0x98] sm:$0xff] }
 0x4b5   : > { %2507 = vmatprep.subr.mxu0 %v4747_v49 }
 0x569   : > { %v2017_v59 = vpop.f32.mrf.mxu1 }
 0x56a   : > { %v2018_v60 = vadd.f32 %v4186_v58, %v2017_v59 }
 0x56b   : > { %v2019_v61 = vpop.f32.mrf.mxu1 }
 0x56c   : > { %v2028_v15 = vmul.f32 0.2, %v2018_v60  ;;  %vm2026_vm15 = vcmp.ge.f32.partialorder %v2018_v60, 0.0 }
 0x56e   : > { %v2030_v1 = vsel %vm2026_vm15, %v2018_v60, %v2028_v15 }
 0x56f   : > { %v2043_v4 = vsel %vm1256_vm8, %v2030_v1, 0.0 }
 0x570   : > { %v2022_v62 = vpop.f32.mrf.mxu1 }
 0x571   : > { %v2023_v63 = vadd.f32 %v4186_v58, %v2022_v62 }
 0x572   : > { %v2024_v0 = vpop.f32.mrf.mxu1 }
 0x573   : > { %vm2027_vm11 = vcmp.ge.f32.partialorder %v2023_v63, 0.0  ;;  %v2029_v2 = vmul.f32 0.2, %v2023_v63 }
 0x575   : > { %v2031_v3 = vsel %vm2027_vm11, %v2023_v63, %v2029_v2 }
 0x576   : > { %v2044_v5 = vsel %vm1256_vm8, %v2031_v3, 0.0 }
 0x577   : > { %v2045_v6 = vadd.f32 %v2044_v5, %v2043_v4 }
 0x579   : > { %v2046_v7 = vrot.slane %v2045_v6, 4 }
 0x57b   : > { %v2047_v9 = vadd.f32 %v2046_v7, %v2045_v6 }
 0x57d   : > { %v2048_v16 = vrot.slane %v2047_v9, 2 }
 0x57f   : > { %v2049_v24 = vadd.f32 %v2048_v16, %v2047_v9 }
 0x581   : > { %v2050_v12 = vrot.slane %v2049_v24, 1 }
 0x583   : > { %v2051_v13 = vadd.f32 %v2050_v12, %v2049_v24 }
 0x585   : > { %v2053_v14 = vmul.f32 0.0625, %v2051_v13 }
 0x587   : > { %v2054_v8 = vsub.f32 %v2030_v1, %v2053_v14  ;;  %v2055_v11 = vsub.f32 %v2031_v3, %v2053_v14 }
 0x589   : > { %v2056_v17 = vmul.f32 %v2054_v8, %v2054_v8  ;;  %v2057_v18 = vmul.f32 %v2055_v11, %v2055_v11 }
 0x58b   : > { %v2058_v10 = vsel %vm1256_vm8, %v2056_v17, 0.0  ;;  %v2059_v19 = vsel %vm1256_vm8, %v2057_v18, 0.0 }
 0x58c   : > { %v2060_v20 = vadd.f32 %v2059_v19, %v2058_v10 }
 0x58e   : > { %v2061_v21 = vrot.slane %v2060_v20, 4 }
 0x590   : > { %v2062_v23 = vadd.f32 %v2061_v21, %v2060_v20 }
 0x592   : > { %v2063_v25 = vrot.slane %v2062_v23, 2 }
 0x594   : > { %v2064_v26 = vadd.f32 %v2063_v25, %v2062_v23 }
 0x596   : > { %v2065_v22 = vrot.slane %v2064_v26, 1 }
 0x598   : > { %v2066_v27 = vadd.f32 %v2065_v22, %v2064_v26 }
 0x59a   : > { %v2067_v28 = vmul.f32 0.0625, %v2066_v27 }
 0x59c   : > { %v2068_v30 = vadd.f32 1e-05, %v2067_v28 }
 0x59e   : > { %4610 = vrsqrt.f32 %v2068_v30  ;;  %v2318_v30 = vld [vmem:[%s4814_s24 + $0x78] sm:$0xff] }
 0x59f   : > { %2334 = vmatpush1.msra.mxu1 %v2318_v30  ;;  %v2484_v30 = vld [vmem:[%s6027_s6 + $0x30] sm:$0xff] }
 0x5a0   : > { %2335 = vmatprep.subr.mxu1 %v4747_v49 }
 0x5a1   : > { %2336 = vmatpush1.msra.mxu1 %v2317_v31  ;;  %v2483_v31 = vld [vmem:[%s6027_s6 + $0x28] sm:$0xff] }
 0x5a2   : > { %2337 = vmatprep.subr.mxu1 %v4747_v49 }
 0x5a3   : > { %2338 = vmatpush1.msra.mxu1 %v2316_v32  ;;  %v2482_v32 = vld [vmem:[%s6027_s6 + $0x20] sm:$0xff] }
 0x5a4   : > { %2339 = vmatprep.subr.mxu1 %v4747_v49 }
 0x5a5   : > { %2340 = vmatpush1.msra.mxu1 %v2315_v33  ;;  %v2481_v33 = vld [vmem:[%s6027_s6 + $0x18] sm:$0xff] }
 0x5a6   : > { %2341 = vmatprep.subr.mxu1 %v4747_v49 }
 0x5a7   : > { %2342 = vmatpush1.msra.mxu1 %v2314_v34  ;;  %v2480_v34 = vld [vmem:[%s6027_s6 + $0x10] sm:$0xff] }
 0x5a8   : > { %2343 = vmatprep.subr.mxu1 %v4747_v49 }
 0x5a9   : > { %2344 = vmatpush1.msra.mxu1 %v2313_v35  ;;  %v2479_v35 = vld [vmem:[%s6027_s6 + $0x8] sm:$0xff] }
 0x5aa   : > { %2345 = vmatprep.subr.mxu1 %v4747_v49 }
 0x5ab   : > { %v4611_v37 = vpop.eup %4610  ;;  %2346 = vmatpush1.msra.mxu1 %v2312_v36  ;;  %v2478_v36 = vld [vmem:[%s6027_s6] sm:$0xff] }
 0x5ac   : > { %v2070_v42 = vmul.f32 %v4611_v37, %v2054_v8  ;;  %v2071_v43 = vmul.f32 %v4611_v37, %v2055_v11  ;;  %v2311_v37 = vld [vmem:[%s4814_s24 + $0x40] sm:$0xff]  ;;  %2347 = vmatprep.subr.mxu1 %v4747_v49 }
 0x5ad   : > { %2348 = vmatpush1.msra.mxu1 %v2311_v37  ;;  %v2497_v37 = vld [vmem:[%s6027_s6 + $0x98] sm:$0xff] }
 0x5ae   : > { %v2072_v44 = vadd.f32 %v2070_v42, %v2041_v40  ;;  %v2073_v45 = vadd.f32 %v2071_v43, %v2042_v41  ;;  %2349 = vmatprep.subr.mxu1 %v4747_v49  ;;  %v2308_v40 = vld [vmem:[%s4814_s24 + $0x28] sm:$0xff]  ;;  %v2307_v41 = vld [vmem:[%s4814_s24 + $0x20] sm:$0xff]  ;;  %v2306_v42 = vld [vmem:[%s4814_s24 + $0x18] sm:$0xff] }
 0x5af   : > { %2350 = vmatpush1.msra.mxu1 %v2310_v38  ;;  %v2305_v43 = vld [vmem:[%s4814_s24 + $0x10] sm:$0xff]  ;;  %v4192_v38 = vld [vmem:[%s4819_s30] ss:$0 sm:$0xff] }
 0x5b0   : > { %2281 = vst.msk [vmem:[#allocation3] sm:$0xff] %vm1256_vm8, %v2072_v44  ;;  %2282 = vst.msk [vmem:[#allocation3 + $0x8] sm:$0xff] %vm1256_vm8, %v2073_v45  ;;  %v2085_v48 = vrot.slane %v2072_v44, 2  ;;  %v2088_v29 = vrot.slane %v2072_v44, 6  ;;  %v2089_v50 = vrot.slane %v2073_v45, 6  ;;  %v2094_v51 = vrot.slane %v2073_v45, 4  ;;  %2351 = vmatprep.subr.mxu1 %v4747_v49 }
 0x5b1   : > { %v2096_v52 = vrot.slane %v2073_v45, 2  ;;  %v2074_v53 = vsel %vm1256_vm8, %v2072_v44, 0.0  ;;  %v2075_v54 = vsel %vm1256_vm8, %v2073_v45, 0.0  ;;  %2352 = vmatpush1.msra.mxu1 %v2309_v39  ;;  %v2303_v45 = vld [vmem:[%s4814_s24] sm:$0xff] }
 0x5b2   : > { %v2090_v55 = vsel %vm1113_vm5, %v2088_v29, %v2089_v50  ;;  %v2098_v56 = vsel %vm1111_vm3, %v2085_v48, %v2072_v44  ;;  %v2100_v57 = vsel %vm1113_vm5, %v2089_v50, %v2094_v51  ;;  %v5431_v58 = vadd.f32 %v2075_v54, %v2074_v53  ;;  %2353 = vmatprep.subr.mxu1 %v4747_v49  ;;  %v2304_v44 = vld [vmem:[%s4814_s24 + $0x8] sm:$0xff]  ;;  %v4189_v48 = vld [vmem:[%s4809_s19] ss:$0 sm:$0xff] }
 0x5b3   : > { %v2099_v59 = vsel %vm1113_vm5, %v2098_v56, %v2088_v29  ;;  %v2138_v60 = vrot.slane %v2090_v55, 4  ;;  %v2116_v61 = vrot.slane %v2090_v55, 2  ;;  %v2105_v15 = vrot.slane %v2090_v55, 1  ;;  %2354 = vmatpush1.msra.mxu1 %v2308_v40 }
 0x5b4   : > { %v2137_v62 = vrot.slane %v2099_v59, 4  ;;  %v2115_v63 = vrot.slane %v2099_v59, 2  ;;  %v2104_v0 = vrot.slane %v2099_v59, 1  ;;  %v2101_v1 = vsel %vm1092_vm0, %v2100_v57, %v2096_v52  ;;  %2355 = vmatprep.subr.mxu1 %v4747_v49 }
 0x5b5   : > { %v2107_v5 = vrot.slane %v2101_v1, 1  ;;  %v2126_v6 = vrot.slane %v2099_v59, 3  ;;  %v2127_v7 = vrot.slane %v2090_v55, 3  ;;  %v2140_v9 = vrot.slane %v2101_v1, 4  ;;  %2356 = vmatpush1.msra.mxu1 %v2307_v41 }
 0x5b6   : > { %v2139_v2 = vsel %vm1117_vm6, %v2137_v62, %v2138_v60  ;;  %v2117_v3 = vsel %vm1145_vm1, %v2115_v63, %v2116_v61  ;;  %v2106_v4 = vsel %vm1123_vm2, %v2104_v0, %v2105_v15  ;;  %v2129_v12 = vrot.slane %v2101_v1, 3  ;;  %2357 = vmatprep.subr.mxu1 %v4747_v49  ;;  %v2321_v62 = vld [vmem:[%s4814_s24 + $0x90] sm:$0xff]  ;;  %v2320_v0 = vld [vmem:[%s4814_s24 + $0x88] sm:$0xff] }
 0x5b7   : > { %4190 = vmatprep.mubr.msk.f32.mxu0 %vm1256_vm8, %v2139_v2  ;;  %2120 = vrot.lane.b32.xlu0 %v2117_v3, %s6038_s11  ;;  %v2141_v16 = vsel %vm1117_vm6, %v2138_v60, %v2140_v9  ;;  %v2108_v24 = vsel %vm1123_vm2, %v2105_v15, %v2107_v5  ;;  %v2128_v13 = vsel %vm1119_vm4, %v2126_v6, %v2127_v7  ;;  %v2118_v14 = vrot.slane %v2101_v1, 2  ;;  %v2319_v6 = vld [vmem:[%s4814_s24 + $0x80] sm:$0xff] }
 0x5b8   : > { %2109 = vrot.lane.b32.xlu1 %v2106_v4, %s6037_s9  ;;  %v2130_v8 = vsel %vm1119_vm4, %v2127_v7, %v2129_v12  ;;  %2358 = vmatpush1.msra.mxu1 %v2306_v42 }
 0x5b9   : > { %v2119_v11 = vsel %vm1145_vm1, %v2116_v61, %v2118_v14  ;;  %2359 = vmatprep.subr.mxu1 %v4747_v49 }
 0x5ba   : > { %2360 = vmatpush1.msra.mxu1 %v2305_v43 }
 0x5bb   : > { %2111 = vrot.lane.b32.xlu0 %v2108_v24, %s6037_s9  ;;  %2361 = vmatprep.subr.mxu1 %v4747_v49 }
 0x5bc   : > { %2131 = vrot.lane.b32.xlu1 %v2128_v13, %s5992_s1  ;;  %2362 = vmatpush1.msra.mxu1 %v2304_v44 }
 0x5bd   : > { %2363 = vmatprep.subr.mxu1 %v4747_v49 }
 0x5be   : > { %2364 = vmatpush1.msra.mxu1 %v2303_v45 }
 0x5bf   : > { %2133 = vrot.lane.b32.xlu0 %v2130_v8, %s5992_s1  ;;  %2389 = vmatprep.subr.mxu1 %v4747_v49 }
 0x5c0   : > { %2122 = vrot.lane.b32.xlu1 %v2119_v11, %s6038_s11  ;;  %2390 = vmatpush2.msra.mxu1 %v2322_v47 }
 0x5c1   : > { %2391 = vmatprep.subr.mxu1 %v4747_v49 }
 0x5c2   : > { %2392 = vmatpush2.msra.mxu1 %v2321_v62 }
 0x5c3   : > { %2393 = vmatprep.subr.mxu1 %v4747_v49 }
 0x5c4   : > { %2394 = vmatpush2.msra.mxu1 %v2320_v0  ;;  %v2406_v0 = vld [vmem:[#allocation3] ss:$2 sm:$0xff] }
 0x5c5   : > { %2395 = vmatprep.subr.mxu1 %v4747_v49 }
 0x5c6   : > { %2396 = vmatpush2.msra.mxu1 %v2319_v6 }
 0x5c7   : > { %2644 = vmatprep.subr.mxu1 %v4747_v49 }
 0x629   : > { %v2121_v17 = vpop.permute.xlu0 %2120 }
 0x62a   : > { %v2110_v18 = vpop.permute.xlu1 %2109 }
 0x62b   : > { %v2142_v10 = vsel %vm1256_vm8, %v2099_v59, %v2110_v18 }
 0x62c   : > { %v2144_v20 = vsel %vm1266_vm10, %v2142_v10, %v2121_v17 }
 0x62d   : > { %v2112_v19 = vpop.permute.xlu0 %2111 }
 0x62e   : > { %v2132_v21 = vpop.permute.xlu1 %2131  ;;  %v2143_v26 = vsel %vm1256_vm8, %v2090_v55, %v2112_v19  ;;  %v2493_v19 = vld [vmem:[%s6027_s6 + $0x78] sm:$0xff] }
 0x62f   : > { %v2146_v23 = vsel %vm1276_vm12, %v2144_v20, %v2132_v21  ;;  %v2492_v20 = vld [vmem:[%s6027_s6 + $0x70] sm:$0xff]  ;;  %v2491_v21 = vld [vmem:[%s6027_s6 + $0x68] sm:$0xff] }
 0x630   : > { %2244 = vmatmul.mubr.f32.vlgmr.msra.gmra.mxu0 %v2146_v23  ;;  %v2490_v23 = vld [vmem:[%s6027_s6 + $0x60] sm:$0xff] }
 0x631   : > { %4191 = vmatprep.mubr.msk.f32.mxu0 %vm1256_vm8, %v2141_v16  ;;  %v2134_v25 = vpop.permute.xlu0 %2133  ;;  %2508 = vmatpush1.msra.mxu0 %v2493_v19 }
 0x632   : > { %v2123_v22 = vpop.permute.xlu1 %2122  ;;  %2509 = vmatprep.subr.mxu0 %v4747_v49 }
 0x633   : > { %v2145_v27 = vsel %vm1266_vm10, %v2143_v26, %v2123_v22  ;;  %2510 = vmatpush1.msra.mxu0 %v2492_v20  ;;  %v2488_v26 = vld [vmem:[%s6027_s6 + $0x50] sm:$0xff]  ;;  %v2487_v22 = vld [vmem:[%s6027_s6 + $0x48] sm:$0xff] }
 0x634   : > { %v2147_v28 = vsel %vm1276_vm12, %v2145_v27, %v2134_v25  ;;  %2511 = vmatprep.subr.mxu0 %v4747_v49  ;;  %v2489_v25 = vld [vmem:[%s6027_s6 + $0x58] sm:$0xff]  ;;  %v2486_v27 = vld [vmem:[%s6027_s6 + $0x40] sm:$0xff] }
 0x635   : > { %2249 = vmatmul.mubr.f32.gmra.mxu0 %v2147_v28  ;;  %v2485_v28 = vld [vmem:[%s6027_s6 + $0x38] sm:$0xff] }
 0x636   : > { %2512 = vmatpush1.msra.mxu0 %v2491_v21 }
 0x637   : > { %2513 = vmatprep.subr.mxu0 %v4747_v49 }
 0x638   : > { %2514 = vmatpush1.msra.mxu0 %v2490_v23 }
 0x639   : > { %2515 = vmatprep.subr.mxu0 %v4747_v49 }
 0x63a   : > { %2516 = vmatpush1.msra.mxu0 %v2489_v25 }
 0x63b   : > { %2517 = vmatprep.subr.mxu0 %v4747_v49 }
 0x63c   : > { %2518 = vmatpush1.msra.mxu0 %v2488_v26 }
 0x63d   : > { %2519 = vmatprep.subr.mxu0 %v4747_v49 }
 0x63e   : > { %2520 = vmatpush1.msra.mxu0 %v2487_v22 }
 0x63f   : > { %2521 = vmatprep.subr.mxu0 %v4747_v49 }
 0x640   : > { %2522 = vmatpush1.msra.mxu0 %v2486_v27 }
 0x641   : > { %2523 = vmatprep.subr.mxu0 %v4747_v49 }
 0x642   : > { %2524 = vmatpush1.msra.mxu0 %v2485_v28 }
 0x643   : > { %2525 = vmatprep.subr.mxu0 %v4747_v49 }
 0x644   : > { %2526 = vmatpush1.msra.mxu0 %v2484_v30 }
 0x645   : > { %2527 = vmatprep.subr.mxu0 %v4747_v49 }
 0x646   : > { %2528 = vmatpush1.msra.mxu0 %v2483_v31 }
 0x647   : > { %2529 = vmatprep.subr.mxu0 %v4747_v49 }
 0x648   : > { %2530 = vmatpush1.msra.mxu0 %v2482_v32 }
 0x649   : > { %2531 = vmatprep.subr.mxu0 %v4747_v49 }
 0x64a   : > { %2532 = vmatpush1.msra.mxu0 %v2481_v33 }
 0x64b   : > { %2533 = vmatprep.subr.mxu0 %v4747_v49 }
 0x64c   : > { %2534 = vmatpush1.msra.mxu0 %v2480_v34 }
 0x64d   : > { %2535 = vmatprep.subr.mxu0 %v4747_v49 }
 0x64e   : > { %2536 = vmatpush1.msra.mxu0 %v2479_v35 }
 0x64f   : > { %2537 = vmatprep.subr.mxu0 %v4747_v49 }
 0x650   : > { %2538 = vmatpush1.msra.mxu0 %v2478_v36 }
 0x651   : > { %2563 = vmatprep.subr.mxu0 %v4747_v49 }
 0x652   : > { %2564 = vmatpush2.msra.mxu0 %v2497_v37 }
 0x653   : > { %2565 = vmatprep.subr.mxu0 %v4747_v49 }
 0x6f0   : > { %v2245_v29 = vpop.f32.mrf.mxu0 }
 0x6f1   : > { %v2246_v50 = vadd.f32 %v4189_v48, %v2245_v29 }
 0x6f2   : > { %v2247_v51 = vpop.f32.mrf.mxu0 }
 0x6f3   : > { %vm2254_vm13 = vcmp.ge.f32.partialorder %v2246_v50, 0.0  ;;  %v2256_v52 = vmul.f32 0.2, %v2246_v50 }
 0x6f5   : > { %v2258_v53 = vsel %vm2254_vm13, %v2246_v50, %v2256_v52  ;;  %v2250_v54 = vpop.f32.mrf.mxu0  ;;  %vm3443_vm13 = vcmask 254080  }
 0x6f6   : > { %v2261_v55 = vrot.slane %v2258_v53, 2  ;;  %v2264_v56 = vrot.slane %v2258_v53, 6  ;;  %v2251_v57 = vadd.f32 %v4189_v48, %v2250_v54 }
 0x6f7   : > { %v2252_v59 = vpop.f32.mrf.mxu0 }
 0x6f8   : > { %v2274_v60 = vsel %vm1111_vm3, %v2261_v55, %v2258_v53  ;;  %vm2255_vm15 = vcmp.ge.f32.partialorder %v2251_v57, 0.0  ;;  %v2257_v61 = vmul.f32 0.2, %v2251_v57 }
 0x6f9   : > { %v2275_v15 = vsel %vm1113_vm5, %v2274_v60, %v2264_v56 }
 0x6fa   : > { %2278 = vst.msk [vmem:[#allocation2] sm:$0xff] %vm1256_vm8, %v2275_v15  ;;  %v2259_v63 = vsel %vm2255_vm15, %v2251_v57, %v2257_v61  ;;  %vm3441_vm15 = vcmask 122880  }
 0x6fb   : > { %v2265_v1 = vrot.slane %v2259_v63, 6  ;;  %v2270_v2 = vrot.slane %v2259_v63, 4  ;;  %v2272_v3 = vrot.slane %v2259_v63, 2 }
 0x6fd   : > { %v2266_v4 = vsel %vm1113_vm5, %v2264_v56, %v2265_v1  ;;  %v2276_v5 = vsel %vm1113_vm5, %v2265_v1, %v2270_v2  ;;  %v2407_v1 = vld [vmem:[#allocation3 + $0x1] ss:$2 sm:$0xff] }
 0x6fe   : > { %v2277_v7 = vsel %vm1092_vm0, %v2276_v5, %v2272_v3  ;;  %2279 = vst.msk [vmem:[#allocation2 + $0x8] sm:$0xff] %vm1256_vm8, %v2266_v4  ;;  %v2408_v2 = vadd.f32 %v2407_v1, %v2406_v0  ;;  %v2496_v4 = vld [vmem:[%s6027_s6 + $0x90] sm:$0xff]  ;;  %v2495_v5 = vld [vmem:[%s6027_s6 + $0x88] sm:$0xff] }
 0x6ff   : > { %2280 = vst.msk [vmem:[#allocation2 + $0x10] sm:$0xf] %vm1863_vm14, %v2277_v7  ;;  %2566 = vmatpush2.msra.mxu0 %v2496_v4 }
 0x700   : > { %v2409_v6 = vmul.f32 0.5, %v2408_v2  ;;  %2567 = vmatprep.subr.mxu0 %v4747_v49 }
 0x701   : > { %2568 = vmatpush2.msra.mxu0 %v2495_v5 }
 0x702   : > { %2569 = vmatprep.subr.mxu0 %v4747_v49 }
 0x705   : > { %v2284_v9 = vld [vmem:[#allocation2 + $0x1] ss:$2 sm:$0xff]  ;;  %v2283_v14 = vld [vmem:[#allocation2] ss:$2 sm:$0xff] }
 0x706   : > { %2289 = vrot.lane.b32.xlu1 %v2284_v9, %s6037_s9  ;;  %v2287_v16 = vld [vmem:[#allocation2 + $0x4] ss:$2 sm:$0xff]  ;;  %v2286_v12 = vld [vmem:[#allocation2 + $0x3] ss:$2 sm:$0xff] }
 0x707   : > { %v2285_v24 = vld [vmem:[#allocation2 + $0x2] ss:$2 sm:$0xff]  ;;  %4193 = vmatprep.mubr.msk.f32.mxu1 %vm1256_vm8, %v2287_v16 }
 0x708   : > { %2293 = vrot.lane.b32.xlu0 %v2285_v24, %s6038_s11  ;;  %v2494_v16 = vld [vmem:[%s6027_s6 + $0x80] sm:$0xff]  ;;  %s6043_s6 = sld [smem:[#allocation14_spill]] }
 0x709   : > { %2570 = vmatpush2.msra.mxu0 %v2494_v16 }
 0x70a   : > { %2297 = vrot.lane.b32.xlu1 %v2286_v12, %s5992_s1  ;;  %4411 = vmatprep.subr.mxu0 %v4747_v49  ;;  %s6041_s1 = sld [smem:[#allocation15_spill]] }
 0x710   : > { %v2629_v37 = vld [vmem:[%s6041_s1 + $0x78] sm:$0xff]  ;;  %v2632_v0 = vld [vmem:[%s6041_s1 + $0x90] sm:$0xff]  ;;  %v2631_v1 = vld [vmem:[%s6041_s1 + $0x88] sm:$0xff] }
 0x778   : > { %v2290_v13 = vpop.permute.xlu1 %2289 }
 0x779   : > { %v2300_v8 = vsel %vm1256_vm8, %v2283_v14, %v2290_v13 }
 0x77a   : > { %v2294_v11 = vpop.permute.xlu0 %2293 }
 0x77b   : > { %v2301_v17 = vsel %vm1266_vm10, %v2300_v8, %v2294_v11 }
 0x77c   : > { %v2298_v18 = vpop.permute.xlu1 %2297 }
 0x77d   : > { %v2302_v10 = vsel %vm1276_vm12, %v2301_v17, %v2298_v18 }
 0x77e   : > { %2398 = vmatmul.mubr.f32.vlgmr.msra.gmra.mxu1 %v2302_v10 }
 0x77f   : > { %2645 = vmatpush1.msra.mxu1 %v2629_v37 }
 0x780   : > { %2646 = vmatprep.subr.mxu1 %v4747_v49 }
 0x83e   : > { %v2399_v39 = vpop.f32.mrf.mxu1 }
 0x83f   : > { %v2400_v40 = vadd.f32 %v4192_v38, %v2399_v39  ;;  %v2628_v38 = vld [vmem:[%s6041_s1 + $0x70] sm:$0xff]  ;;  %v2627_v39 = vld [vmem:[%s6041_s1 + $0x68] sm:$0xff] }
 0x840   : > { %v2401_v41 = vpop.f32.mrf.mxu1  ;;  %2647 = vmatpush1.msra.mxu1 %v2628_v38 }
 0x841   : > { %vm2403_vm11 = vcmp.ge.f32.partialorder %v2400_v40, 0.0  ;;  %v2404_v42 = vmul.f32 0.2, %v2400_v40  ;;  %2648 = vmatprep.subr.mxu1 %v4747_v49  ;;  %v2625_v41 = vld [vmem:[%s6041_s1 + $0x58] sm:$0xff] }
 0x842   : > { %2649 = vmatpush1.msra.mxu1 %v2627_v39 }
 0x843   : > { %v2405_v43 = vsel %vm2403_vm11, %v2400_v40, %v2404_v42  ;;  %v2626_v40 = vld [vmem:[%s6041_s1 + $0x60] sm:$0xff]  ;;  %2650 = vmatprep.subr.mxu1 %v4747_v49  ;;  %v2624_v42 = vld [vmem:[%s6041_s1 + $0x50] sm:$0xff]  ;;  %vm3567_vm11 = vcmask 123905  }
 0x844   : > { %v2410_v44 = vsel %vm1256_vm8, %v2405_v43, 0.0  ;;  %2651 = vmatpush1.msra.mxu1 %v2626_v40 }
 0x845   : > { %v2411_v45 = vrot.slane %v2410_v44, 4  ;;  %2652 = vmatprep.subr.mxu1 %v4747_v49 }
 0x846   : > { %2653 = vmatpush1.msra.mxu1 %v2625_v41 }
 0x847   : > { %v2412_v47 = vadd.f32 %v2411_v45, %v2410_v44  ;;  %2654 = vmatprep.subr.mxu1 %v4747_v49  ;;  %v2622_v44 = vld [vmem:[%s6041_s1 + $0x40] sm:$0xff]  ;;  %v2621_v45 = vld [vmem:[%s6041_s1 + $0x38] sm:$0xff] }
 0x848   : > { %2655 = vmatpush1.msra.mxu1 %v2624_v42 }
 0x849   : > { %v2413_v48 = vrot.slane %v2412_v47, 2  ;;  %2656 = vmatprep.subr.mxu1 %v4747_v49 }
 0x84b   : > { %v2414_v29 = vadd.f32 %v2413_v48, %v2412_v47  ;;  %v2620_v47 = vld [vmem:[%s6041_s1 + $0x30] sm:$0xff]  ;;  %v2619_v48 = vld [vmem:[%s6041_s1 + $0x28] sm:$0xff] }
 0x84d   : > { %v2415_v50 = vrot.slane %v2414_v29, 1 }
 0x84f   : > { %v2416_v51 = vadd.f32 %v2415_v50, %v2414_v29  ;;  %v2618_v29 = vld [vmem:[%s6041_s1 + $0x20] sm:$0xff]  ;;  %v2617_v50 = vld [vmem:[%s6041_s1 + $0x18] sm:$0xff] }
 0x851   : > { %v2418_v52 = vmul.f32 0.125, %v2416_v51  ;;  %v2616_v51 = vld [vmem:[%s6041_s1 + $0x10] sm:$0xff] }
 0x853   : > { %v2419_v53 = vsub.f32 %v2405_v43, %v2418_v52  ;;  %v2623_v43 = vld [vmem:[%s6041_s1 + $0x48] sm:$0xff] }
 0x854   : > { %2657 = vmatpush1.msra.mxu1 %v2623_v43  ;;  %v2615_v52 = vld [vmem:[%s6041_s1 + $0x8] sm:$0xff] }
 0x855   : > { %v2420_v54 = vmul.f32 %v2419_v53, %v2419_v53  ;;  %2658 = vmatprep.subr.mxu1 %v4747_v49 }
 0x856   : > { %2659 = vmatpush1.msra.mxu1 %v2622_v44 }
 0x857   : > { %v2421_v55 = vsel %vm1256_vm8, %v2420_v54, 0.0  ;;  %2660 = vmatprep.subr.mxu1 %v4747_v49  ;;  %v2633_v54 = vld [vmem:[%s6041_s1 + $0x98] sm:$0xff] }
 0x858   : > { %v2422_v56 = vrot.slane %v2421_v55, 4  ;;  %2661 = vmatpush1.msra.mxu1 %v2621_v45 }
 0x859   : > { %2662 = vmatprep.subr.mxu1 %v4747_v49 }
 0x85a   : > { %v2423_v57 = vadd.f32 %v2422_v56, %v2421_v55  ;;  %2663 = vmatpush1.msra.mxu1 %v2620_v47  ;;  %v4194_v55 = vld [vmem:[%s6043_s6] ss:$0 sm:$0xff]  ;;  %s6044_s6 = sld [smem:[#allocation17_spill]] }
 0x85b   : > { %2664 = vmatprep.subr.mxu1 %v4747_v49 }
 0x85c   : > { %v2424_v59 = vrot.slane %v2423_v57, 2  ;;  %2665 = vmatpush1.msra.mxu1 %v2619_v48 }
 0x85d   : > { %2666 = vmatprep.subr.mxu1 %v4747_v49 }
 0x85e   : > { %v2425_v60 = vadd.f32 %v2424_v59, %v2423_v57  ;;  %2667 = vmatpush1.msra.mxu1 %v2618_v29 }
 0x85f   : > { %2668 = vmatprep.subr.mxu1 %v4747_v49 }
 0x860   : > { %v2426_v61 = vrot.slane %v2425_v60, 1  ;;  %2669 = vmatpush1.msra.mxu1 %v2617_v50 }
 0x861   : > { %2670 = vmatprep.subr.mxu1 %v4747_v49 }
 0x862   : > { %v2427_v15 = vadd.f32 %v2426_v61, %v2425_v60  ;;  %2671 = vmatpush1.msra.mxu1 %v2616_v51 }
 0x863   : > { %2672 = vmatprep.subr.mxu1 %v4747_v49 }
 0x864   : > { %v2428_v62 = vmul.f32 0.125, %v2427_v15  ;;  %2673 = vmatpush1.msra.mxu1 %v2615_v52 }
 0x865   : > { %2674 = vmatprep.subr.mxu1 %v4747_v49 }
 0x866   : > { %v2429_v63 = vadd.f32 1e-05, %v2428_v62 }
 0x868   : > { %4612 = vrsqrt.f32 %v2429_v63 }
 0x875   : > { %v4613_v3 = vpop.eup %4612 }
 0x876   : > { %v2431_v7 = vmul.f32 %v4613_v3, %v2419_v53  ;;  %v2614_v53 = vld [vmem:[%s6041_s1] sm:$0xff] }
 0x877   : > { %2675 = vmatpush1.msra.mxu1 %v2614_v53 }
 0x878   : > { %v5553_v9 = vadd.f32 %v2431_v7, %v2409_v6  ;;  %2700 = vmatprep.subr.mxu1 %v4747_v49  ;;  %v2630_v6 = vld [vmem:[%s6041_s1 + $0x80] sm:$0xff]  ;;  %s6045_s1 = sld [smem:[#allocation16_spill]] }
 0x879   : > { %2701 = vmatpush2.msra.mxu1 %v2633_v54 }
 0x87a   : > { %2593 = vst.msk [vmem:[#allocation3] sm:$0xff] %vm1256_vm8, %v5553_v9  ;;  %v2442_v24 = vrot.slane %v5553_v9, 2  ;;  %v2444_v12 = vrot.slane %v5553_v9, 6  ;;  %v2446_v13 = vrot.slane %v5553_v9, 4  ;;  %2702 = vmatprep.subr.mxu1 %v4747_v49 }
 0x87b   : > { %2703 = vmatpush2.msra.mxu1 %v2632_v0 }
 0x87c   : > { %v2448_v14 = vsel %vm1111_vm3, %v2442_v24, %v5553_v9  ;;  %v2450_v8 = vsel %vm1113_vm5, %v2444_v12, %v2446_v13  ;;  %2704 = vmatprep.subr.mxu1 %v4747_v49 }
 0x87d   : > { %v2449_v11 = vsel %vm1113_vm5, %v2448_v14, %v2444_v12  ;;  %v2451_v17 = vsel %vm1092_vm0, %v2450_v8, %v2442_v24  ;;  %2705 = vmatpush2.msra.mxu1 %v2631_v1 }
 0x87e   : > { %v2472_v18 = vrot.slane %v2449_v11, 4  ;;  %v2473_v10 = vrot.slane %v2451_v17, 4  ;;  %v2460_v19 = vrot.slane %v2449_v11, 2  ;;  %v2461_v20 = vrot.slane %v2451_v17, 2  ;;  %2706 = vmatprep.subr.mxu1 %v4747_v49 }
 0x87f   : > { %v2454_v21 = vrot.slane %v2449_v11, 1  ;;  %v2455_v23 = vrot.slane %v2451_v17, 1  ;;  %v2466_v27 = vrot.slane %v2449_v11, 3  ;;  %v2467_v28 = vrot.slane %v2451_v17, 3  ;;  %2707 = vmatpush2.msra.mxu1 %v2630_v6  ;;  %v2957_v6 = vld [vmem:[%s6048_s8 + $0x8] sm:$0xff] }
 0x880   : > { %v2474_v25 = vsel %vm1117_vm6, %v2472_v18, %v2473_v10  ;;  %v2462_v26 = vsel %vm1145_vm1, %v2460_v19, %v2461_v20  ;;  %4389 = vmatprep.subr.mxu1 %v4747_v49  ;;  %v2755_v19 = vld [vmem:[%s6044_s6 + $0x18] sm:$0xff]  ;;  %v2754_v20 = vld [vmem:[%s6044_s6 + $0x10] sm:$0xff] }
 0x881   : > { %4195 = vmatprep.mubr.msk.f32.mxu0 %vm1256_vm8, %v2474_v25  ;;  %2463 = vrot.lane.b32.xlu1 %v2462_v26, %s6038_s11  ;;  %v2456_v22 = vsel %vm1123_vm2, %v2454_v21, %v2455_v23  ;;  %v2468_v30 = vsel %vm1119_vm4, %v2466_v27, %v2467_v28  ;;  %v2753_v21 = vld [vmem:[%s6044_s6 + $0x8] sm:$0xff]  ;;  %v2752_v23 = vld [vmem:[%s6044_s6] sm:$0xff]  ;;  %s6047_s6 = sld [smem:[#allocation18_spill]] }
 0x882   : > { %2457 = vrot.lane.b32.xlu0 %v2456_v22, %s6037_s9  ;;  %v4196_v25 = vld [vmem:[%s6045_s1] ss:$0 sm:$0xff]  ;;  %s6046_s1 = sld [smem:[#allocation19_spill]]  ;;  %v2717_v51 = vld [vmem:[#allocation3] ss:$2 sm:$0xf] }
 0x883   : > { %v2718_v52 = vld [vmem:[#allocation3 + $0x1] ss:$2 sm:$0xf] }
 0x884   : > { %v2719_v53 = vadd.f32 %v2718_v52, %v2717_v51 }
 0x886   : > { %2469 = vrot.lane.b32.xlu0 %v2468_v30, %s6042_s3 }
 0x8f3   : > { %v2464_v32 = vpop.permute.xlu1 %2463 }
 0x8f4   : > { %v2458_v31 = vpop.permute.xlu0 %2457 }
 0x8f5   : > { %v2475_v33 = vsel %vm1256_vm8, %v2449_v11, %v2458_v31 }
 0x8f6   : > { %v2476_v34 = vsel %vm1266_vm10, %v2475_v33, %v2464_v32 }
 0x8f8   : > { %v2470_v35 = vpop.permute.xlu0 %2469 }
 0x8f9   : > { %v2477_v36 = vsel %vm1276_vm12, %v2476_v34, %v2470_v35 }
 0x8fa   : > { %2572 = vmatmul.mubr.f32.vlgmr.msra.gmra.mxu0 %v2477_v36 }
 0x9ba   : > { %v2573_v56 = vpop.f32.mrf.mxu0 }
 0x9bb   : > { %v2574_v57 = vadd.f32 %v4194_v55, %v2573_v56  ;;  %v2720_v55 = vmul.f32 0.5, %v2719_v53 }
 0x9bc   : > { %v2575_v59 = vpop.f32.mrf.mxu0 }
 0x9bd   : > { %vm2577_vm1 = vcmp.ge.f32.partialorder %v2574_v57, 0.0  ;;  %v2578_v60 = vmul.f32 0.2, %v2574_v57  ;;  %v2842_v59 = vld [vmem:[%s6046_s1 + $0x18] sm:$0xff] }
 0x9bf   : > { %v2579_v61 = vsel %vm2577_vm1, %v2574_v57, %v2578_v60  ;;  %v2841_v60 = vld [vmem:[%s6046_s1 + $0x10] sm:$0xff]  ;;  %vm3569_vm1 = vcmask 255105  }
 0x9c0   : > { %v2581_v15 = vrot.slane %v2579_v61, 2  ;;  %v2583_v62 = vrot.slane %v2579_v61, 6  ;;  %v2585_v63 = vrot.slane %v2579_v61, 4 }
 0x9c2   : > { %v2587_v2 = vsel %vm1111_vm3, %v2581_v15, %v2579_v61  ;;  %v2589_v3 = vsel %vm1113_vm5, %v2583_v62, %v2585_v63  ;;  %v2840_v61 = vld [vmem:[%s6046_s1 + $0x8] sm:$0xff] }
 0x9c3   : > { %v2588_v4 = vsel %vm1113_vm5, %v2587_v2, %v2583_v62  ;;  %v2590_v5 = vsel %vm1092_vm0, %v2589_v3, %v2581_v15  ;;  %vm4748_vm0 = vmmov 0   ;;  %v2839_v15 = vld [vmem:[%s6046_s1] sm:$0xff]  ;;  %s6050_s1 = sld [smem:[#allocation20_spill]] }
 0x9c4   : > { %2591 = vst.msk [vmem:[#allocation2] sm:$0xff] %vm1256_vm8, %v2588_v4  ;;  %4419 = vmatprep.mubr.msk.f32.mxu0 %vm4748_vm0, %v4747_v49  ;;  %v4198_v62 = vld [vmem:[%s6047_s6] ss:$0 sm:$0xff]  ;;  %v2959_v4 = vld [vmem:[%s6048_s8 + $0x18] sm:$0xff]  ;;  %s6051_s6 = sld [smem:[#allocation22_spill]] }
 0x9c5   : > { %2592 = vst.msk [vmem:[#allocation2 + $0x8] sm:$0xf] %vm1863_vm14, %v2590_v5  ;;  %4412 = vmatpush3.msra.mxu0 %v2959_v4  ;;  %v2958_v5 = vld [vmem:[%s6048_s8 + $0x10] sm:$0xff] }
 0x9c6   : > { %4413 = vmatprep.subr.mxu0 %v4747_v49 }
 0x9c7   : > { %4414 = vmatpush3.msra.mxu0 %v2958_v5 }
 0x9c8   : > { %4415 = vmatprep.subr.mxu0 %v4747_v49 }
 0x9c9   : > { %4416 = vmatpush3.msra.mxu0 %v2957_v6 }
 0x9ca   : > { %4417 = vmatprep.subr.mxu0 %v4747_v49 }
 0x9cb   : > { %v2595_v24 = vld [vmem:[#allocation2 + $0x1] ss:$2 sm:$0xf]  ;;  %v2594_v14 = vld [vmem:[#allocation2] ss:$2 sm:$0xf] }
 0x9cc   : > { %v2598_v7 = vld [vmem:[#allocation2 + $0x4] ss:$2 sm:$0xf]  ;;  %2600 = vrot.lane.b32.xlu1 %v2595_v24, %s6037_s9  ;;  %v2597_v12 = vld [vmem:[#allocation2 + $0x3] ss:$2 sm:$0xf] }
 0x9cd   : > { %v2596_v16 = vld [vmem:[#allocation2 + $0x2] ss:$2 sm:$0xf]  ;;  %4197 = vmatprep.mubr.msk.f32.mxu1 %vm1256_vm8, %v2598_v7  ;;  %v3046_v7 = vld [vmem:[%s6049_s13 + $0x18] sm:$0xff]  ;;  %v4200_v24 = vld [vmem:[%s6050_s1] ss:$0 sm:$0xff] }
 0x9ce   : > { %2604 = vrot.lane.b32.xlu0 %v2596_v16, %s6038_s11  ;;  %v2956_v16 = vld [vmem:[%s6048_s8] sm:$0xff]  ;;  %s6052_s1 = sld [smem:[#allocation25_spill]] }
 0x9cf   : > { %4418 = vmatpush3.msra.mxu0 %v2956_v16  ;;  %s6053_s8 = sld [smem:[#allocation29_spill]] }
 0x9d0   : > { %2608 = vrot.lane.b32.xlu1 %v2597_v12, %s6042_s3  ;;  %4433 = vmatprep.subr.mxu0 %v4747_v49 }
 0x9d4   : > { %v3162_v52 = vld [vmem:[%s6052_s1 + $0x10] sm:$0xff] }
 0x9d5   : > { %v3247_v51 = vld [vmem:[%s6053_s8 + $0x18] sm:$0xff]  ;;  %v3246_v53 = vld [vmem:[%s6053_s8 + $0x10] sm:$0xff] }
 0xa3e   : > { %v2601_v13 = vpop.permute.xlu1 %2600 }
 0xa3f   : > { %v2611_v11 = vsel %vm1256_vm8, %v2594_v14, %v2601_v13 }
 0xa40   : > { %v2605_v8 = vpop.permute.xlu0 %2604 }
 0xa41   : > { %v2612_v18 = vsel %vm1266_vm10, %v2611_v11, %v2605_v8 }
 0xa42   : > { %v2609_v17 = vpop.permute.xlu1 %2608 }
 0xa43   : > { %v2613_v10 = vsel %vm1276_vm12, %v2612_v18, %v2609_v17 }
 0xa44   : > { %2709 = vmatmul.mubr.f32.vlgmr.msra.gmra.mxu1 %v2613_v10 }
 0xa45   : > { %4390 = vmatpush3.msra.mxu1 %v2755_v19  ;;  %4397 = vmatprep.mubr.msk.f32.mxu1 %vm4748_vm0, %v4747_v49 }
 0xa46   : > { %4391 = vmatprep.subr.mxu1 %v4747_v49 }
 0xa47   : > { %4392 = vmatpush3.msra.mxu1 %v2754_v20 }
 0xa48   : > { %4393 = vmatprep.subr.mxu1 %v4747_v49 }
 0xa49   : > { %4394 = vmatpush3.msra.mxu1 %v2753_v21 }
 0xa4a   : > { %4395 = vmatprep.subr.mxu1 %v4747_v49 }
 0xa4b   : > { %4396 = vmatpush3.msra.mxu1 %v2752_v23 }
 0xa4c   : > { %4400 = vmatprep.subr.mxu1 %v4747_v49 }
 0xb04   : > { %v2710_v26 = vpop.f32.mrf.mxu1 }
 0xb05   : > { %v2711_v22 = vadd.f32 %v4196_v25, %v2710_v26 }
 0xb06   : > { %v2712_v27 = vpop.f32.mrf.mxu1 }
 0xb07   : > { %vm2714_vm2 = vcmp.ge.f32.partialorder %v2711_v22, 0.0  ;;  %v2715_v28 = vmul.f32 0.2, %v2711_v22 }
 0xb09   : > { %v2716_v30 = vsel %vm2714_vm2, %v2711_v22, %v2715_v28  ;;  %vm3696_vm2 = vcmask 256130  }
 0xb0a   : > { %v2721_v31 = vsel %vm1863_vm14, %v2716_v30, 0.0 }
 0xb0b   : > { %v2722_v32 = vrot.slane %v2721_v31, 4 }
 0xb0d   : > { %v2723_v33 = vadd.f32 %v2722_v32, %v2721_v31 }
 0xb0f   : > { %v2724_v34 = vrot.slane %v2723_v33, 2 }
 0xb11   : > { %v2725_v35 = vadd.f32 %v2724_v34, %v2723_v33 }
 0xb13   : > { %v2726_v36 = vrot.slane %v2725_v35, 1 }
 0xb15   : > { %v2727_v37 = vadd.f32 %v2726_v36, %v2725_v35 }
 0xb17   : > { %v2729_v38 = vmul.f32 0.25, %v2727_v37 }
 0xb19   : > { %v2730_v39 = vsub.f32 %v2716_v30, %v2729_v38 }
 0xb1b   : > { %v2731_v40 = vmul.f32 %v2730_v39, %v2730_v39 }
 0xb1d   : > { %v2732_v41 = vsel %vm1863_vm14, %v2731_v40, 0.0  ;;  %v3045_v40 = vld [vmem:[%s6049_s13 + $0x10] sm:$0xff] }
 0xb1e   : > { %v2733_v42 = vrot.slane %v2732_v41, 4 }
 0xb20   : > { %v2734_v43 = vadd.f32 %v2733_v42, %v2732_v41  ;;  %v3044_v41 = vld [vmem:[%s6049_s13 + $0x8] sm:$0xff]  ;;  %v3043_v42 = vld [vmem:[%s6049_s13] sm:$0xff] }
 0xb22   : > { %v2735_v44 = vrot.slane %v2734_v43, 2 }
 0xb24   : > { %v2736_v45 = vadd.f32 %v2735_v44, %v2734_v43  ;;  %v4202_v43 = vld [vmem:[%s6051_s6] ss:$0 sm:$0xff]  ;;  %s6054_s6 = sld [smem:[#allocation24_spill]] }
 0xb26   : > { %v2737_v47 = vrot.slane %v2736_v45, 1 }
 0xb28   : > { %v2738_v48 = vadd.f32 %v2737_v47, %v2736_v45 }
 0xb2a   : > { %v2739_v29 = vmul.f32 0.25, %v2738_v48 }
 0xb2c   : > { %v2740_v50 = vadd.f32 1e-05, %v2739_v29 }
 0xb2e   : > { %4614 = vrsqrt.f32 %v2740_v50  ;;  %v3163_v50 = vld [vmem:[%s6052_s1 + $0x18] sm:$0xff] }
 0xb3b   : > { %v4615_v54 = vpop.eup %4614 }
 0xb3c   : > { %v2742_v56 = vmul.f32 %v4615_v54, %v2730_v39  ;;  %v3161_v54 = vld [vmem:[%s6052_s1 + $0x8] sm:$0xff] }
 0xb3e   : > { %v5648_v57 = vadd.f32 %v2742_v56, %v2720_v55  ;;  %v3245_v55 = vld [vmem:[%s6053_s8 + $0x8] sm:$0xff]  ;;  %v3160_v56 = vld [vmem:[%s6052_s1] sm:$0xff]  ;;  %s6055_s1 = sld [smem:[#allocation27_spill]] }
 0xb40   : > { %4398 = vmatmul.mubr.msk.f32.vlgmr.msra.gmra.mxu1 %vm1256_vm8, %v5648_v57 }
 0xb41   : > { %4401 = vmatpush3.msra.mxu1 %v2842_v59  ;;  %4408 = vmatprep.mubr.msk.f32.mxu1 %vm4748_vm0, %v4747_v49  ;;  %v3244_v59 = vld [vmem:[%s6053_s8] sm:$0xff] }
 0xb42   : > { %4402 = vmatprep.subr.mxu1 %v4747_v49 }
 0xb43   : > { %4403 = vmatpush3.msra.mxu1 %v2841_v60  ;;  %v4204_v60 = vld [vmem:[%s6054_s6] ss:$0 sm:$0xff]  ;;  %s6056_s6 = sld [smem:[#allocation28_spill]] }
 0xb44   : > { %4404 = vmatprep.subr.mxu1 %v4747_v49 }
 0xb45   : > { %4405 = vmatpush3.msra.mxu1 %v2840_v61 }
 0xb46   : > { %4406 = vmatprep.subr.mxu1 %v4747_v49 }
 0xb47   : > { %4407 = vmatpush3.msra.mxu1 %v2839_v15 }
 0xb48   : > { %4422 = vmatprep.subr.mxu1 %v4747_v49 }
 0xc00   : > { %v2832_v63 = vpop.f32.mrf.mxu1 }
 0xc01   : > { %v2833_v0 = vadd.f32 %v4198_v62, %v2832_v63 }
 0xc02   : > { %v4399_v1 = vpop.f32.mrf.mxu1 }
 0xc03   : > { %vm2836_vm3 = vcmp.ge.f32.partialorder %v2833_v0, 0.0  ;;  %v2837_v2 = vmul.f32 0.2, %v2833_v0 }
 0xc05   : > { %v2838_v3 = vsel %vm2836_vm3, %v2833_v0, %v2837_v2 }
 0xc06   : > { %4409 = vmatmul.mubr.msk.f32.vlgmr.msra.gmra.mxu1 %vm1256_vm8, %v2838_v3 }
 0xc07   : > { %4430 = vmatprep.mubr.msk.f32.mxu1 %vm4748_vm0, %v4747_v49  ;;  %4423 = vmatpush3.msra.mxu1 %v3046_v7 }
 0xc08   : > { %4424 = vmatprep.subr.mxu1 %v4747_v49 }
 0xc09   : > { %4425 = vmatpush3.msra.mxu1 %v3045_v40 }
 0xc0a   : > { %4426 = vmatprep.subr.mxu1 %v4747_v49 }
 0xc0b   : > { %4427 = vmatpush3.msra.mxu1 %v3044_v41 }
 0xc0c   : > { %4428 = vmatprep.subr.mxu1 %v4747_v49 }
 0xc0d   : > { %4429 = vmatpush3.msra.mxu1 %v3043_v42 }
 0xc0e   : > { %4444 = vmatprep.subr.mxu1 %v4747_v49 }
 0xcc6   : > { %v2919_v12 = vpop.f32.mrf.mxu1 }
 0xcc7   : > { %v2920_v13 = vadd.f32 %v4200_v24, %v2919_v12 }
 0xcc8   : > { %v4410_v14 = vpop.f32.mrf.mxu1 }
 0xcc9   : > { %vm2923_vm4 = vcmp.ge.f32.partialorder %v2920_v13, 0.0  ;;  %v2924_v8 = vmul.f32 0.2, %v2920_v13 }
 0xccb   : > { %v2925_v11 = vsel %vm2923_vm4, %v2920_v13, %v2924_v8 }
 0xccc   : > { %v2926_v17 = vsel %vm1863_vm14, %v2925_v11, 0.0 }
 0xccd   : > { %v2927_v18 = vrot.slane %v2926_v17, 4 }
 0xccf   : > { %v2928_v10 = vadd.f32 %v2927_v18, %v2926_v17 }
 0xcd1   : > { %v2929_v19 = vrot.slane %v2928_v10, 2 }
 0xcd3   : > { %v2930_v20 = vadd.f32 %v2929_v19, %v2928_v10 }
 0xcd5   : > { %v2931_v21 = vrot.slane %v2930_v20, 1 }
 0xcd7   : > { %v2932_v23 = vadd.f32 %v2931_v21, %v2930_v20 }
 0xcd9   : > { %v2933_v25 = vmul.f32 0.25, %v2932_v23 }
 0xcdb   : > { %v2934_v26 = vsub.f32 %v2925_v11, %v2933_v25 }
 0xcdd   : > { %v2935_v22 = vmul.f32 %v2934_v26, %v2934_v26 }
 0xcdf   : > { %v2936_v27 = vsel %vm1863_vm14, %v2935_v22, 0.0  ;;  %v5726_v22 = vld [vmem:[%s6055_s1 + $0x10] sm:$0xff] }
 0xce0   : > { %v2937_v28 = vrot.slane %v2936_v27, 4 }
 0xce2   : > { %v2938_v30 = vadd.f32 %v2937_v28, %v2936_v27  ;;  %v5733_v27 = vld [vmem:[%s6055_s1 + $0x8] sm:$0xff]  ;;  %v5740_v28 = vld [vmem:[%s6055_s1] sm:$0xff] }
 0xce4   : > { %v2939_v31 = vrot.slane %v2938_v30, 2 }
 0xce6   : > { %v2940_v32 = vadd.f32 %v2939_v31, %v2938_v30 }
 0xce8   : > { %v2941_v33 = vrot.slane %v2940_v32, 1 }
 0xcea   : > { %v2942_v34 = vadd.f32 %v2941_v33, %v2940_v32 }
 0xcec   : > { %v2943_v35 = vmul.f32 0.25, %v2942_v34  ;;  %v5768_v34 = vld [vmem:[%s6056_s6] sm:$0x1] }
 0xcee   : > { %v2944_v36 = vadd.f32 1e-05, %v2943_v35 }
 0xcf0   : > { %4616 = vrsqrt.f32 %v2944_v36 }
 0xcfd   : > { %v4617_v37 = vpop.eup %4616 }
 0xcfe   : > { %v2946_v38 = vmul.f32 %v4617_v37, %v2934_v26  ;;  %v5719_v26 = vld [vmem:[%s6055_s1 + $0x18] sm:$0xff]  ;;  %s6057_s1 = sld [smem:[#allocation26_spill]] }
 0xd00   : > { %v5680_v39 = vadd.f32 %v2946_v38, %v5648_v57 }
 0xd02   : > { %4420 = vmatmul.mubr.msk.f32.vlgmr.msra.gmra.mxu0 %vm1256_vm8, %v5680_v39 }
 0xd03   : > { %4441 = vmatprep.mubr.msk.f32.mxu0 %vm4748_vm0, %v4747_v49  ;;  %4434 = vmatpush3.msra.mxu0 %v3163_v50 }
 0xd04   : > { %4435 = vmatprep.subr.mxu0 %v4747_v49  ;;  %v4206_v38 = vld [vmem:[%s6057_s1] ss:$0 sm:$0xff]  ;;  %s4749_s1 = smov 112  }
 0xd05   : > { %4436 = vmatpush3.msra.mxu0 %v3162_v52 }
 0xd06   : > { %4437 = vmatprep.subr.mxu0 %v4747_v49 }
 0xd07   : > { %4438 = vmatpush3.msra.mxu0 %v3161_v54 }
 0xd08   : > { %4439 = vmatprep.subr.mxu0 %v4747_v49 }
 0xd09   : > { %4440 = vmatpush3.msra.mxu0 %v3160_v56 }
 0xd0a   : > { %4455 = vmatprep.subr.mxu0 %v4747_v49 }
 0xdc2   : > { %v3036_v44 = vpop.f32.mrf.mxu0 }
 0xdc3   : > { %v3037_v45 = vadd.f32 %v4202_v43, %v3036_v44 }
 0xdc4   : > { %v4421_v47 = vpop.f32.mrf.mxu0 }
 0xdc5   : > { %vm3040_vm5 = vcmp.ge.f32.partialorder %v3037_v45, 0.0  ;;  %v3041_v48 = vmul.f32 0.2, %v3037_v45 }
 0xdc7   : > { %v3042_v29 = vsel %vm3040_vm5, %v3037_v45, %v3041_v48 }
 0xdc8   : > { %4431 = vmatmul.mubr.msk.f32.vlgmr.msra.gmra.mxu1 %vm1256_vm8, %v3042_v29 }
 0xdc9   : > { %4452 = vmatprep.mubr.msk.f32.mxu1 %vm4748_vm0, %v4747_v49  ;;  %4445 = vmatpush3.msra.mxu1 %v3247_v51 }
 0xdca   : > { %4446 = vmatprep.subr.mxu1 %v4747_v49 }
 0xdcb   : > { %4447 = vmatpush3.msra.mxu1 %v3246_v53 }
 0xdcc   : > { %4448 = vmatprep.subr.mxu1 %v4747_v49 }
 0xdcd   : > { %4449 = vmatpush3.msra.mxu1 %v3245_v55 }
 0xdce   : > { %4450 = vmatprep.subr.mxu1 %v4747_v49 }
 0xdcf   : > { %4451 = vmatpush3.msra.mxu1 %v3244_v59 }
 0xdd0   : > { %4466 = vmatprep.subr.mxu1 %v4747_v49 }
 0xe88   : > { %v3123_v61 = vpop.f32.mrf.mxu1 }
 0xe89   : > { %v3124_v15 = vadd.f32 %v4204_v60, %v3123_v61 }
 0xe8a   : > { %v4432_v62 = vpop.f32.mrf.mxu1 }
 0xe8b   : > { %vm3127_vm6 = vcmp.ge.f32.partialorder %v3124_v15, 0.0  ;;  %v3128_v63 = vmul.f32 0.2, %v3124_v15 }
 0xe8d   : > { %v3129_v0 = vsel %vm3127_vm6, %v3124_v15, %v3128_v63 }
 0xe8e   : > { %v3130_v1 = vsel %vm1863_vm14, %v3129_v0, 0.0 }
 0xe8f   : > { %v3131_v2 = vrot.slane %v3130_v1, 4 }
 0xe91   : > { %v3132_v3 = vadd.f32 %v3131_v2, %v3130_v1 }
 0xe93   : > { %v3133_v4 = vrot.slane %v3132_v3, 2 }
 0xe95   : > { %v3134_v5 = vadd.f32 %v3133_v4, %v3132_v3 }
 0xe97   : > { %v3135_v6 = vrot.slane %v3134_v5, 1 }
 0xe99   : > { %v3136_v7 = vadd.f32 %v3135_v6, %v3134_v5 }
 0xe9b   : > { %v3137_v16 = vmul.f32 0.25, %v3136_v7 }
 0xe9d   : > { %v3138_v24 = vsub.f32 %v3129_v0, %v3137_v16 }
 0xe9f   : > { %v3139_v12 = vmul.f32 %v3138_v24, %v3138_v24 }
 0xea1   : > { %v3140_v13 = vsel %vm1863_vm14, %v3139_v12, 0.0 }
 0xea2   : > { %v3141_v14 = vrot.slane %v3140_v13, 4 }
 0xea4   : > { %v3142_v8 = vadd.f32 %v3141_v14, %v3140_v13 }
 0xea6   : > { %v3143_v11 = vrot.slane %v3142_v8, 2 }
 0xea8   : > { %v3144_v17 = vadd.f32 %v3143_v11, %v3142_v8 }
 0xeaa   : > { %v3145_v18 = vrot.slane %v3144_v17, 1 }
 0xeac   : > { %v3146_v10 = vadd.f32 %v3145_v18, %v3144_v17 }
 0xeae   : > { %v3147_v19 = vmul.f32 0.25, %v3146_v10 }
 0xeb0   : > { %v3148_v20 = vadd.f32 1e-05, %v3147_v19 }
 0xeb2   : > { %4618 = vrsqrt.f32 %v3148_v20 }
 0xebf   : > { %v4619_v21 = vpop.eup %4618 }
 0xec0   : > { %v3150_v23 = vmul.f32 %v4619_v21, %v3138_v24 }
 0xec2   : > { %v5716_v25 = vadd.f32 %v3150_v23, %v5680_v39 }
 0xec4   : > { %4442 = vmatmul.mubr.msk.f32.vlgmr.msra.gmra.mxu0 %vm1256_vm8, %v5716_v25  ;;  %4453 = vmatmul.mubr.msk.f32.vlgmr.msra.gmra.mxu1 %vm1256_vm8, %v5716_v25 }
 0xec5   : > { %4456 = vmatpush3.msra.mxu0 %v5719_v26  ;;  %4463 = vmatprep.mubr.msk.f32.mxu0 %vm4748_vm0, %v4747_v49 }
 0xec6   : > { %4457 = vmatprep.subr.mxu0 %v4747_v49  ;;  %4467 = vmatpush3.msra.mxu1 %v5719_v26 }
 0xec7   : > { %4458 = vmatpush3.msra.mxu0 %v5726_v22  ;;  %4468 = vmatprep.subr.mxu1 %v4747_v49 }
 0xec8   : > { %4459 = vmatprep.subr.mxu0 %v4747_v49  ;;  %4469 = vmatpush3.msra.mxu1 %v5726_v22 }
 0xec9   : > { %4460 = vmatpush3.msra.mxu0 %v5733_v27  ;;  %4470 = vmatprep.subr.mxu1 %v4747_v49 }
 0xeca   : > { %4461 = vmatprep.subr.mxu0 %v4747_v49  ;;  %4471 = vmatpush3.msra.mxu1 %v5733_v27 }
 0xecb   : > { %4462 = vmatpush3.msra.mxu0 %v5740_v28  ;;  %4472 = vmatprep.subr.mxu1 %v4747_v49 }
 0xecc   : > { %4464 = vmatmul.mubr.f32.vlgmr.msra.gmra.mxu0 %v4747_v49  ;;  %4473 = vmatpush3.msra.mxu1 %v5740_v28 }
 0xecd   : > { %4474 = vmatprep.mubr.msk.f32.mxu1 %vm4748_vm0, %v4747_v49  ;;  %4477 = vmatprep.subr.mxu0 %v4747_v49 }
 0xece   : > { %4478 = vmatpush3.msra.mxu0 %v5719_v26  ;;  %4485 = vmatprep.mubr.msk.f32.mxu0 %vm4748_vm0, %v4747_v49 }
 0xecf   : > { %4479 = vmatprep.subr.mxu0 %v4747_v49  ;;  %4488 = vmatprep.subr.mxu1 %v4747_v49 }
 0xed0   : > { %4480 = vmatpush3.msra.mxu0 %v5726_v22 }
 0xed1   : > { %4481 = vmatprep.subr.mxu0 %v4747_v49 }
 0xed2   : > { %4482 = vmatpush3.msra.mxu0 %v5733_v27 }
 0xed3   : > { %4483 = vmatprep.subr.mxu0 %v4747_v49 }
 0xed4   : > { %4484 = vmatpush3.msra.mxu0 %v5740_v28 }
 0xed5   : > { %4499 = vmatprep.subr.mxu0 %v4747_v49 }
 0xf84   : > { %v3240_v30 = vpop.f32.mrf.mxu0  ;;  %v5765_v31 = vpop.f32.mrf.mxu1 }
 0xf85   : > { %v5773_v40 = vadd.f32 %v4206_v38, %v3240_v30 }
 0xf86   : > { %v4443_v32 = vpop.f32.mrf.mxu0  ;;  %v4454_v33 = vpop.f32.mrf.mxu1 }
 0xf87   : > { %v3331_v41 = vrot.slane %v5773_v40, 3  ;;  %v3445_v3 = vrot.slane %v5773_v40, 1 }
 0xf89   : > { %v3333_v42 = vsel %vm1261_vm9, %v5773_v40, %v3331_v41  ;;  %v3447_v4 = vsel %vm1261_vm9, %v5773_v40, %v3445_v3  ;;  %v3571_v41 = vrot.slane %v5773_v40, 7 }
 0xf8c   : > { %v3403_v35 = vpop.f32.mrf.mxu0 }
 0xf8d   : > { %v3404_v36 = vadd.f32 %v3403_v35, %v5768_v34 }
 0xf8e   : > { %v4465_v37 = vpop.f32.mrf.mxu0 }
 0xf8f   : > { %3415 = vrot.lane.b32.xlu0 %v3404_v36, %s6042_s3  ;;  %v3407_v43 = vadd.f32 %v3404_v36, %v3333_v42 }
 0xf91   : > { %v4210_v44 = vmul.f32 -1.442695, %v3407_v43 }
 0xf93   : > { %4620 = vpow2.f32 %v4210_v44 }
 0xfa0   : > { %v4621_v45 = vpop.eup %4620 }
 0xfa1   : > { %v3411_v47 = vadd.f32 1.0, %v4621_v45 }
 0xfa3   : > { %4622 = vrcp.f32 %v3411_v47 }
 0xfb0   : > { %v4623_v48 = vpop.eup %4622 }
 0xfb1   : > { %v3425_v54 = vsub.f32 1.0, %v4623_v48  ;;  %v3431_v56 = vmul.f32 0.0, %v4623_v48 }
0x1001   : > { %v3416_v29 = vpop.permute.xlu0 %3415 }
0x1002   : > { %v3418_v50 = vmul.f32 %v4623_v48, %v3416_v29 }
0x1004   : > { %3420 = vrot.lane.b32.xlu1 %v3418_v50, %s6037_s9 }
0x1076   : > { %v3421_v51 = vpop.permute.xlu1 %3420 }
0x1077   : > { %v3423_v52 = vadd.f32 %v3421_v51, %v3333_v42  ;;  %v3573_v42 = vsel %vm1261_vm9, %v5773_v40, %v3571_v41  ;;  %v3933_v41 = vld [vmem:[%s4919_s27 + $0x10] sm:$0xff] }
0x1079   : > { %4624 = vtanh.f32 %v3423_v52 }
0x1086   : > { %v4625_v53 = vpop.eup %4624 }
0x1087   : > { %3427 = vrot.lane.b32.xlu0 %v4625_v53, %s4749_s1 }
0x10f9   : > { %v3428_v55 = vpop.permute.xlu0 %3427 }
0x10fa   : > { %v3430_v59 = vmul.f32 %v3428_v55, %v3425_v54 }
0x10fc   : > { %v3432_v60 = vadd.f32 %v3431_v56, %v3430_v59 }
0x10fe   : > { %3437 = vrot.lane.b32.xlu0 %v3432_v60, %s6035_s5  ;;  %3434 = vrot.lane.b32.xlu1 %v3432_v60, %s4749_s1 }
0x1170   : > { %v3438_v61 = vpop.permute.xlu0 %3437  ;;  %v3435_v15 = vpop.permute.xlu1 %3434 }
0x1171   : > { %3444 = vst.msk [vmem:[#allocation4 + $0x3] sm:$0x1] %vm3443_vm13, %v3438_v61  ;;  %v3440_v62 = vsel %vm1251_vm7, %v3435_v15, %v3438_v61 }
0x1172   : > { %3442 = vst.msk [vmem:[#allocation4] sm:$0x1] %vm3441_vm15, %v3435_v15  ;;  %4475 = vmatmul.mubr.msk.f32.vlgmr.msra.gmra.mxu1 %vm1256_vm8, %v3440_v62  ;;  %v3547_v14 = vrot.slane %v3440_v62, 7 }
0x1173   : > { %4489 = vmatpush3.msra.mxu1 %v5719_v26  ;;  %4496 = vmatprep.mubr.msk.f32.mxu1 %vm4748_vm0, %v4747_v49 }
0x1174   : > { %4490 = vmatprep.subr.mxu1 %v4747_v49 }
0x1175   : > { %4491 = vmatpush3.msra.mxu1 %v5726_v22 }
0x1176   : > { %4492 = vmatprep.subr.mxu1 %v4747_v49 }
0x1177   : > { %4493 = vmatpush3.msra.mxu1 %v5733_v27 }
0x1178   : > { %4494 = vmatprep.subr.mxu1 %v4747_v49 }
0x1179   : > { %4495 = vmatpush3.msra.mxu1 %v5740_v28 }
0x117a   : > { %3963 = vmatprep.subr.mxu1 %v4747_v49 }
0x1232   : > { %v3517_v63 = vpop.f32.mrf.mxu1 }
0x1233   : > { %v3518_v0 = vadd.f32 %v3517_v63, %v5768_v34 }
0x1234   : > { %v4476_v1 = vpop.f32.mrf.mxu1 }
0x1235   : > { %v3522_v2 = vrot.slane %v3518_v0, 7 }
0x1237   : > { %3531 = vrot.lane.b32.xlu1 %v3522_v2, %s6042_s3  ;;  %v3524_v5 = vadd.f32 %v3522_v2, %v3447_v4 }
0x1239   : > { %v4212_v6 = vmul.f32 -1.442695, %v3524_v5 }
0x123b   : > { %4626 = vpow2.f32 %v4212_v6 }
0x1248   : > { %v4627_v7 = vpop.eup %4626 }
0x1249   : > { %v3528_v16 = vadd.f32 1.0, %v4627_v7 }
0x124b   : > { %4628 = vrcp.f32 %v3528_v16 }
0x1258   : > { %v4629_v24 = vpop.eup %4628 }
0x1259   : > { %v3541_v10 = vsub.f32 1.0, %v4629_v24 }
0x12a9   : > { %v3532_v12 = vpop.permute.xlu1 %3531 }
0x12aa   : > { %v3534_v13 = vmul.f32 %v4629_v24, %v3532_v12 }
0x12ac   : > { %3536 = vrot.lane.b32.xlu0 %v3534_v13, %s6037_s9 }
0x12b0   : > { %3548 = vrot.lane.b32.xlu0 %v3547_v14, %s6034_s7 }
0x131e   : > { %v3537_v8 = vpop.permute.xlu0 %3536 }
0x131f   : > { %v3539_v11 = vadd.f32 %v3537_v8, %v3447_v4 }
0x1321   : > { %4630 = vtanh.f32 %v3539_v11 }
0x1322   : > { %v3549_v18 = vpop.permute.xlu0 %3548 }
0x1323   : > { %v3551_v20 = vmul.f32 %v4629_v24, %v3549_v18 }
0x132e   : > { %v4631_v17 = vpop.eup %4630 }
0x132f   : > { %3543 = vrot.lane.b32.xlu1 %v4631_v17, %s4749_s1 }
0x1333   : > { %3553 = vrot.lane.b32.xlu1 %v3547_v14, %s6036_s10 }
0x13a1   : > { %v3544_v19 = vpop.permute.xlu1 %3543 }
0x13a2   : > { %v3546_v21 = vmul.f32 %v3544_v19, %v3541_v10 }
0x13a4   : > { %v3552_v23 = vadd.f32 %v3551_v20, %v3546_v21 }
0x13a5   : > { %v3554_v26 = vpop.permute.xlu1 %3553 }
0x13a6   : > { %v3556_v22 = vmul.f32 %v4629_v24, %v3554_v26  ;;  %3559 = vrot.lane.b32.xlu0 %v3552_v23, %s4749_s1  ;;  %v3698_v24 = vrot.slane %v5773_v40, 5  ;;  %v3945_v23 = vld [vmem:[%s4919_s27 + $0x70] sm:$0xff]  ;;  %v3944_v26 = vld [vmem:[%s4919_s27 + $0x68] sm:$0xff] }
0x13a8   : > { %v3557_v27 = vadd.f32 %v3556_v22, %v3546_v21  ;;  %v3700_v12 = vsel %vm1261_vm9, %v5773_v40, %v3698_v24  ;;  %v3946_v21 = vld [vmem:[%s4919_s27 + $0x78] sm:$0xff]  ;;  %v3943_v22 = vld [vmem:[%s4919_s27 + $0x60] sm:$0xff]  ;;  %vm3822_vm9 = vcmask 257155  }
0x13aa   : > { %3563 = vrot.lane.b32.xlu1 %v3557_v27, %s6035_s5  ;;  %v3942_v27 = vld [vmem:[%s4919_s27 + $0x58] sm:$0xff] }
0x1418   : > { %v3560_v28 = vpop.permute.xlu0 %3559 }
0x1419   : > { %3568 = vst.msk [vmem:[#allocation4] sm:$0x2] %vm3567_vm11, %v3560_v28 }
0x141c   : > { %v3564_v30 = vpop.permute.xlu1 %3563 }
0x141d   : > { %v3566_v32 = vsel %vm1251_vm7, %v3560_v28, %v3564_v30  ;;  %3570 = vst.msk [vmem:[#allocation4 + $0x1] sm:$0x2] %vm3569_vm1, %v3564_v30  ;;  %v3941_v28 = vld [vmem:[%s4919_s27 + $0x50] sm:$0xff]  ;;  %v3940_v30 = vld [vmem:[%s4919_s27 + $0x48] sm:$0xff] }
0x141e   : > { %v3575_v33 = vrot.slane %v3566_v32, 1  ;;  %v3674_v51 = vrot.slane %v3566_v32, 7  ;;  %v3939_v32 = vld [vmem:[%s4919_s27 + $0x40] sm:$0xff] }
0x1420   : > { %4486 = vmatmul.mubr.msk.f32.vlgmr.msra.gmra.mxu0 %vm1256_vm8, %v3575_v33  ;;  %v3938_v33 = vld [vmem:[%s4919_s27 + $0x38] sm:$0xff] }
0x1421   : > { %4507 = vmatprep.mubr.msk.f32.mxu0 %vm4748_vm0, %v4747_v49  ;;  %vm3694_vm0 = vcmask 124930  }
0x14e0   : > { %v3644_v35 = vpop.f32.mrf.mxu0 }
0x14e1   : > { %v3645_v36 = vadd.f32 %v3644_v35, %v5768_v34  ;;  %v3937_v35 = vld [vmem:[%s4919_s27 + $0x30] sm:$0xff] }
0x14e2   : > { %v4487_v37 = vpop.f32.mrf.mxu0 }
0x14e3   : > { %v3649_v38 = vrot.slane %v3645_v36, 6  ;;  %v3936_v36 = vld [vmem:[%s4919_s27 + $0x28] sm:$0xff]  ;;  %v3935_v37 = vld [vmem:[%s4919_s27 + $0x20] sm:$0xff] }
0x14e5   : > { %3658 = vrot.lane.b32.xlu0 %v3649_v38, %s6042_s3  ;;  %v3651_v43 = vadd.f32 %v3649_v38, %v3573_v42  ;;  %v3934_v38 = vld [vmem:[%s4919_s27 + $0x18] sm:$0xff] }
0x14e7   : > { %v4214_v44 = vmul.f32 -1.442695, %v3651_v43  ;;  %v3931_v43 = vld [vmem:[%s4919_s27] sm:$0xff] }
0x14e9   : > { %4632 = vpow2.f32 %v4214_v44  ;;  %v3958_v44 = vld [vmem:[%s4919_s27 + $0xd8] sm:$0xff] }
0x14f6   : > { %v4633_v45 = vpop.eup %4632 }
0x14f7   : > { %v3655_v47 = vadd.f32 1.0, %v4633_v45  ;;  %v3957_v45 = vld [vmem:[%s4919_s27 + $0xd0] sm:$0xff] }
0x14f9   : > { %4634 = vrcp.f32 %v3655_v47  ;;  %v3956_v47 = vld [vmem:[%s4919_s27 + $0xc8] sm:$0xff] }
0x1506   : > { %v4635_v48 = vpop.eup %4634 }
0x1507   : > { %v3668_v56 = vsub.f32 1.0, %v4635_v48 }
0x1557   : > { %v3659_v29 = vpop.permute.xlu0 %3658 }
0x1558   : > { %v3661_v50 = vmul.f32 %v4635_v48, %v3659_v29  ;;  %v3954_v29 = vld [vmem:[%s4919_s27 + $0xb8] sm:$0xff] }
0x155a   : > { %3663 = vrot.lane.b32.xlu1 %v3661_v50, %s6037_s9  ;;  %v2077_v50 = vrot.slane %v5431_v58, 4 }
0x155e   : > { %3675 = vrot.lane.b32.xlu1 %v3674_v51, %s6034_s7 }
0x15cc   : > { %v3664_v52 = vpop.permute.xlu1 %3663 }
0x15cd   : > { %v3666_v53 = vadd.f32 %v3664_v52, %v3573_v42  ;;  %v3932_v42 = vld [vmem:[%s4919_s27 + $0x8] sm:$0xff]  ;;  %v2433_v52 = vsel %vm1256_vm8, %v5553_v9, 0.0 }
0x15cf   : > { %4636 = vtanh.f32 %v3666_v53  ;;  %v2078_v53 = vadd.f32 %v2077_v50, %v5431_v58 }
0x15d0   : > { %v3676_v55 = vpop.permute.xlu1 %3675 }
0x15d1   : > { %v3678_v60 = vmul.f32 %v4635_v48, %v3676_v55  ;;  %v2434_v55 = vrot.slane %v2433_v52, 4 }
0x15dc   : > { %v4637_v54 = vpop.eup %4636 }
0x15dd   : > { %3670 = vrot.lane.b32.xlu0 %v4637_v54, %s4749_s1 }
0x15e1   : > { %3680 = vrot.lane.b32.xlu0 %v3674_v51, %s6036_s10  ;;  %v3152_v51 = vsel %vm1863_vm14, %v5716_v25, 0.0  ;;  %v3952_v25 = vld [vmem:[%s4919_s27 + $0xa8] sm:$0xff] }
0x15e2   : > { %v3153_v54 = vrot.slane %v3152_v51, 4 }
0x164f   : > { %v3671_v59 = vpop.permute.xlu0 %3670 }
0x1650   : > { %v3673_v61 = vmul.f32 %v3671_v59, %v3668_v56  ;;  %v2744_v56 = vsel %vm1863_vm14, %v5648_v57, 0.0  ;;  %v2079_v59 = vrot.slane %v2078_v53, 2 }
0x1652   : > { %v3679_v15 = vadd.f32 %v3678_v60, %v3673_v61  ;;  %v3154_v60 = vadd.f32 %v3153_v54, %v3152_v51 }
0x1653   : > { %v3681_v62 = vpop.permute.xlu0 %3680 }
0x1654   : > { %v3683_v63 = vmul.f32 %v4635_v48, %v3681_v62  ;;  %3686 = vrot.lane.b32.xlu1 %v3679_v15, %s4749_s1  ;;  %v3955_v48 = vld [vmem:[%s4919_s27 + $0xc0] sm:$0xff]  ;;  %v2745_v15 = vrot.slane %v2744_v56, 4  ;;  %v3953_v62 = vld [vmem:[%s4919_s27 + $0xb0] sm:$0xff]  ;;  %v3155_v58 = vrot.slane %v3154_v60, 2 }
0x1656   : > { %v3684_v0 = vadd.f32 %v3683_v63, %v3673_v61  ;;  %v2435_v61 = vadd.f32 %v2434_v55, %v2433_v52  ;;  %v2080_v63 = vadd.f32 %v2079_v59, %v2078_v53 }
0x1658   : > { %3690 = vrot.lane.b32.xlu0 %v3684_v0, %s6035_s5  ;;  %v2436_v9 = vrot.slane %v2435_v61, 2  ;;  %v2746_v0 = vadd.f32 %v2745_v15, %v2744_v56 }
0x165a   : > { %v2747_v24 = vrot.slane %v2746_v0, 2 }
0x16c6   : > { %v3687_v1 = vpop.permute.xlu1 %3686 }
0x16c7   : > { %3695 = vst.msk [vmem:[#allocation4] sm:$0x4] %vm3694_vm0, %v3687_v1 }
0x16ca   : > { %v3691_v2 = vpop.permute.xlu0 %3690 }
0x16cb   : > { %v3693_v3 = vsel %vm1251_vm7, %v3687_v1, %v3691_v2  ;;  %3697 = vst.msk [vmem:[#allocation4 - $0x1] sm:$0x4] %vm3696_vm2, %v3691_v2  ;;  %v3951_v1 = vld [vmem:[%s4919_s27 + $0xa0] sm:$0xff]  ;;  %vm3816_vm7 = vcmask 125955  }
0x16cc   : > { %v3702_v4 = vrot.slane %v3693_v3, 2  ;;  %v3801_v10 = vrot.slane %v3693_v3, 7  ;;  %v3950_v3 = vld [vmem:[%s4919_s27 + $0x98] sm:$0xff] }
0x16ce   : > { %4497 = vmatmul.mubr.msk.f32.vlgmr.msra.gmra.mxu1 %vm1256_vm8, %v3702_v4 }
0x16cf   : > { %3964 = vmatpush1.msra.mxu1 %v3946_v21  ;;  %v2748_v21 = vadd.f32 %v2747_v24, %v2746_v0 }
0x16d0   : > { %3965 = vmatprep.subr.mxu1 %v4747_v49 }
0x16d1   : > { %3966 = vmatpush1.msra.mxu1 %v3945_v23 }
0x16d2   : > { %3967 = vmatprep.subr.mxu1 %v4747_v49 }
0x16d3   : > { %3968 = vmatpush1.msra.mxu1 %v3944_v26  ;;  %v3947_v26 = vld [vmem:[%s4919_s27 + $0x80] sm:$0xff] }
0x16d4   : > { %3969 = vmatprep.subr.mxu1 %v4747_v49 }
0x16d5   : > { %3970 = vmatpush1.msra.mxu1 %v3943_v22 }
0x16d6   : > { %3971 = vmatprep.subr.mxu1 %v4747_v49 }
0x16d7   : > { %3972 = vmatpush1.msra.mxu1 %v3942_v27 }
0x16d8   : > { %3973 = vmatprep.subr.mxu1 %v4747_v49 }
0x16d9   : > { %3974 = vmatpush1.msra.mxu1 %v3941_v28 }
0x16da   : > { %3975 = vmatprep.subr.mxu1 %v4747_v49 }
0x16db   : > { %3976 = vmatpush1.msra.mxu1 %v3940_v30 }
0x16dc   : > { %3977 = vmatprep.subr.mxu1 %v4747_v49 }
0x16dd   : > { %3978 = vmatpush1.msra.mxu1 %v3939_v32 }
0x16de   : > { %3979 = vmatprep.subr.mxu1 %v4747_v49 }
0x16df   : > { %3980 = vmatpush1.msra.mxu1 %v3938_v33  ;;  %v2749_v33 = vrot.slane %v2748_v21, 1 }
0x16e0   : > { %3981 = vmatprep.subr.mxu1 %v4747_v49 }
0x16e1   : > { %3982 = vmatpush1.msra.mxu1 %v3937_v35 }
0x16e2   : > { %3983 = vmatprep.subr.mxu1 %v4747_v49 }
0x16e3   : > { %3984 = vmatpush1.msra.mxu1 %v3936_v36 }
0x16e4   : > { %3985 = vmatprep.subr.mxu1 %v4747_v49 }
0x16e5   : > { %3986 = vmatpush1.msra.mxu1 %v3935_v37  ;;  %v2750_v37 = vadd.f32 %v2749_v33, %v2748_v21 }
0x16e6   : > { %3987 = vmatprep.subr.mxu1 %v4747_v49 }
0x16e7   : > { %3988 = vmatpush1.msra.mxu1 %v3934_v38  ;;  %v1582_v38 = vrot.slane %v5273_v46, 4 }
0x16e8   : > { %3989 = vmatprep.subr.mxu1 %v4747_v49 }
0x16e9   : > { %3990 = vmatpush1.msra.mxu1 %v3933_v41 }
0x16ea   : > { %3991 = vmatprep.subr.mxu1 %v4747_v49 }
0x16eb   : > { %3992 = vmatpush1.msra.mxu1 %v3932_v42  ;;  %v1583_v42 = vadd.f32 %v1582_v38, %v5273_v46 }
0x16ec   : > { %3993 = vmatprep.subr.mxu1 %v4747_v49 }
0x16ed   : > { %3994 = vmatpush1.msra.mxu1 %v3931_v43 }
0x16ee   : > { %4003 = vmatprep.subr.mxu1 %v4747_v49 }
0x16ef   : > { %4004 = vmatpush2.msra.mxu1 %v3958_v44  ;;  %v1584_v44 = vrot.slane %v1583_v42, 2 }
0x16f0   : > { %4005 = vmatprep.subr.mxu1 %v4747_v49 }
0x16f1   : > { %4006 = vmatpush2.msra.mxu1 %v3957_v45 }
0x16f2   : > { %4007 = vmatprep.subr.mxu1 %v4747_v49 }
0x16f3   : > { %4008 = vmatpush2.msra.mxu1 %v3956_v47  ;;  %v1585_v47 = vadd.f32 %v1584_v44, %v1583_v42 }
0x16f4   : > { %4009 = vmatprep.subr.mxu1 %v4747_v49 }
0x16f5   : > { %4010 = vmatpush2.msra.mxu1 %v3955_v48  ;;  %v1586_v50 = vrot.slane %v1585_v47, 1 }
0x16f6   : > { %4011 = vmatprep.subr.mxu1 %v4747_v49 }
0x16f7   : > { %4012 = vmatpush2.msra.mxu1 %v3954_v29 }
0x16f8   : > { %4013 = vmatprep.subr.mxu1 %v4747_v49 }
0x16f9   : > { %4014 = vmatpush2.msra.mxu1 %v3953_v62 }
0x16fa   : > { %4015 = vmatprep.subr.mxu1 %v4747_v49 }
0x16fb   : > { %4016 = vmatpush2.msra.mxu1 %v3952_v25 }
0x16fc   : > { %4017 = vmatprep.subr.mxu1 %v4747_v49 }
0x16fd   : > { %4018 = vmatpush2.msra.mxu1 %v3951_v1 }
0x16fe   : > { %4019 = vmatprep.subr.mxu1 %v4747_v49 }
0x16ff   : > { %4020 = vmatpush2.msra.mxu1 %v3950_v3 }
0x1700   : > { %4021 = vmatprep.subr.mxu1 %v4747_v49 }
0x178e   : > { %v3771_v5 = vpop.f32.mrf.mxu1 }
0x178f   : > { %v3772_v6 = vadd.f32 %v3771_v5, %v5768_v34  ;;  %v2081_v5 = vrot.slane %v2080_v63, 1 }
0x1790   : > { %v4498_v7 = vpop.f32.mrf.mxu1 }
0x1791   : > { %v3776_v16 = vrot.slane %v3772_v6, 5  ;;  %v3156_v7 = vadd.f32 %v3155_v58, %v3154_v60 }
0x1793   : > { %3785 = vrot.lane.b32.xlu1 %v3776_v16, %s6042_s3  ;;  %v3778_v13 = vadd.f32 %v3776_v16, %v3700_v12  ;;  %v2437_v16 = vadd.f32 %v2436_v9, %v2435_v61 }
0x1795   : > { %v4216_v14 = vmul.f32 -1.442695, %v3778_v13 }
0x1797   : > { %4638 = vpow2.f32 %v4216_v14  ;;  %v3949_v14 = vld [vmem:[%s4919_s27 + $0x90] sm:$0xff] }
0x1798   : > { %4022 = vmatpush2.msra.mxu1 %v3949_v14 }
0x1799   : > { %4023 = vmatprep.subr.mxu1 %v4747_v49 }
0x17a4   : > { %v4639_v8 = vpop.eup %4638 }
0x17a5   : > { %v3782_v11 = vadd.f32 1.0, %v4639_v8 }
0x17a7   : > { %4640 = vrcp.f32 %v3782_v11 }
0x17b4   : > { %v5827_v17 = vpop.eup %4640 }
0x17b5   : > { %v3795_v6 = vsub.f32 1.0, %v5827_v17 }
0x1805   : > { %v3786_v34 = vpop.permute.xlu1 %3785 }
0x1806   : > { %v3788_v18 = vmul.f32 %v5827_v17, %v3786_v34 }
0x1808   : > { %3790 = vrot.lane.b32.xlu0 %v3788_v18, %s6037_s9  ;;  %v3948_v18 = vld [vmem:[%s4919_s27 + $0x88] sm:$0xff] }
0x1809   : > { %4024 = vmatpush2.msra.mxu1 %v3948_v18 }
0x180a   : > { %4025 = vmatprep.subr.mxu1 %v4747_v49 }
0x180b   : > { %4026 = vmatpush2.msra.mxu1 %v3947_v26 }
0x180c   : > { %3802 = vrot.lane.b32.xlu0 %v3801_v10, %s6034_s7 }
0x187a   : > { %v3791_v40 = vpop.permute.xlu0 %3790 }
0x187b   : > { %v3793_v19 = vadd.f32 %v3791_v40, %v3700_v12 }
0x187d   : > { %4642 = vtanh.f32 %v3793_v19  ;;  %v3157_v19 = vrot.slane %v3156_v7, 1 }
0x187e   : > { %v3803_v4 = vpop.permute.xlu0 %3802 }
0x187f   : > { %v3805_v11 = vmul.f32 %v5827_v17, %v3803_v4  ;;  %v3158_v30 = vadd.f32 %v3157_v19, %v3156_v7 }
0x1881   : > { %v3159_v35 = vmul.f32 0.25, %v3158_v30 }
0x188a   : > { %v4643_v20 = vpop.eup %4642 }
0x188b   : > { %3797 = vrot.lane.b32.xlu1 %v4643_v20, %s4749_s1  ;;  %v2438_v20 = vrot.slane %v2437_v16, 1 }
0x188d   : > { %v2439_v32 = vadd.f32 %v2438_v20, %v2437_v16 }
0x188f   : > { %3807 = vrot.lane.b32.xlu1 %v3801_v10, %s6036_s10  ;;  %s6058_s10 = sld [smem:[#allocation30_spill]]  ;;  %v2082_v10 = vadd.f32 %v2081_v5, %v2080_v63  ;;  %v2440_v36 = vmul.f32 0.125, %v2439_v32 }
0x1891   : > { %v2083_v27 = vmul.f32 0.0625, %v2082_v10 }
0x1895   : > { %v3828_v57 = vld [vmem:[%s6058_s10 + $0x18] sm:$0xff]  ;;  %v3827_v2 = vld [vmem:[%s6058_s10 + $0x10] sm:$0xff]  ;;  %v3826_v13 = vld [vmem:[%s6058_s10 + $0x8] sm:$0xff] }
0x1896   : > { %4500 = vmatpush3.msra.mxu0 %v3828_v57  ;;  %v3825_v8 = vld [vmem:[%s6058_s10] sm:$0xff] }
0x1897   : > { %4501 = vmatprep.subr.mxu0 %v4747_v49 }
0x1898   : > { %4502 = vmatpush3.msra.mxu0 %v3827_v2  ;;  %v3959_v2 = vld [vmem:[%s4924_s4] sm:$0x1] }
0x1899   : > { %4503 = vmatprep.subr.mxu0 %v4747_v49 }
0x189a   : > { %4504 = vmatpush3.msra.mxu0 %v3826_v13 }
0x189b   : > { %4505 = vmatprep.subr.mxu0 %v4747_v49  ;;  %v2751_v49 = vmul.f32 0.25, %v2750_v37 }
0x189c   : > { %4506 = vmatpush3.msra.mxu0 %v3825_v8 }
0x18fd   : > { %v3798_v12 = vpop.permute.xlu1 %3797 }
0x18fe   : > { %v3800_v34 = vmul.f32 %v3798_v12, %v3795_v6 }
0x1900   : > { %v3806_v40 = vadd.f32 %v3805_v11, %v3800_v34 }
0x1901   : > { %v3808_v23 = vpop.permute.xlu1 %3807 }
0x1902   : > { %v3810_v22 = vmul.f32 %v5827_v17, %v3808_v23  ;;  %3813 = vrot.lane.b32.xlu0 %v3806_v40, %s4749_s1  ;;  %v2948_v17 = vsel %vm1863_vm14, %v5680_v39, 0.0  ;;  %v1587_v39 = vadd.f32 %v1586_v50, %v1585_v47  ;;  %s1077_s1 = scalar_lea.vmem %s4934_s20, %s4986_s18  ;;  %s4750_s18 = smov [#allocation5]  }
0x1903   : > { %v2949_v41 = vrot.slane %v2948_v17, 4 }
0x1904   : > { %v3811_v28 = vadd.f32 %v3810_v22, %v3800_v34  ;;  %v1588_v46 = vmul.f32 0.03125, %v1587_v39 }
0x1905   : > { %v2950_v43 = vadd.f32 %v2949_v41, %v2948_v17 }
0x1906   : > { %3819 = vrot.lane.b32.xlu1 %v3811_v28, %s6035_s5  ;;  %3908 = vrot.lane.b32.xlu0 %v2083_v27, %s6037_s9  ;;  %s6059_s5 = sld [smem:[#allocation31_spill]] }
0x1907   : > { %v2951_v45 = vrot.slane %v2950_v43, 2 }
0x1909   : > { %v2952_v48 = vadd.f32 %v2951_v45, %v2950_v43 }
0x190a   : > { %3920 = vrot.lane.b32.xlu1 %v3159_v35, %s6037_s9  ;;  %3912 = vrot.lane.b32.xlu0 %v2440_v36, %s6038_s11  ;;  %s1062_s9 = sand.u32 1, %s4696_s23  }
0x190b   : > { %v2953_v51 = vrot.slane %v2952_v48, 1 }
0x190c   : > { %v4208_v0 = vld [vmem:[%s6059_s5] ss:$0 sm:$0xff] }
0x190d   : > { %v2954_v54 = vadd.f32 %v2953_v51, %v2952_v48  ;;  %v3322_v57 = vadd.f32 %v4208_v0, %v5765_v31 }
0x190e   : > { %3923 = vrot.lane.b32.xlu1 %v3159_v35, %s6038_s11  ;;  %3916 = vrot.lane.b32.xlu0 %v2751_v49, %s6042_s3  ;;  %s4172_s3 = sshll.u32 %s1062_s9, 2  ;;  %s4220_s11 = sshll.u32 %s4957_s0, 6 }
0x190f   : > { %v2955_v59 = vmul.f32 0.25, %v2954_v54  ;;  %s1064_s7 = scalar_lea.vmem [#allocation5], %s4172_s3  ;;  %s5933_s8 = scalar_lea.hbm %s4929_s12, %s4220_s11 }
0x1910   : > { %s4052_s6 = sshll.u32 %s1064_s7, 4  ;;  %s4036_s0 = scalar_lea.sflag [#allocation6], %s1062_s9  ;;  %s5935_s6 = int_to_ptr.vmem [resolvable:$true] %s4052_s6 }
0x1911   : > { %s4644_s5 = scalar_lea.vmem %s5935_s6, 64  ;;  %s4648_s3 = sshll.u32 %s4750_s18, 4  ;;  %s4649_s3 = int_to_ptr.vmem [resolvable:$false] %s4648_s3 }
0x1912   : > { %p4645_p11 = scmp.ne.s32.totalorder %s5935_s6, %s4644_s5  ;;  %s4650_s11 = scalar_lea.vmem %s4649_s3, 128 }
0x1913   : > { %p4651_p0 = scmp.lt.s32.totalorder %s5935_s6, %s4649_s3  ;;  %p4652_p1 = scmp.lt.s32.totalorder %s4650_s11, %s4644_s5 }
0x1914   : > { %p4646_p12 = pnand %p4645_p11, %p4974_p5 }
0x1915   : > { %p4653_p2 = por %p4652_p1, %p4651_p0 }
0x1916   : > { %p4647_p13 = pneg %p4646_p12 }
0x1918   : > { %p4654_p3 = pnand %p4653_p2, %p4647_p13 }
0x1974   : > { %v3814_v29 = vpop.permute.xlu0 %3813 }
0x1975   : > { %3817 = vst.msk [vmem:[#allocation4] sm:$0x8] %vm3816_vm7, %v3814_v29 }
0x1978   : > { %v3820_v52 = vpop.permute.xlu1 %3819  ;;  %v3909_v53 = vpop.permute.xlu0 %3908 }
0x1979   : > { %3823 = vst.msk [vmem:[#allocation4 - $0x3] sm:$0x8] %vm3822_vm9, %v3820_v52  ;;  %v3926_v60 = vsel %vm1256_vm8, %v1588_v46, %v3909_v53 }
0x197c   : > { %v3921_v55 = vpop.permute.xlu1 %3920  ;;  %v3913_v56 = vpop.permute.xlu0 %3912 }
0x197d   : > { %v3929_v61 = vsel %vm1256_vm8, %v2955_v59, %v3921_v55  ;;  %v3927_v15 = vsel %vm1266_vm10, %v3926_v60, %v3913_v56 }
0x1980   : > { %v3924_v62 = vpop.permute.xlu1 %3923  ;;  %v3917_v25 = vpop.permute.xlu0 %3916  ;;  %v3824_v63 = vld [vmem:[#allocation4] sm:$0xf] }
0x1981   : > { %v3930_v58 = vsel %vm1266_vm10, %v3929_v61, %v3924_v62  ;;  %v3928_v9 = vsel %vm1276_vm12, %v3927_v15, %v3917_v25  ;;  %4508 = vmatmul.mubr.msk.f32.vlgmr.msra.gmra.mxu0 %vm1256_vm8, %v3824_v63  ;;  %vm4033_vm8 = vcmask 909312  }
0x1982   : > { %4218 = vmatprep.mubr.msk.f32.mxu1 %vm1276_vm12, %v3930_v58 }
0x1983   : > { %4028 = vmatmul.mubr.f32.vlgmr.msra.gmra.mxu1 %v3928_v9 }
0x1a41   : > { %v3898_v1 = vpop.f32.mrf.mxu0 }
0x1a42   : > { %v3902_v3 = vadd.f32 %v3898_v1, %v3322_v57 }
0x1a43   : > { %v4509_v4 = vpop.f32.mrf.mxu0  ;;  %v4029_v5 = vpop.f32.mrf.mxu1 }
0x1a44   : > { %vm3903_vm10 = vcmp.ge.f32.partialorder %v3902_v3, 0.0  ;;  %v3904_v6 = vmul.f32 0.2, %v3902_v3  ;;  %v4030_v7 = vadd.f32 %v4029_v5, %v3959_v2 }
0x1a45   : > { %v4031_v16 = vpop.f32.mrf.mxu1 }
0x1a46   : > { %v3905_v31 = vsel %vm3903_vm10, %v3902_v3, %v3904_v6  ;;  %4034 = vst.msk [vmem:[%s1077_s1] sm:$0x1] %vm4033_vm8, %v4030_v7 }
0x1a47   : > { %3906 = vst.msk [vmem:[%s1064_s7] sm:$0xf] %vm1863_vm14, %v3905_v31 }
0x1a48   : > { %4657 = shalt.err (!%p4654_p3)
}
0x1a49   : > { %s4658_s9 = scalar_lea.hbm %s5933_s8, 64  ;;  %s4662_s7 = scalar_lea.hbm %s4929_s12, 128 }
0x1a4a   : > { %p4659_p4 = scmp.ne.s32.totalorder %s5933_s8, %s4658_s9  ;;  %p4663_p9 = scmp.lt.s32.totalorder %s5933_s8, %s4929_s12 }
0x1a4b   : > { %p4664_p10 = scmp.lt.s32.totalorder %s4662_s7, %s4658_s9 }
0x1a4c   : > { %p4660_p7 = pnand %p4659_p4, %p4974_p5 }
0x1a4d   : > { %p4665_p11 = por %p4664_p10, %p4663_p9 }
0x1a4e   : > { %p4661_p8 = pneg %p4660_p7 }
0x1a50   : > { %p4666_p12 = pnand %p4665_p11, %p4661_p8 }
0x1a52   : > { %4669 = shalt.err (!%p4666_p12)
}
0x1a53   : > { %4510 = dma.vmem_to_hbm [thread:$0]  (%p4974_p5), %s5935_s6, 64, %s5933_s8, %s4036_s0  }
0x1a54 PF: > { %p4516_p13 = scmp.ge.s32.totalorder %s4704_s28, 2  ;;  %s4067_s1 = sand.u32 1, %s4692_s22  }
0x1a55   : > { %s4068_s5 = scalar_lea.sflag [#allocation6], %s4067_s1 }
0x1a56   : > { %p4513_p0 = pnand %p4516_p13, %p4978_p6 }
0x1a58   : > { %p4514_p1 = pneg %p4513_p0 }
0x1a5a   : > { %4687 = dma.done.wait (%p4514_p1), %s4068_s5, 64  }
0x1a5b   : > { %4689 = vsyncadd (%p4514_p1), %s4068_s5, 4294967232  ;;  %s6060_s18 = sld [smem:[#allocation32_spill]]  ;;  %p82_p2 = scmp.ge.s32.totalorder %s4961_s2, 4  }
0x1a5c   : > { %s6061_s22 = smov %s4696_s23  ;;  %s6062_s23 = smov %s4700_s26 }
0x1a5d   : > { %s6064_s28 = smov %s4961_s2  ;;  %84 = sbr.rel (!%p82_p2) target bundleno = 73 (0x49), region = 250 }
0x1a61   : > { %s6063_s26 = smov %s6060_s18 }
0x1a62   :  { %4079 = vsyncpa [#allocation6], 1 }
0x1a63   :  { %4081 = vsyncpa [#allocation6 + $0x1], 1 }

</bundles_post_ra>
